<compile_context>
chip_gen: v6e
topology: v6e:2x2x1
jax: 0.10.0
libtpu: 0.0.40
codegen_flags: <defaults>
</compile_context>

<pallas_src>
import numpy as np
import jax
import jax.numpy as jnp
from jax import lax
from jax.experimental import pallas as pl
from jax.experimental.pallas import tpu as pltpu

_LANE = 128


def _rup(n, m=_LANE):
    return ((n + m - 1) // m) * m


def _pad_to(a, shape):
    pads = [(0, t - s) for s, t in zip(a.shape, shape)]
    if any(p[1] for p in pads):
        return jnp.pad(a, pads)
    return a


# ----------------------------------------------------------------------------
# Kernels
# ----------------------------------------------------------------------------
def _conv_trunk(x, w1_ref, w2_ref, w3_ref, b1_ref, b2a_ref, b2b_ref, pad_ref, H, W):
    """Main branch: conv1(1x1) -> BN/ReLU -> conv2(3x3) -> BN/ReLU -> conv3(1x1) -> BN.

    x: (H*W, Cin_p) bf16.  All BN scales are pre-folded into the weights.
    Returns the main-branch output (H*W, Cout_p) in f32 (bias already added).
    """
    HW = H * W
    P = w1_ref.shape[1]

    # conv1: 1x1 channel matmul on the MXU (bf16 in, f32 acc) + bias + ReLU.
    out1 = jnp.dot(x, w1_ref[...], preferred_element_type=jnp.float32)
    a1 = jnp.maximum(out1 + b1_ref[...], 0.0)

    # Stage a1 into a flat row-haloed buffer: rows [2W, 2W+HW) hold a1, the
    # 2W-row halos above/below stay zero.  Every 3x3 tap then reads a CONTIGUOUS
    # sublane slice (no strided window + reshape copies).
    pad_ref[0:2 * W, :] = jnp.zeros((2 * W, P), jnp.float32)
    pad_ref[2 * W + HW:4 * W + HW, :] = jnp.zeros((2 * W, P), jnp.float32)
    pad_ref[2 * W:2 * W + HW, :] = a1

    # Column masks remove the row-wraparound of the flat layout (dx != 1 taps).
    xcoord = lax.broadcasted_iota(jnp.int32, (HW, 1), 0) % W
    not_left = xcoord != 0            # valid positions for dx == 0 taps
    not_right = xcoord != (W - 1)     # valid positions for dx == 2 taps

    # 3x3 conv as 9 shifted (HW, P) x (P, P) bf16 matmuls accumulated in f32.
    acc = jnp.zeros((HW, P), jnp.float32)
    for dy in range(3):
        for dx in range(3):
            off = (dy + 1) * W + (dx - 1)        # static contiguous row offset
            win = pad_ref[off:off + HW, :]
            if dx == 0:
                win = jnp.where(not_left, win, 0.0)
            elif dx == 2:
                win = jnp.where(not_right, win, 0.0)
            acc = acc + jnp.dot(win.astype(jnp.bfloat16), w2_ref[dy * 3 + dx],
                                preferred_element_type=jnp.float32)

    # BN bias (scale folded into w2) -> ReLU -> conv3 (1x1, s2b folded) -> bias.
    a2 = jnp.maximum(acc + b2a_ref[...], 0.0).astype(jnp.bfloat16)
    out3 = jnp.dot(a2, w3_ref[...], preferred_element_type=jnp.float32)
    return out3 + b2b_ref[...]


def _bottleneck_proj_kernel(x_ref, w1_ref, w2_ref, w3_ref, ws_ref,
                            b1_ref, b2a_ref, b2b_ref, bs_ref,
                            o_ref, pad_ref):
    """Projection-shortcut variant (stride==1, in_planes != expansion*planes)."""
    _, H, W, Cin = x_ref.shape
    x = x_ref[0].reshape(H * W, Cin)                       # bf16
    out3 = _conv_trunk(x, w1_ref, w2_ref, w3_ref,
                       b1_ref, b2a_ref, b2b_ref, pad_ref, H, W)
    xs = jnp.dot(x, ws_ref[...], preferred_element_type=jnp.float32) + bs_ref[...]
    out = jnp.maximum(out3 + xs, 0.0)
    o_ref[0] = out.reshape(H, W, out.shape[-1]).astype(o_ref.dtype)


def _bottleneck_identity_kernel(x_ref, w1_ref, w2_ref, w3_ref,
                                b1_ref, b2a_ref, b2b_ref,
                                o_ref, pad_ref):
    """Identity-shortcut variant: skips the shortcut matmul entirely (out += x)."""
    _, H, W, Cin = x_ref.shape
    x = x_ref[0].reshape(H * W, Cin)                       # bf16
    out3 = _conv_trunk(x, w1_ref, w2_ref, w3_ref,
                       b1_ref, b2a_ref, b2b_ref, pad_ref, H, W)
    out = jnp.maximum(out3 + x.astype(jnp.float32), 0.0)
    o_ref[0] = out.reshape(H, W, out.shape[-1]).astype(o_ref.dtype)


# ----------------------------------------------------------------------------
# Wrapper
# ----------------------------------------------------------------------------
def ara_bottleneck_gcp(x_nchw, ara, params):
    """Forward of ARA_Bottleneck_GCP (inference). Returns (out_nchw, ara)."""
    x = jnp.transpose(x_nchw, (0, 2, 3, 1)).astype(jnp.float32)   # NCHW -> NHWC
    N, H, W, Cin = x.shape
    P = params["w1"].shape[1]
    Cout = params["w3"].shape[1]
    identity = bool(params["identity"])

    # Pad every channel axis to a lane multiple so stores are dense (unmasked)
    # and MXU rows are full; padded channels carry zeros end-to-end.
    Cin_p, P_p, Cout_p = _rup(Cin), _rup(P), _rup(Cout)

    # ---- parameter prep (wrapper glue): fold BN scales into conv weights,
    # pad channels, cast MXU operands to bf16, keep biases in f32. -----------
    bf16, f32 = jnp.bfloat16, jnp.float32
    w1 = _pad_to(params["w1"] * params["s1"][None, :], (Cin_p, P_p)).astype(bf16)
    w2 = (params["w2"] * params["s2a"][None, None, None, :]).reshape(9, P, P)
    w2 = _pad_to(w2, (9, P_p, P_p)).astype(bf16)
    w3 = _pad_to(params["w3"] * params["s2b"][None, :], (P_p, Cout_p)).astype(bf16)
    b1 = _pad_to(params["b1"].reshape(1, P).astype(f32), (1, P_p))
    b2a = _pad_to(params["b2a"].reshape(1, P).astype(f32), (1, P_p))
    b2b = _pad_to(params["b2b"].reshape(1, Cout).astype(f32), (1, Cout_p))
    xp = _pad_to(x, (N, H, W, Cin_p)).astype(bf16)

    def const_spec(shape):
        nd = len(shape)
        return pl.BlockSpec(shape, lambda n, _nd=nd: (0,) * _nd)

    in_arrays = [xp, w1, w2, w3]
    in_specs = [
        pl.BlockSpec((1, H, W, Cin_p), lambda n: (n, 0, 0, 0)),
        const_spec((Cin_p, P_p)),
        const_spec((9, P_p, P_p)),
        const_spec((P_p, Cout_p)),
    ]
    if not identity:
        ws = _pad_to(params["ws"] * params["ss"][None, :], (Cin_p, Cout_p)).astype(bf16)
        in_arrays.append(ws)
        in_specs.append(const_spec((Cin_p, Cout_p)))
    in_arrays += [b1, b2a, b2b]
    in_specs += [const_spec((1, P_p)), const_spec((1, P_p)), const_spec((1, Cout_p))]
    if not identity:
        bs = _pad_to(params["bs"].reshape(1, Cout).astype(f32), (1, Cout_p))
        in_arrays.append(bs)
        in_specs.append(const_spec((1, Cout_p)))

    # Explicit scoped-VMEM budget from the actual block + scratch sizes.
    blk_in = H * W * Cin_p * 2
    blk_out = H * W * Cout_p * 4
    wts = 2 * (Cin_p * P_p + 9 * P_p * P_p + P_p * Cout_p
               + (0 if identity else Cin_p * Cout_p))
    scratch_bytes = (H + 4) * W * P_p * 4
    est = 2 * (blk_in + blk_out + wts) + scratch_bytes
    vmem_limit = int(min(max(2 * est + (8 << 20), 16 << 20), 48 << 20))

    kernel = _bottleneck_identity_kernel if identity else _bottleneck_proj_kernel

    out = pl.pallas_call(
        kernel,
        out_shape=jax.ShapeDtypeStruct((N, H, W, Cout_p), jnp.float32),
        grid_spec=pltpu.PrefetchScalarGridSpec(
            num_scalar_prefetch=0,
            grid=(N,),
            in_specs=in_specs,
            out_specs=pl.BlockSpec((1, H, W, Cout_p), lambda n: (n, 0, 0, 0)),
            scratch_shapes=[pltpu.VMEM(((H + 4) * W, P_p), jnp.float32)],
        ),
        compiler_params=pltpu.CompilerParams(
            dimension_semantics=("parallel",),
            vmem_limit_bytes=vmem_limit,
        ),
    )(*in_arrays)

    out = out[..., :Cout]
    return jnp.transpose(out, (0, 3, 1, 2)), ara                  # NHWC -> NCHW


# ----------------------------------------------------------------------------
# Synthetic parameters / reference
# ----------------------------------------------------------------------------
def init_params(key, in_planes, planes, stride=1, expansion=4, eps=1e-5):
    """Deterministic synthetic parameters (PyTorch shapes, inference-mode BN folded)."""
    assert stride == 1  # TODO(synk): stride > 1 downsample variant not implemented.
    Cout = expansion * planes
    ks = jax.random.split(key, 8)

    def bn_fold(k, c):
        kg, kb, km, kv = jax.random.split(k, 4)
        gamma = 1.0 + 0.1 * jax.random.normal(kg, (c,))
        beta = 0.1 * jax.random.normal(kb, (c,))
        mean = 0.1 * jax.random.normal(km, (c,))
        var = jnp.abs(jax.random.normal(kv, (c,))) + 0.5
        scale = gamma / jnp.sqrt(var + eps)
        bias = beta - mean * scale
        return scale.astype(jnp.float32), bias.astype(jnp.float32)

    w1 = (0.2 * jax.random.normal(ks[0], (in_planes, planes))).astype(jnp.float32)
    w2 = (0.2 * jax.random.normal(ks[1], (3, 3, planes, planes))).astype(jnp.float32)
    w3 = (0.2 * jax.random.normal(ks[2], (planes, Cout))).astype(jnp.float32)
    s1, b1 = bn_fold(ks[3], planes)
    s2a, b2a = bn_fold(ks[4], planes)
    s2b, b2b = bn_fold(ks[5], Cout)

    p = dict(w1=w1, w2=w2, w3=w3, s1=s1, b1=b1, s2a=s2a, b2a=b2a,
             s2b=s2b, b2b=b2b, identity=(stride == 1 and in_planes == Cout))
    if not p["identity"]:
        p["ws"] = (0.2 * jax.random.normal(ks[6], (in_planes, Cout))).astype(jnp.float32)
        p["ss"], p["bs"] = bn_fold(ks[7], Cout)
    return p


def reference(x_nchw, p):
    """Pure-JAX f32 reference of the same forward (for correctness check)."""
    x = jnp.transpose(x_nchw, (0, 2, 3, 1)).astype(jnp.float32)
    out1 = jnp.einsum('nhwc,cp->nhwp', x, p["w1"])
    a1 = jnp.maximum(out1 * p["s1"] + p["b1"], 0.0)
    out2 = lax.conv_general_dilated(a1, p["w2"], (1, 1), 'SAME',
                                    dimension_numbers=('NHWC', 'HWIO', 'NHWC'))
    a2 = jnp.maximum(out2 * p["s2a"] + p["b2a"], 0.0)
    out3 = jnp.einsum('nhwp,pq->nhwq', a2, p["w3"]) * p["s2b"] + p["b2b"]
    if p["identity"]:
        xs = x
    else:
        xs = jnp.einsum('nhwc,cq->nhwq', x, p["ws"]) * p["ss"] + p["bs"]
    out = jnp.maximum(out3 + xs, 0.0)
    return jnp.transpose(out, (0, 3, 1, 2))


if __name__ == "__main__":
    key = jax.random.PRNGKey(0)
    kx, kp1, kp2 = jax.random.split(key, 3)

    N, H, W = 2, 16, 16
    ara = jnp.ones((1,), jnp.float32)          # auxiliary ARA state (passed through)

    # Case 1: projection shortcut (in_planes != expansion * planes).
    in_planes, planes = 4, 4
    x = jax.random.normal(kx, (N, in_planes, H, W), jnp.float32)
    params = init_params(kp1, in_planes, planes, stride=1)
    out, ara_out = ara_bottleneck_gcp(x, ara, params)
    out = jax.block_until_ready(out)
    assert out.shape == (N, 4 * planes, H, W)
    np.testing.assert_allclose(np.asarray(out), np.asarray(reference(x, params)),
                               rtol=2e-2, atol=2e-2)

    # Case 2: identity shortcut (in_planes == expansion * planes) -> specialized kernel.
    in_planes2, planes2 = 16, 4
    x2 = jax.random.normal(kx, (N, in_planes2, H, W), jnp.float32)
    params2 = init_params(kp2, in_planes2, planes2, stride=1)
    out2, _ = ara_bottleneck_gcp(x2, ara, params2)
    out2 = jax.block_until_ready(out2)
    assert out2.shape == (N, 4 * planes2, H, W)
    np.testing.assert_allclose(np.asarray(out2), np.asarray(reference(x2, params2)),
                               rtol=2e-2, atol=2e-2)

    print("KERNEL_OK")
</pallas_src>

<mosaic_0001>
module attributes {stable_mosaic.version = 11 : i64} {
  func.func @_bottleneck_proj_kernel(%arg0: i32, %arg1: memref<1x16x16x128xbf16, #tpu.memory_space<vmem>>, %arg2: memref<128x128xbf16, #tpu.memory_space<vmem>>, %arg3: memref<9x128x128xbf16, #tpu.memory_space<vmem>>, %arg4: memref<128x128xbf16, #tpu.memory_space<vmem>>, %arg5: memref<128x128xbf16, #tpu.memory_space<vmem>>, %arg6: memref<1x128xf32, #tpu.memory_space<vmem>>, %arg7: memref<1x128xf32, #tpu.memory_space<vmem>>, %arg8: memref<1x128xf32, #tpu.memory_space<vmem>>, %arg9: memref<1x128xf32, #tpu.memory_space<vmem>>, %arg10: memref<1x16x16x128xf32, #tpu.memory_space<vmem>>, %arg11: memref<320x128xf32, #tpu.memory_space<vmem>>) attributes {dimension_semantics = [#tpu.dimension_semantics<parallel>], iteration_bounds = array<i64: 2>, scalar_prefetch = 0 : i64, scratch_operands = 1 : i64, tpu.core_type = #tpu.core_type<tc>, window_params = [{transform_indices = @transform_0, window_bounds = array<i64: 1, 16, 16, 128>}, {pipeline_mode = #tpu.pipeline_mode<synchronous>, transform_indices = @transform_1, window_bounds = array<i64: 128, 128>}, {pipeline_mode = #tpu.pipeline_mode<synchronous>, transform_indices = @transform_2, window_bounds = array<i64: 9, 128, 128>}, {pipeline_mode = #tpu.pipeline_mode<synchronous>, transform_indices = @transform_3, window_bounds = array<i64: 128, 128>}, {pipeline_mode = #tpu.pipeline_mode<synchronous>, transform_indices = @transform_4, window_bounds = array<i64: 128, 128>}, {pipeline_mode = #tpu.pipeline_mode<synchronous>, transform_indices = @transform_5, window_bounds = array<i64: 1, 128>}, {pipeline_mode = #tpu.pipeline_mode<synchronous>, transform_indices = @transform_6, window_bounds = array<i64: 1, 128>}, {pipeline_mode = #tpu.pipeline_mode<synchronous>, transform_indices = @transform_7, window_bounds = array<i64: 1, 128>}, {pipeline_mode = #tpu.pipeline_mode<synchronous>, transform_indices = @transform_8, window_bounds = array<i64: 1, 128>}, {transform_indices = @transform_9, window_bounds = array<i64: 1, 16, 16, 128>}]} {
    %c0 = arith.constant 0 : index
    %c0_0 = arith.constant 0 : index
    %c0_1 = arith.constant 0 : index
    %c0_2 = arith.constant 0 : index
    %0 = vector.load %arg1[%c0, %c0_0, %c0_1, %c0_2] : memref<1x16x16x128xbf16, #tpu.memory_space<vmem>>, vector<1x16x16x128xbf16>
    %1 = vector.shape_cast %0 : vector<1x16x16x128xbf16> to vector<16x16x128xbf16>
    %2 = vector.shape_cast %1 : vector<16x16x128xbf16> to vector<256x128xbf16>
    %c0_3 = arith.constant 0 : index
    %c0_4 = arith.constant 0 : index
    %3 = vector.load %arg2[%c0_3, %c0_4] : memref<128x128xbf16, #tpu.memory_space<vmem>>, vector<128x128xbf16>
    %cst = arith.constant dense<0.000000e+00> : vector<256x128xf32>
    %4 = tpu.matmul %2, %3, %cst {dimension_numbers = #tpu.dot_dimension_numbers<[1], [0], [0], [1], [0, 0, 1, 1], [], []>} : vector<256x128xbf16>, vector<128x128xbf16>, vector<256x128xf32> -> vector<256x128xf32>
    %c0_5 = arith.constant 0 : index
    %c0_6 = arith.constant 0 : index
    %5 = vector.load %arg6[%c0_5, %c0_6] : memref<1x128xf32, #tpu.memory_space<vmem>>, vector<1x128xf32>
    %6 = vector.broadcast %5 : vector<1x128xf32> to vector<256x128xf32>
    %7 = arith.addf %4, %6 : vector<256x128xf32>
    %cst_7 = arith.constant 0.000000e+00 : f32
    %8 = vector.broadcast %cst_7 : f32 to vector<256x128xf32>
    %9 = arith.maximumf %7, %8 : vector<256x128xf32>
    %cst_8 = arith.constant 0.000000e+00 : f32
    %10 = vector.broadcast %cst_8 : f32 to vector<32x128xf32>
    %c0_9 = arith.constant 0 : index
    %c0_10 = arith.constant 0 : index
    %11 = vector.load %arg11[%c0_9, %c0_10] : memref<320x128xf32, #tpu.memory_space<vmem>>, vector<32x128xf32>
    tpu.vector_store %arg11[%c0_9, %c0_10], %10 {strides = array<i32>} : memref<320x128xf32, #tpu.memory_space<vmem>>, vector<32x128xf32>,
    %cst_11 = arith.constant 0.000000e+00 : f32
    %12 = vector.broadcast %cst_11 : f32 to vector<32x128xf32>
    %c288 = arith.constant 288 : index
    %c0_12 = arith.constant 0 : index
    %13 = vector.load %arg11[%c288, %c0_12] : memref<320x128xf32, #tpu.memory_space<vmem>>, vector<32x128xf32>
    tpu.vector_store %arg11[%c288, %c0_12], %12 {strides = array<i32>} : memref<320x128xf32, #tpu.memory_space<vmem>>, vector<32x128xf32>,
    %c32 = arith.constant 32 : index
    %c0_13 = arith.constant 0 : index
    %14 = vector.load %arg11[%c32, %c0_13] : memref<320x128xf32, #tpu.memory_space<vmem>>, vector<256x128xf32>
    tpu.vector_store %arg11[%c32, %c0_13], %9 {strides = array<i32>} : memref<320x128xf32, #tpu.memory_space<vmem>>, vector<256x128xf32>,
    %15 = tpu.iota {dimensions = array<i32: 0>} : vector<256x1xi32>
    %c16_i32 = arith.constant 16 : i32
    %c0_i32 = arith.constant 0 : i32
    %16 = arith.cmpi eq, %c16_i32, %c0_i32 : i32
    %c1_i32 = arith.constant 1 : i32
    %17 = arith.select %16, %c1_i32, %c16_i32 : i32
    %18 = vector.broadcast %17 : i32 to vector<256x1xi32>
    %19 = arith.remsi %15, %18 : vector<256x1xi32>
    %c0_i32_14 = arith.constant 0 : i32
    %20 = vector.broadcast %c0_i32_14 : i32 to vector<256x1xi32>
    %21 = arith.cmpi ne, %19, %20 : vector<256x1xi32>
    %c0_i32_15 = arith.constant 0 : i32
    %22 = vector.broadcast %c0_i32_15 : i32 to vector<256x1xi32>
    %23 = arith.cmpi slt, %19, %22 : vector<256x1xi32>
    %c0_i32_16 = arith.constant 0 : i32
    %24 = arith.cmpi slt, %17, %c0_i32_16 : i32
    %25 = vector.broadcast %24 : i1 to vector<256x1xi1>
    %26 = vector.broadcast %25 : vector<256x1xi1> to vector<256x1xi1>
    %27 = arith.xori %23, %26 : vector<256x1xi1>
    %28 = arith.andi %27, %21 : vector<256x1xi1>
    %29 = vector.broadcast %17 : i32 to vector<256x1xi32>
    %30 = arith.addi %19, %29 : vector<256x1xi32>
    %31 = arith.select %28, %30, %19 : vector<256x1xi1>, vector<256x1xi32>
    %c0_i32_17 = arith.constant 0 : i32
    %32 = vector.broadcast %c0_i32_17 : i32 to vector<256x1xi32>
    %33 = arith.cmpi ne, %31, %32 : vector<256x1xi32>
    %c15_i32 = arith.constant 15 : i32
    %34 = vector.broadcast %c15_i32 : i32 to vector<256x1xi32>
    %35 = arith.cmpi ne, %31, %34 : vector<256x1xi32>
    %cst_18 = arith.constant 0.000000e+00 : f32
    %36 = vector.broadcast %cst_18 : f32 to vector<256x128xf32>
    %c15 = arith.constant 15 : index
    %c0_19 = arith.constant 0 : index
    %37 = vector.load %arg11[%c15, %c0_19] : memref<320x128xf32, #tpu.memory_space<vmem>>, vector<256x128xf32>
    %cst_20 = arith.constant 0.000000e+00 : f32
    %38 = vector.shape_cast %33 : vector<256x1xi1> to vector<256x1xi1>
    %39 = vector.broadcast %38 : vector<256x1xi1> to vector<256x128xi1>
    %40 = vector.broadcast %cst_20 : f32 to vector<256x128xf32>
    %41 = arith.select %39, %37, %40 : vector<256x128xi1>, vector<256x128xf32>
    %42 = arith.truncf %41 : vector<256x128xf32> to vector<256x128xbf16>
    %c0_21 = arith.constant 0 : index
    %c0_22 = arith.constant 0 : index
    %c0_23 = arith.constant 0 : index
    %43 = vector.load %arg3[%c0_21, %c0_22, %c0_23] : memref<9x128x128xbf16, #tpu.memory_space<vmem>>, vector<1x128x128xbf16>
    %44 = vector.shape_cast %43 : vector<1x128x128xbf16> to vector<128x128xbf16>
    %cst_24 = arith.constant dense<0.000000e+00> : vector<256x128xf32>
    %45 = tpu.matmul %42, %44, %cst_24 {dimension_numbers = #tpu.dot_dimension_numbers<[1], [0], [0], [1], [0, 0, 1, 1], [], []>} : vector<256x128xbf16>, vector<128x128xbf16>, vector<256x128xf32> -> vector<256x128xf32>
    %46 = arith.addf %36, %45 : vector<256x128xf32>
    %c16 = arith.constant 16 : index
    %c0_25 = arith.constant 0 : index
    %47 = vector.load %arg11[%c16, %c0_25] : memref<320x128xf32, #tpu.memory_space<vmem>>, vector<256x128xf32>
    %48 = arith.truncf %47 : vector<256x128xf32> to vector<256x128xbf16>
    %c1 = arith.constant 1 : index
    %c0_26 = arith.constant 0 : index
    %c0_27 = arith.constant 0 : index
    %49 = vector.load %arg3[%c1, %c0_26, %c0_27] : memref<9x128x128xbf16, #tpu.memory_space<vmem>>, vector<1x128x128xbf16>
    %50 = vector.shape_cast %49 : vector<1x128x128xbf16> to vector<128x128xbf16>
    %cst_28 = arith.constant dense<0.000000e+00> : vector<256x128xf32>
    %51 = tpu.matmul %48, %50, %cst_28 {dimension_numbers = #tpu.dot_dimension_numbers<[1], [0], [0], [1], [0, 0, 1, 1], [], []>} : vector<256x128xbf16>, vector<128x128xbf16>, vector<256x128xf32> -> vector<256x128xf32>
    %52 = arith.addf %46, %51 : vector<256x128xf32>
    %c17 = arith.constant 17 : index
    %c0_29 = arith.constant 0 : index
    %53 = vector.load %arg11[%c17, %c0_29] : memref<320x128xf32, #tpu.memory_space<vmem>>, vector<256x128xf32>
    %cst_30 = arith.constant 0.000000e+00 : f32
    %54 = vector.shape_cast %35 : vector<256x1xi1> to vector<256x1xi1>
    %55 = vector.broadcast %54 : vector<256x1xi1> to vector<256x128xi1>
    %56 = vector.broadcast %cst_30 : f32 to vector<256x128xf32>
    %57 = arith.select %55, %53, %56 : vector<256x128xi1>, vector<256x128xf32>
    %58 = arith.truncf %57 : vector<256x128xf32> to vector<256x128xbf16>
    %c2 = arith.constant 2 : index
    %c0_31 = arith.constant 0 : index
    %c0_32 = arith.constant 0 : index
    %59 = vector.load %arg3[%c2, %c0_31, %c0_32] : memref<9x128x128xbf16, #tpu.memory_space<vmem>>, vector<1x128x128xbf16>
    %60 = vector.shape_cast %59 : vector<1x128x128xbf16> to vector<128x128xbf16>
    %cst_33 = arith.constant dense<0.000000e+00> : vector<256x128xf32>
    %61 = tpu.matmul %58, %60, %cst_33 {dimension_numbers = #tpu.dot_dimension_numbers<[1], [0], [0], [1], [0, 0, 1, 1], [], []>} : vector<256x128xbf16>, vector<128x128xbf16>, vector<256x128xf32> -> vector<256x128xf32>
    %62 = arith.addf %52, %61 : vector<256x128xf32>
    %c31 = arith.constant 31 : index
    %c0_34 = arith.constant 0 : index
    %63 = vector.load %arg11[%c31, %c0_34] : memref<320x128xf32, #tpu.memory_space<vmem>>, vector<256x128xf32>
    %cst_35 = arith.constant 0.000000e+00 : f32
    %64 = vector.shape_cast %33 : vector<256x1xi1> to vector<256x1xi1>
    %65 = vector.broadcast %64 : vector<256x1xi1> to vector<256x128xi1>
    %66 = vector.broadcast %cst_35 : f32 to vector<256x128xf32>
    %67 = arith.select %65, %63, %66 : vector<256x128xi1>, vector<256x128xf32>
    %68 = arith.truncf %67 : vector<256x128xf32> to vector<256x128xbf16>
    %c3 = arith.constant 3 : index
    %c0_36 = arith.constant 0 : index
    %c0_37 = arith.constant 0 : index
    %69 = vector.load %arg3[%c3, %c0_36, %c0_37] : memref<9x128x128xbf16, #tpu.memory_space<vmem>>, vector<1x128x128xbf16>
    %70 = vector.shape_cast %69 : vector<1x128x128xbf16> to vector<128x128xbf16>
    %cst_38 = arith.constant dense<0.000000e+00> : vector<256x128xf32>
    %71 = tpu.matmul %68, %70, %cst_38 {dimension_numbers = #tpu.dot_dimension_numbers<[1], [0], [0], [1], [0, 0, 1, 1], [], []>} : vector<256x128xbf16>, vector<128x128xbf16>, vector<256x128xf32> -> vector<256x128xf32>
    %72 = arith.addf %62, %71 : vector<256x128xf32>
    %c32_39 = arith.constant 32 : index
    %c0_40 = arith.constant 0 : index
    %73 = vector.load %arg11[%c32_39, %c0_40] : memref<320x128xf32, #tpu.memory_space<vmem>>, vector<256x128xf32>
    %74 = arith.truncf %73 : vector<256x128xf32> to vector<256x128xbf16>
    %c4 = arith.constant 4 : index
    %c0_41 = arith.constant 0 : index
    %c0_42 = arith.constant 0 : index
    %75 = vector.load %arg3[%c4, %c0_41, %c0_42] : memref<9x128x128xbf16, #tpu.memory_space<vmem>>, vector<1x128x128xbf16>
    %76 = vector.shape_cast %75 : vector<1x128x128xbf16> to vector<128x128xbf16>
    %cst_43 = arith.constant dense<0.000000e+00> : vector<256x128xf32>
    %77 = tpu.matmul %74, %76, %cst_43 {dimension_numbers = #tpu.dot_dimension_numbers<[1], [0], [0], [1], [0, 0, 1, 1], [], []>} : vector<256x128xbf16>, vector<128x128xbf16>, vector<256x128xf32> -> vector<256x128xf32>
    %78 = arith.addf %72, %77 : vector<256x128xf32>
    %c33 = arith.constant 33 : index
    %c0_44 = arith.constant 0 : index
    %79 = vector.load %arg11[%c33, %c0_44] : memref<320x128xf32, #tpu.memory_space<vmem>>, vector<256x128xf32>
    %cst_45 = arith.constant 0.000000e+00 : f32
    %80 = vector.shape_cast %35 : vector<256x1xi1> to vector<256x1xi1>
    %81 = vector.broadcast %80 : vector<256x1xi1> to vector<256x128xi1>
    %82 = vector.broadcast %cst_45 : f32 to vector<256x128xf32>
    %83 = arith.select %81, %79, %82 : vector<256x128xi1>, vector<256x128xf32>
    %84 = arith.truncf %83 : vector<256x128xf32> to vector<256x128xbf16>
    %c5 = arith.constant 5 : index
    %c0_46 = arith.constant 0 : index
    %c0_47 = arith.constant 0 : index
    %85 = vector.load %arg3[%c5, %c0_46, %c0_47] : memref<9x128x128xbf16, #tpu.memory_space<vmem>>, vector<1x128x128xbf16>
    %86 = vector.shape_cast %85 : vector<1x128x128xbf16> to vector<128x128xbf16>
    %cst_48 = arith.constant dense<0.000000e+00> : vector<256x128xf32>
    %87 = tpu.matmul %84, %86, %cst_48 {dimension_numbers = #tpu.dot_dimension_numbers<[1], [0], [0], [1], [0, 0, 1, 1], [], []>} : vector<256x128xbf16>, vector<128x128xbf16>, vector<256x128xf32> -> vector<256x128xf32>
    %88 = arith.addf %78, %87 : vector<256x128xf32>
    %c47 = arith.constant 47 : index
    %c0_49 = arith.constant 0 : index
    %89 = vector.load %arg11[%c47, %c0_49] : memref<320x128xf32, #tpu.memory_space<vmem>>, vector<256x128xf32>
    %cst_50 = arith.constant 0.000000e+00 : f32
    %90 = vector.shape_cast %33 : vector<256x1xi1> to vector<256x1xi1>
    %91 = vector.broadcast %90 : vector<256x1xi1> to vector<256x128xi1>
    %92 = vector.broadcast %cst_50 : f32 to vector<256x128xf32>
    %93 = arith.select %91, %89, %92 : vector<256x128xi1>, vector<256x128xf32>
    %94 = arith.truncf %93 : vector<256x128xf32> to vector<256x128xbf16>
    %c6 = arith.constant 6 : index
    %c0_51 = arith.constant 0 : index
    %c0_52 = arith.constant 0 : index
    %95 = vector.load %arg3[%c6, %c0_51, %c0_52] : memref<9x128x128xbf16, #tpu.memory_space<vmem>>, vector<1x128x128xbf16>
    %96 = vector.shape_cast %95 : vector<1x128x128xbf16> to vector<128x128xbf16>
    %cst_53 = arith.constant dense<0.000000e+00> : vector<256x128xf32>
    %97 = tpu.matmul %94, %96, %cst_53 {dimension_numbers = #tpu.dot_dimension_numbers<[1], [0], [0], [1], [0, 0, 1, 1], [], []>} : vector<256x128xbf16>, vector<128x128xbf16>, vector<256x128xf32> -> vector<256x128xf32>
    %98 = arith.addf %88, %97 : vector<256x128xf32>
    %c48 = arith.constant 48 : index
    %c0_54 = arith.constant 0 : index
    %99 = vector.load %arg11[%c48, %c0_54] : memref<320x128xf32, #tpu.memory_space<vmem>>, vector<256x128xf32>
    %100 = arith.truncf %99 : vector<256x128xf32> to vector<256x128xbf16>
    %c7 = arith.constant 7 : index
    %c0_55 = arith.constant 0 : index
    %c0_56 = arith.constant 0 : index
    %101 = vector.load %arg3[%c7, %c0_55, %c0_56] : memref<9x128x128xbf16, #tpu.memory_space<vmem>>, vector<1x128x128xbf16>
    %102 = vector.shape_cast %101 : vector<1x128x128xbf16> to vector<128x128xbf16>
    %cst_57 = arith.constant dense<0.000000e+00> : vector<256x128xf32>
    %103 = tpu.matmul %100, %102, %cst_57 {dimension_numbers = #tpu.dot_dimension_numbers<[1], [0], [0], [1], [0, 0, 1, 1], [], []>} : vector<256x128xbf16>, vector<128x128xbf16>, vector<256x128xf32> -> vector<256x128xf32>
    %104 = arith.addf %98, %103 : vector<256x128xf32>
    %c49 = arith.constant 49 : index
    %c0_58 = arith.constant 0 : index
    %105 = vector.load %arg11[%c49, %c0_58] : memref<320x128xf32, #tpu.memory_space<vmem>>, vector<256x128xf32>
    %cst_59 = arith.constant 0.000000e+00 : f32
    %106 = vector.shape_cast %35 : vector<256x1xi1> to vector<256x1xi1>
    %107 = vector.broadcast %106 : vector<256x1xi1> to vector<256x128xi1>
    %108 = vector.broadcast %cst_59 : f32 to vector<256x128xf32>
    %109 = arith.select %107, %105, %108 : vector<256x128xi1>, vector<256x128xf32>
    %110 = arith.truncf %109 : vector<256x128xf32> to vector<256x128xbf16>
    %c8 = arith.constant 8 : index
    %c0_60 = arith.constant 0 : index
    %c0_61 = arith.constant 0 : index
    %111 = vector.load %arg3[%c8, %c0_60, %c0_61] : memref<9x128x128xbf16, #tpu.memory_space<vmem>>, vector<1x128x128xbf16>
    %112 = vector.shape_cast %111 : vector<1x128x128xbf16> to vector<128x128xbf16>
    %cst_62 = arith.constant dense<0.000000e+00> : vector<256x128xf32>
    %113 = tpu.matmul %110, %112, %cst_62 {dimension_numbers = #tpu.dot_dimension_numbers<[1], [0], [0], [1], [0, 0, 1, 1], [], []>} : vector<256x128xbf16>, vector<128x128xbf16>, vector<256x128xf32> -> vector<256x128xf32>
    %114 = arith.addf %104, %113 : vector<256x128xf32>
    %c0_63 = arith.constant 0 : index
    %c0_64 = arith.constant 0 : index
    %115 = vector.load %arg7[%c0_63, %c0_64] : memref<1x128xf32, #tpu.memory_space<vmem>>, vector<1x128xf32>
    %116 = vector.broadcast %115 : vector<1x128xf32> to vector<256x128xf32>
    %117 = arith.addf %114, %116 : vector<256x128xf32>
    %cst_65 = arith.constant 0.000000e+00 : f32
    %118 = vector.broadcast %cst_65 : f32 to vector<256x128xf32>
    %119 = arith.maximumf %117, %118 : vector<256x128xf32>
    %120 = arith.truncf %119 : vector<256x128xf32> to vector<256x128xbf16>
    %c0_66 = arith.constant 0 : index
    %c0_67 = arith.constant 0 : index
    %121 = vector.load %arg4[%c0_66, %c0_67] : memref<128x128xbf16, #tpu.memory_space<vmem>>, vector<128x128xbf16>
    %cst_68 = arith.constant dense<0.000000e+00> : vector<256x128xf32>
    %122 = tpu.matmul %120, %121, %cst_68 {dimension_numbers = #tpu.dot_dimension_numbers<[1], [0], [0], [1], [0, 0, 1, 1], [], []>} : vector<256x128xbf16>, vector<128x128xbf16>, vector<256x128xf32> -> vector<256x128xf32>
    %c0_69 = arith.constant 0 : index
    %c0_70 = arith.constant 0 : index
    %123 = vector.load %arg8[%c0_69, %c0_70] : memref<1x128xf32, #tpu.memory_space<vmem>>, vector<1x128xf32>
    %124 = vector.broadcast %123 : vector<1x128xf32> to vector<256x128xf32>
    %125 = arith.addf %122, %124 : vector<256x128xf32>
    %c0_71 = arith.constant 0 : index
    %c0_72 = arith.constant 0 : index
    %126 = vector.load %arg5[%c0_71, %c0_72] : memref<128x128xbf16, #tpu.memory_space<vmem>>, vector<128x128xbf16>
    %cst_73 = arith.constant dense<0.000000e+00> : vector<256x128xf32>
    %127 = tpu.matmul %2, %126, %cst_73 {dimension_numbers = #tpu.dot_dimension_numbers<[1], [0], [0], [1], [0, 0, 1, 1], [], []>} : vector<256x128xbf16>, vector<128x128xbf16>, vector<256x128xf32> -> vector<256x128xf32>
    %c0_74 = arith.constant 0 : index
    %c0_75 = arith.constant 0 : index
    %128 = vector.load %arg9[%c0_74, %c0_75] : memref<1x128xf32, #tpu.memory_space<vmem>>, vector<1x128xf32>
    %129 = vector.broadcast %128 : vector<1x128xf32> to vector<256x128xf32>
    %130 = arith.addf %127, %129 : vector<256x128xf32>
    %131 = arith.addf %125, %130 : vector<256x128xf32>
    %cst_76 = arith.constant 0.000000e+00 : f32
    %132 = vector.broadcast %cst_76 : f32 to vector<256x128xf32>
    %133 = arith.maximumf %131, %132 : vector<256x128xf32>
    %134 = vector.shape_cast %133 : vector<256x128xf32> to vector<16x16x128xf32>
    %c0_77 = arith.constant 0 : index
    %c0_78 = arith.constant 0 : index
    %c0_79 = arith.constant 0 : index
    %c0_80 = arith.constant 0 : index
    %135 = vector.load %arg10[%c0_77, %c0_78, %c0_79, %c0_80] : memref<1x16x16x128xf32, #tpu.memory_space<vmem>>, vector<1x16x16x128xf32>
    %136 = vector.shape_cast %135 : vector<1x16x16x128xf32> to vector<16x16x128xf32>
    %137 = vector.shape_cast %134 : vector<16x16x128xf32> to vector<1x16x16x128xf32>
    tpu.vector_store %arg10[%c0_77, %c0_78, %c0_79, %c0_80], %137 {strides = array<i32>} : memref<1x16x16x128xf32, #tpu.memory_space<vmem>>, vector<1x16x16x128xf32>,
    return
  }
  func.func @transform_0(%arg0: i32) -> (i32, i32, i32, i32) {
    %c0_i32 = arith.constant 0 : i32
    %c0_i32_0 = arith.constant 0 : i32
    %c0_i32_1 = arith.constant 0 : i32
    %c0_i32_2 = arith.constant 0 : i32
    return %arg0, %c0_i32, %c0_i32_0, %c0_i32_1 : i32, i32, i32, i32
  }
  func.func @transform_1(%arg0: i32) -> (i32, i32) {
    %c0_i32 = arith.constant 0 : i32
    %c0_i32_0 = arith.constant 0 : i32
    %c0_i32_1 = arith.constant 0 : i32
    return %c0_i32, %c0_i32_0 : i32, i32
  }
  func.func @transform_2(%arg0: i32) -> (i32, i32, i32) {
    %c0_i32 = arith.constant 0 : i32
    %c0_i32_0 = arith.constant 0 : i32
    %c0_i32_1 = arith.constant 0 : i32
    %c0_i32_2 = arith.constant 0 : i32
    return %c0_i32, %c0_i32_0, %c0_i32_1 : i32, i32, i32
  }
  func.func @transform_3(%arg0: i32) -> (i32, i32) {
    %c0_i32 = arith.constant 0 : i32
    %c0_i32_0 = arith.constant 0 : i32
    %c0_i32_1 = arith.constant 0 : i32
    return %c0_i32, %c0_i32_0 : i32, i32
  }
  func.func @transform_4(%arg0: i32) -> (i32, i32) {
    %c0_i32 = arith.constant 0 : i32
    %c0_i32_0 = arith.constant 0 : i32
    %c0_i32_1 = arith.constant 0 : i32
    return %c0_i32, %c0_i32_0 : i32, i32
  }
  func.func @transform_5(%arg0: i32) -> (i32, i32) {
    %c0_i32 = arith.constant 0 : i32
    %c0_i32_0 = arith.constant 0 : i32
    %c0_i32_1 = arith.constant 0 : i32
    return %c0_i32, %c0_i32_0 : i32, i32
  }
  func.func @transform_6(%arg0: i32) -> (i32, i32) {
    %c0_i32 = arith.constant 0 : i32
    %c0_i32_0 = arith.constant 0 : i32
    %c0_i32_1 = arith.constant 0 : i32
    return %c0_i32, %c0_i32_0 : i32, i32
  }
  func.func @transform_7(%arg0: i32) -> (i32, i32) {
    %c0_i32 = arith.constant 0 : i32
    %c0_i32_0 = arith.constant 0 : i32
    %c0_i32_1 = arith.constant 0 : i32
    return %c0_i32, %c0_i32_0 : i32, i32
  }
  func.func @transform_8(%arg0: i32) -> (i32, i32) {
    %c0_i32 = arith.constant 0 : i32
    %c0_i32_0 = arith.constant 0 : i32
    %c0_i32_1 = arith.constant 0 : i32
    return %c0_i32, %c0_i32_0 : i32, i32
  }
  func.func @transform_9(%arg0: i32) -> (i32, i32, i32, i32) {
    %c0_i32 = arith.constant 0 : i32
    %c0_i32_0 = arith.constant 0 : i32
    %c0_i32_1 = arith.constant 0 : i32
    %c0_i32_2 = arith.constant 0 : i32
    return %arg0, %c0_i32, %c0_i32_0, %c0_i32_1 : i32, i32, i32, i32
  }
}

</mosaic_0001>

<bundles_post_ra>
// kernel: tpu_custom_call.1
= control target key start
LH: loop header
LB: loop body
LE: loop exit
PB: predicated region body
PF: predicated region fallthrough
CT: control target
= control target key end

     0   :  { %s8579_s0 = inlined_call_operand.hbm [shape: bf16[2,16,16,128], index: 0, kind: input, shape index: {}]   ;;  %s8580_s1 = inlined_call_operand.hbm [shape: bf16[128,128], index: 1, kind: input, shape index: {}]   ;;  %s8581_s2 = inlined_call_operand.hbm [shape: bf16[9,128,128], index: 2, kind: input, shape index: {}]   ;;  %s8582_s3 = inlined_call_operand.hbm [shape: bf16[128,128], index: 3, kind: input, shape index: {}]   ;;  %s8583_s4 = inlined_call_operand.hbm [shape: bf16[128,128], index: 4, kind: input, shape index: {}]   ;;  %s8584_s5 = inlined_call_operand.vmem [shape: f32[1,128], index: 5, kind: input, shape index: {}]   ;;  %s8585_s6 = inlined_call_operand.vmem [shape: f32[1,128], index: 6, kind: input, shape index: {}]   ;;  %s8586_s7 = inlined_call_operand.vmem [shape: f32[1,128], index: 7, kind: input, shape index: {}]   ;;  %s8587_s8 = inlined_call_operand.vmem [shape: f32[1,128], index: 8, kind: input, shape index: {}]   ;;  %s8588_s9 = inlined_call_operand.hbm [shape: f32[2,16,16,128], index: 9, kind: output, shape index: {}]  }
   0x1   :  { %8629 = sst [smem:[#allocation44_spill]] %s8580_s1 }
   0x2   :  { %8630 = sst [smem:[#allocation45_spill]] %s8581_s2 }
   0x3   :  { %8631 = sst [smem:[#allocation46_spill]] %s8582_s3 }
   0x4   :  { %14 = vsyncpa [#allocation4], 0 }
   0x5   :  { %16 = vsyncpa [#allocation4 + $0x1], 0 }
   0x6   :  { %17 = vsyncpa [#allocation7], 0 }
   0x7   :  { %18 = vsyncpa [#allocation10], 0 }
   0x8   :  { %19 = vsyncpa [#allocation5], 0 }
   0x9   :  { %21 = vsyncpa [#allocation5 + $0x1], 0  ;;  %s6887_s30 = smov 0   ;;  %s6889_s10 = smov 0  }
   0xa   :  { %s6891_s11 = smov 0   ;;  %s6893_s12 = smov 0  }
   0xb LB: > { %s6908_s13 = sadd.s32 4294967295, %s6822_s12   ;;  %s5104_s14 = sadd.s32 4294967294, %s6822_s12   ;;  %s6822_s12 = sphi %s6893_s12, %s8828_s12   ;;  %s6818_s11 = sphi %s6891_s11, %s8827_s11   ;;  %s6814_s10 = sphi %s6889_s10, %s8826_s10   ;;  %s6810_s30 = sphi %s6887_s30, %s8825_s30  }
   0xc   : > { %p47_p0 = scmp.ne.s32.totalorder %s6814_s10, %s6810_s30  ;;  %p8589_p1 = scmp.eq.s32.totalorder %s6908_s13, 0 }
   0xd   : > { %p239_p2 = scmp.eq.s32.totalorder %s6908_s13, 1  ;;  %p245_p3 = scmp.eq.s32.totalorder %s5104_s14, 1 }
   0xe   : > { %p6917_p4 = por %p8589_p1, %p47_p0  ;;  %p5105_p5 = scmp.ge.s32.totalorder %s6822_s12, 1 }
   0xf   : > { %p6922_p6 = por %p245_p3, %p47_p0  ;;  %p252_p7 = scmp.lt.s32.totalorder %s6822_s12, 3 }
  0x10   : > { %s8632_s15 = scalar_select %p6917_p4, 1, 0 }
  0x11   : > { %s8633_s16 = scalar_select %p6922_p6, 1, 0 }
  0x12   : > { %p6927_p8 = pnand %p5105_p5, %p252_p7  ;;  %s6824_s18 = smov [#allocation6]  }
  0x13   : > { %s264_s19 = sshll.u32 %s6824_s18, 4  ;;  %s6825_s21 = smov [#allocation9]   ;;  %s265_s19 = int_to_ptr.vmem [resolvable:$true] %s264_s19 }
  0x14   : > { %s8634_s17 = scalar_select %p6927_p8, 1, 0 }
  0x15   : > { %p6416_p9 = pneg %p6927_p8  ;;  %s290_s22 = sshll.u32 %s6825_s21, 4  ;;  %s291_s22 = int_to_ptr.vmem [resolvable:$true] %s290_s22 }
  0x16   : > { %s6826_s23 = smov [#allocation8]   ;;  %s6629_s25 = scalar_lea.vmem %s265_s19, 1024 }
  0x17   : > { %p6936_p11 = pnand %p6416_p9, %p8589_p1  ;;  %s277_s24 = sshll.u32 %s6826_s23, 4  ;;  %s278_s24 = int_to_ptr.vmem [resolvable:$true] %s277_s24 }
  0x18   : > { %p6630_p13 = scmp.ne.s32.totalorder %s265_s19, %s6629_s25  ;;  %p6637_p5 = scmp.lt.s32.totalorder %s265_s19, %s265_s19 }
  0x19   : > { %p6620_p12 = pneg %p6936_p11  ;;  %p6638_p7 = scmp.lt.s32.totalorder %s6629_s25, %s6629_s25 }
  0x1b   : > { %p6632_p0 = pnand %p6630_p13, %p6620_p12  ;;  %p6639_p9 = por %p6638_p7, %p6637_p5 }
  0x1d   : > { %p6633_p3 = pneg %p6632_p0 }
  0x1f   : > { %p6640_p10 = pnand %p6639_p9, %p6633_p3 }
  0x21   : > { %6643 = shalt.err (!%p6640_p10)
}
  0x22   : > { %s8590_s26 = smov 64   ;;  %s8591_s27 = smov 4  }
  0x23   : > { %s8636_s1 = sld [smem:[#allocation44_spill]]  ;;  %s6655_s14 = scalar_lea.vmem %s291_s22, 1024 }
  0x24   : > { %p6656_p13 = scmp.ne.s32.totalorder %s291_s22, %s6655_s14  ;;  %p6663_p3 = scmp.lt.s32.totalorder %s291_s22, %s291_s22 }
  0x25   : > { %p6664_p10 = scmp.lt.s32.totalorder %s6655_s14, %s6655_s14 }
  0x26   : > { %p6658_p0 = pnand %p6656_p13, %p6620_p12 }
  0x27   : > { %p6665_p7 = por %p6664_p10, %p6663_p3 }
  0x28   : > { %p6659_p5 = pneg %p6658_p0 }
  0x29   : > { %6419 = dma.hbm_to_vmem [thread:$0]  (!%p6936_p11), %s8636_s1, 1024, %s265_s19, [#allocation7], %s8590_s26, %s8590_s26, %s8591_s27  }
  0x2a   : > { %p6666_p9 = pnand %p6665_p7, %p6659_p5 }
  0x2c   : > { %6669 = shalt.err (!%p6666_p9)
}
  0x2d   : > { %s8637_s3 = sld [smem:[#allocation46_spill]]  ;;  %s6681_s19 = scalar_lea.vmem %s278_s24, 9216 }
  0x2e   : > { %p6682_p1 = scmp.ne.s32.totalorder %s278_s24, %s6681_s19  ;;  %p6689_p3 = scmp.lt.s32.totalorder %s278_s24, %s278_s24 }
  0x2f   : > { %p6690_p5 = scmp.lt.s32.totalorder %s6681_s19, %s6681_s19 }
  0x30   : > { %p6684_p13 = pnand %p6682_p1, %p6620_p12 }
  0x31   : > { %p6691_p10 = por %p6690_p5, %p6689_p3 }
  0x32   : > { %p6685_p0 = pneg %p6684_p13 }
  0x33   : > { %6425 = dma.hbm_to_vmem [thread:$0]  (!%p6936_p11), %s8637_s3, 1024, %s291_s22, [#allocation10], %s8590_s26, %s8590_s26, %s8591_s27  }
  0x34   : > { %p6692_p7 = pnand %p6691_p10, %p6685_p0 }
  0x36   : > { %6695 = shalt.err (!%p6692_p7)
}
  0x37   : > { %s8638_s2 = sld [smem:[#allocation45_spill]]  ;;  %s6829_s22 = smov [#allocation11]  }
  0x38   : > { %s303_s28 = sshll.u32 %s6829_s22, 4  ;;  %s304_s28 = int_to_ptr.vmem [resolvable:$true] %s303_s28 }
  0x39   : > { %s6707_s29 = scalar_lea.vmem %s304_s28, 1024  ;;  %p6715_p0 = scmp.lt.s32.totalorder %s304_s28, %s304_s28 }
  0x3a   : > { %p6708_p1 = scmp.ne.s32.totalorder %s304_s28, %s6707_s29  ;;  %p6716_p3 = scmp.lt.s32.totalorder %s6707_s29, %s6707_s29 }
  0x3c   : > { %p6710_p9 = pnand %p6708_p1, %p6620_p12  ;;  %p6717_p5 = por %p6716_p3, %p6715_p0 }
  0x3d   : > { %6422 = dma.hbm_to_vmem [thread:$0]  (!%p6936_p11), %s8638_s2, 9216, %s278_s24, [#allocation7], %s8590_s26, %s8590_s26, %s8591_s27  }
  0x3e   : > { %p6711_p13 = pneg %p6710_p9 }
  0x40   : > { %p6718_p10 = pnand %p6717_p5, %p6711_p13 }
  0x42   : > { %6721 = shalt.err (!%p6718_p10)
}
  0x43   : > { %6428 = dma.hbm_to_vmem [thread:$0]  (!%p6936_p11), %s8583_s4, 1024, %s304_s28, [#allocation10], %s8590_s26, %s8590_s26, %s8591_s27  }
  0x44   : > { %s6987_s18 = sadd.s32 1, %s6822_s12   ;;  %s34_s20 = sadd.s32 1, %s6818_s11 }
  0x45   : > { %s31_s21 = ssub.s32 %s6822_s12, %s6987_s18  ;;  %p41_p12 = scmp.ne.s32.totalorder %s6818_s11, %s6814_s10 }
  0x46   : > { %p32_p7 = scmp.eq.s32.totalorder %s31_s21, 0  ;;  %p42_p1 = scmp.eq.s32.totalorder %s6822_s12, 0 }
  0x47   : > { %p6997_p9 = por %p239_p2, %p41_p12  ;;  %p6441_p13 = scmp.lt.s32.totalorder %s6822_s12, 2 }
  0x48   : > { %s7003_s23 = scalar_select %p32_p7, %s6818_s11, %s34_s20  }
  0x49   : > { %s8639_s19 = scalar_select %p6997_p9, 1, 0 }
  0x4a   : > { %p43_p0 = por %p42_p1, %p41_p12  ;;  %s329_s25 = sand.u32 1, %s6818_s11  }
  0x4b   : > { %s5111_s22 = sshll.u32 %s329_s25, 7  ;;  %s5530_s28 = sshll.u32 %s6822_s12, 11 }
  0x4c   : > { %s7010_s14 = scalar_lea.hbm %s8579_s0, %s5530_s28  ;;  %s333_s21 = scalar_lea.vmem [#allocation3], %s5111_s22 }
  0x4d   : > { %s340_s26 = sshll.u32 %s333_s21, 4  ;;  %p7014_p2 = pnand %p6441_p13, %p43_p0  ;;  %s7012_s26 = int_to_ptr.vmem [resolvable:$true] %s340_s26 }
  0x4e   : > { %s7018_s20 = scalar_lea.sflag [#allocation4], %s329_s25  ;;  %s6722_s1 = scalar_lea.hbm %s7010_s14, 2048 }
  0x4f   : > { %p6723_p11 = scmp.ne.s32.totalorder %s7010_s14, %s6722_s1  ;;  %p6724_p3 = pneg %p7014_p2 }
  0x50   : > { %s6727_s22 = scalar_lea.hbm %s8579_s0, 4096  ;;  %p6728_p12 = scmp.lt.s32.totalorder %s7010_s14, %s8579_s0 }
  0x51   : > { %p6725_p5 = pnand %p6724_p3, %p6723_p11  ;;  %p6729_p7 = scmp.lt.s32.totalorder %s6727_s22, %s6722_s1 }
  0x53   : > { %p6726_p10 = pneg %p6725_p5  ;;  %p6730_p1 = por %p6729_p7, %p6728_p12 }
  0x55   : > { %p6731_p13 = pnand %p6730_p1, %p6726_p10 }
  0x57   : > { %6734 = shalt.err (!%p6731_p13)
}
  0x58   : > { %s6735_s25 = scalar_lea.vmem %s7012_s26, 2048  ;;  %s6830_s2 = smov [#allocation3]  }
  0x59   : > { %p6736_p0 = scmp.ne.s32.totalorder %s7012_s26, %s6735_s25  ;;  %s6740_s3 = sshll.u32 %s6830_s2, 4  ;;  %s6741_s3 = int_to_ptr.vmem [resolvable:$false] %s6740_s3 }
  0x5a   : > { %s6742_s28 = scalar_lea.vmem %s6741_s3, 4096  ;;  %p6743_p5 = scmp.lt.s32.totalorder %s7012_s26, %s6741_s3 }
  0x5b   : > { %p6738_p6 = pnand %p6736_p0, %p6724_p3  ;;  %p6744_p9 = scmp.lt.s32.totalorder %s6742_s28, %s6735_s25 }
  0x5d   : > { %p6739_p11 = pneg %p6738_p6  ;;  %p6745_p4 = por %p6744_p9, %p6743_p5 }
  0x5f   : > { %p6746_p8 = pnand %p6745_p4, %p6739_p11 }
  0x61   : > { %6749 = shalt.err (!%p6746_p8)
}
  0x62   : > { %s8641_s1 = smov 4   ;;  %s8642_s29 = smov 64  }
  0x63   : > { %6432 = dma.hbm_to_vmem [thread:$0]  (!%p7014_p2), %s7010_s14, 2048, %s7012_s26, %s7018_s20, %s8642_s29, %s8642_s29, %s8641_s1  }
  0x64   : > { %p8643_p6 = scmp.ne.s32.totalorder %s8634_s17, 0 }
  0x66   : > { %352 = sbr.rel (%p8643_p6) target bundleno = 1095 (0x447), region = 56 }
  0x6b   : > { %s7045_s2 = sand.u32 1, %s6814_s10   ;;  %p8644_p4 = scmp.ne.s32.totalorder %s8632_s15, 0 }
  0x6c   : > { %s5115_s3 = sshll.u32 %s7045_s2, 7  ;;  %s355_s22 = scalar_lea.sflag [#allocation4], %s7045_s2 }
  0x6d   : > { %s7049_s24 = scalar_lea.vmem [#allocation3], %s5115_s3 }
  0x6e   : > { %6793 = dma.done.wait (%p8644_p4), %s355_s22, 2048  }
  0x6f   : > { %6795 = vsyncadd (%p8644_p4), %s355_s22, 4294965248  ;;  %p8645_p8 = scmp.eq.s32.totalorder %s6908_s13, 0 }
  0x71   : > { %6797 = dma.done.wait (%p8645_p8), [#allocation7], 10240   ;;  %p8646_p9 = pmov %p8645_p8 }
  0x72   : > { %p8647_p2 = pmov %p8645_p8 }
  0x73   : > { %6799 = vsyncadd (%p8646_p9), [#allocation7], 4294957056 }
  0x74   : > { %6801 = dma.done.wait (%p8647_p2), [#allocation10], 2048   ;;  %p8648_p3 = pmov %p8647_p2 }
  0x75   : > { %v6489_v0 = vld [vmem:[#allocation6 + $0x38] sm:$0xff]   ;;  %v6490_v1 = vld [vmem:[#allocation6 + $0x30] sm:$0xff]   ;;  %v6491_v2 = vld [vmem:[#allocation6 + $0x28] sm:$0xff]   ;;  %v6831_v38 = vmov 0.0   ;;  %v842_v40 = vlaneseq  ;;  %v6832_v41 = vmov 0.0|0.0   ;;  %vm8620_vm1 = vmmov 1  }
  0x76   : > { %6803 = vsyncadd (%p8648_p3), [#allocation10], 4294965248  ;;  %5820 = vmatprep.subr.bf16.mxu0 %v6489_v0  ;;  %v6492_v3 = vld [vmem:[#allocation6 + $0x20] sm:$0xff]   ;;  %v6493_v5 = vld [vmem:[#allocation6 + $0x18] sm:$0xff]   ;;  %802 = vst [vmem:[#allocation2] sm:$0xff] %v6831_v38  ;;  %5884 = vmatprep.mubr.bf16.mxu1 %v6832_v41  ;;  %v8649_v48 = vmov 0 }
  0x77   : > { %5821 = vmatpush3.bf16.msra.mxu0 %v6489_v0  ;;  %v6497_v4 = vld [vmem:[%s7049_s24] sm:$0xff]   ;;  %v6494_v6 = vld [vmem:[#allocation6 + $0x10] sm:$0xff]   ;;  %v6495_v7 = vld [vmem:[#allocation6 + $0x8] sm:$0xff]   ;;  %804 = vst [vmem:[#allocation2 + $0x10] sm:$0xff] %v6831_v38  ;;  %v7079_v42 = vshrl.u32 %v842_v40, 7  ;;  %s5120_s28 = sshll.u32 %s7045_s2, 8 }
  0x78   : > { %5822 = vmatprep.subr.bf16.mxu0 %v6490_v1  ;;  %5836 = vmatprep.mubr.bf16.mxu0 %v6497_v4  ;;  %v6496_v8 = vld [vmem:[#allocation6] sm:$0xff]   ;;  %v6513_v9 = vld [vmem:[#allocation8 + $0x78] sm:$0xff]   ;;  %v6515_v10 = vld [vmem:[#allocation8 + $0x70] sm:$0xff]   ;;  %805 = vst [vmem:[#allocation2 + $0x18] sm:$0xff] %v6831_v38  ;;  %s8414_s1 = scalar_lea.vmem [#allocation12], %s5120_s28  ;;  %s5531_s29 = sshll.u32 %s6908_s13, 12 }
  0x79   : > { %5868 = vmatprep.subr.bf16.mxu1 %v6513_v9  ;;  %v6514_v11 = vld [vmem:[#allocation8 + $0x38] sm:$0xff]   ;;  %v6498_v12 = vld [vmem:[%s7049_s24 + $0x8] sm:$0xff]   ;;  %v6499_v14 = vld [vmem:[%s7049_s24 + $0x10] sm:$0xff]   ;;  %803 = vst [vmem:[#allocation2 + $0x8] sm:$0xff] %v6831_v38  ;;  %v879_v44 = vand.u32 15, %v7079_v42  ;;  %v845_v61 = vadd.s32 16, %v7079_v42  ;;  %s8532_s15 = scalar_lea.hbm %s8588_s9, %s5531_s29 }
  0x7a   : > { %5869 = vmatpush3.bf16.msra.mxu1 %v6513_v9  ;;  %v6517_v13 = vld [vmem:[#allocation8 + $0x68] sm:$0xff]   ;;  %v6516_v15 = vld [vmem:[#allocation8 + $0x30] sm:$0xff]   ;;  %v6500_v17 = vld [vmem:[%s7049_s24 + $0x18] sm:$0xff]   ;;  %806 = vst [vmem:[#allocation2 + $0x120] sm:$0xff] %v6831_v38  ;;  %s4993_s3 = sshll.u32 %s8414_s1, 4  ;;  %s4980_s17 = scalar_lea.sflag [#allocation5], %s7045_s2  ;;  %s8534_s3 = int_to_ptr.vmem [resolvable:$true] %s4993_s3 }
  0x7b   : > { %5823 = vmatpush3.bf16.msra.mxu0 %v6490_v1  ;;  %5870 = vmatprep.subr.bf16.mxu1 %v6515_v10  ;;  %v6518_v16 = vld [vmem:[#allocation8 + $0x28] sm:$0xff]   ;;  %v6501_v18 = vld [vmem:[%s7049_s24 + $0x20] sm:$0xff]   ;;  %v6503_v20 = vld [vmem:[%s7049_s24 + $0x30] sm:$0xff]   ;;  %807 = vst [vmem:[#allocation2 + $0x128] sm:$0xff] %v6831_v38  ;;  %vm1259_vm0 = vcmp.ne.s32.totalorder %v879_v44, 0  ;;  %v847_v1 = vadd.s32 32, %v7079_v42 }
  0x7c   : > { %5824 = vmatprep.subr.bf16.mxu0 %v6491_v2  ;;  %v6502_v19 = vld [vmem:[%s7049_s24 + $0x28] sm:$0xff]   ;;  %v6504_v21 = vld [vmem:[%s7049_s24 + $0x38] sm:$0xff]   ;;  %v6505_v22 = vld [vmem:[%s7049_s24 + $0x40] sm:$0xff]   ;;  %808 = vst [vmem:[#allocation2 + $0x130] sm:$0xff] %v6831_v38  ;;  %s6750_s26 = scalar_lea.vmem %s8534_s3, 4096  ;;  %p8822_p12 = scmp.ne.s32.totalorder %s8639_s19, 0 }
  0x7d   : > { %v6506_v23 = vld [vmem:[%s7049_s24 + $0x48] sm:$0xff]   ;;  %v6507_v24 = vld [vmem:[%s7049_s24 + $0x50] sm:$0xff]   ;;  %v6508_v25 = vld [vmem:[%s7049_s24 + $0x58] sm:$0xff]   ;;  %p6751_p10 = scmp.ne.s32.totalorder %s8534_s3, %s6750_s26  ;;  %s6834_s13 = smov [#allocation12]  }
  0x7e   : > { %5871 = vmatpush3.bf16.msra.mxu1 %v6515_v10  ;;  %v6509_v26 = vld [vmem:[%s7049_s24 + $0x60] sm:$0xff]   ;;  %v6510_v27 = vld [vmem:[%s7049_s24 + $0x68] sm:$0xff]   ;;  %v6511_v28 = vld [vmem:[%s7049_s24 + $0x70] sm:$0xff]   ;;  %s6754_s27 = sshll.u32 %s6834_s13, 4  ;;  %s6755_s27 = int_to_ptr.vmem [resolvable:$false] %s6754_s27 }
  0x7f   : > { %5825 = vmatpush3.bf16.msra.mxu0 %v6491_v2  ;;  %5872 = vmatprep.subr.bf16.mxu1 %v6517_v13  ;;  %v6512_v29 = vld [vmem:[%s7049_s24 + $0x78] sm:$0xff]   ;;  %v6519_v30 = vld [vmem:[#allocation8 + $0x60] sm:$0xff]   ;;  %v6523_v33 = vld [vmem:[#allocation8 + $0x50] sm:$0xff]   ;;  %p6752_p7 = pnand %p6751_p10, %p8822_p12  ;;  %s6756_s14 = scalar_lea.vmem %s6755_s27, 8192 }
  0x80   : > { %5826 = vmatprep.subr.bf16.mxu0 %v6492_v3  ;;  %v6521_v31 = vld [vmem:[#allocation8 + $0x58] sm:$0xff]   ;;  %v6520_v32 = vld [vmem:[#allocation8 + $0x20] sm:$0xff]   ;;  %v6525_v35 = vld [vmem:[#allocation8 + $0x48] sm:$0xff]   ;;  %p6757_p13 = scmp.lt.s32.totalorder %s8534_s3, %s6755_s27  ;;  %p6758_p0 = scmp.lt.s32.totalorder %s6756_s14, %s6750_s26 }
  0x81   : > { %v6522_v34 = vld [vmem:[#allocation8 + $0x18] sm:$0xff]   ;;  %v6524_v36 = vld [vmem:[#allocation8 + $0x10] sm:$0xff]   ;;  %v6527_v37 = vld [vmem:[#allocation8 + $0x40] sm:$0xff]   ;;  %p6753_p1 = pneg %p6752_p7 }
  0x82   : > { %5873 = vmatpush3.bf16.msra.mxu1 %v6517_v13  ;;  %v6526_v39 = vld [vmem:[#allocation8 + $0x8] sm:$0xff]   ;;  %v6528_v43 = vld [vmem:[#allocation8] sm:$0xff]   ;;  %v1324_v46 = vld [vmem:[#allocation2 + $0x17] sm:$0xff]  ;;  %p6759_p11 = por %p6758_p0, %p6757_p13 }
  0x83   : > { %5827 = vmatpush3.bf16.msra.mxu0 %v6492_v3  ;;  %5874 = vmatprep.subr.bf16.mxu1 %v6519_v30  ;;  %v1323_v45 = vld [vmem:[#allocation2 + $0xf] sm:$0xff]  ;;  %vm7083_vm2 = vmpackc.low %vm8620_vm1, %vm1259_vm0  ;;  %v6529_v49 = vld [vmem:[#allocation8 + $0xb8] sm:$0xff]  }
  0x84   : > { %5828 = vmatprep.subr.bf16.mxu0 %v6493_v5  ;;  %v5163_v47 = vpack.c.bf16 %v1324_v46, %v1323_v45  ;;  %v8650_v48 = vsel %vm7083_vm2, 4294967295, %v8649_v48  ;;  %v7089_v50 = vld [vmem:[#allocation8 + $0xf8] sm:$0xff]   ;;  %v7095_v51 = vld [vmem:[%s8584_s5] ss:$0 sm:$0xff]  ;;  %v6530_v9 = vld [vmem:[#allocation8 + $0xb0] sm:$0xff]   ;;  %p6760_p5 = pnand %p6759_p11, %p6753_p1 }
  0x85   : > { %v6532_v41 = vld [vmem:[#allocation8 + $0xa0] sm:$0xff]   ;;  %v6535_v46 = vld [vmem:[#allocation8 + $0xf0] sm:$0xff]  }
  0x86   : > { %5875 = vmatpush3.bf16.msra.mxu1 %v6519_v30 }
  0x87   : > { %5829 = vmatpush3.bf16.msra.mxu0 %v6493_v5  ;;  %5876 = vmatprep.subr.bf16.mxu1 %v6521_v31  ;;  %v893_v5 = vand.u32 15, %v845_v61 }
  0x88   : > { %5830 = vmatprep.subr.bf16.mxu0 %v6494_v6 }
  0x89   : > { %vm7106_vm3 = vcmp.ne.s32.totalorder %v893_v5, 0 }
  0x8a   : > { %5877 = vmatpush3.bf16.msra.mxu1 %v6521_v31  ;;  %vm7123_vm5 = vmpackc.low %vm8620_vm1, %vm7106_vm3 }
  0x8b   : > { %5831 = vmatpush3.bf16.msra.mxu0 %v6494_v6  ;;  %5878 = vmatprep.subr.bf16.mxu1 %v6523_v33 }
  0x8c   : > { %5832 = vmatprep.subr.bf16.mxu0 %v6495_v7 }
  0x8e   : > { %5879 = vmatpush3.bf16.msra.mxu1 %v6523_v33 }
  0x8f   : > { %5833 = vmatpush3.bf16.msra.mxu0 %v6495_v7  ;;  %5880 = vmatprep.subr.bf16.mxu1 %v6525_v35 }
  0x90   : > { %5834 = vmatprep.subr.bf16.mxu0 %v6496_v8 }
  0x92   : > { %5881 = vmatpush3.bf16.msra.mxu1 %v6525_v35 }
  0x93   : > { %5835 = vmatpush3.bf16.msra.mxu0 %v6496_v8  ;;  %5882 = vmatprep.subr.bf16.mxu1 %v6527_v37 }
  0x94   : > { %5916 = vmatprep.subr.bf16.mxu0 %v6514_v11 }
  0x96   : > { %5837 = vmatmul.mubr.bf16.vlgmr.msra.gmra.mxu0 %v6498_v12  ;;  %5883 = vmatpush3.bf16.msra.mxu1 %v6527_v37  ;;  %v907_v12 = vand.u32 15, %v847_v1 }
  0x97   : > { %5840 = vmatprep.mubr.bf16.mxu0 %v6499_v14  ;;  %5917 = vmatpush3.bf16.msra.mxu0 %v6514_v11 }
  0x98   : > { %5918 = vmatprep.subr.bf16.mxu0 %v6516_v15  ;;  %5964 = vmatprep.subr.bf16.mxu1 %v6529_v49  ;;  %vm7112_vm4 = vcmp.ne.s32.totalorder %v907_v12, 0  ;;  %v6536_v12 = vld [vmem:[#allocation8 + $0x90] sm:$0xff]  }
  0x99   : > { %vm7134_vm6 = vmpackc.low %vm8620_vm1, %vm7112_vm4 }
  0x9b   : > { %5919 = vmatpush3.bf16.msra.mxu0 %v6516_v15 }
  0x9c   : > { %5920 = vmatprep.subr.bf16.mxu0 %v6518_v16 }
  0x9e   : > { %5841 = vmatmul.mubr.bf16.gmra.mxu0 %v6500_v17  ;;  %v849_v17 = vadd.s32 48, %v7079_v42 }
  0x9f   : > { %5844 = vmatprep.mubr.bf16.mxu0 %v6501_v18  ;;  %5921 = vmatpush3.bf16.msra.mxu0 %v6518_v16  ;;  %v6538_v16 = vld [vmem:[#allocation8 + $0xe0] sm:$0xff]  }
  0xa0   : > { %5922 = vmatprep.subr.bf16.mxu0 %v6520_v32 }
  0xa3   : > { %5923 = vmatpush3.bf16.msra.mxu0 %v6520_v32  ;;  %v921_v32 = vand.u32 15, %v849_v17 }
  0xa4   : > { %5924 = vmatprep.subr.bf16.mxu0 %v6522_v34 }
  0xa5   : > { %vm7147_vm7 = vcmp.ne.s32.totalorder %v921_v32, 0 }
  0xa6   : > { %5845 = vmatmul.mubr.bf16.gmra.mxu0 %v6502_v19  ;;  %vm7165_vm9 = vmpackc.low %vm8620_vm1, %vm7147_vm7 }
  0xa7   : > { %5848 = vmatprep.mubr.bf16.mxu0 %v6503_v20  ;;  %5925 = vmatpush3.bf16.msra.mxu0 %v6522_v34  ;;  %v6531_v20 = vld [vmem:[#allocation8 + $0xa8] sm:$0xff]  }
  0xa8   : > { %5926 = vmatprep.subr.bf16.mxu0 %v6524_v36 }
  0xab   : > { %5927 = vmatpush3.bf16.msra.mxu0 %v6524_v36  ;;  %v8657_v36 = vmov 0 }
  0xac   : > { %5928 = vmatprep.subr.bf16.mxu0 %v6526_v39  ;;  %v8658_v36 = vsel %vm7134_vm6, 4294967295, %v8657_v36 }
  0xae   : > { %5849 = vmatmul.mubr.bf16.gmra.mxu0 %v6504_v21 }
  0xaf   : > { %5852 = vmatprep.mubr.bf16.mxu0 %v6505_v22  ;;  %5929 = vmatpush3.bf16.msra.mxu0 %v6526_v39 }
  0xb0   : > { %5930 = vmatprep.subr.bf16.mxu0 %v6528_v43 }
  0xb3   : > { %5931 = vmatpush3.bf16.msra.mxu0 %v6528_v43 }
  0xb4   : > { %6012 = vmatprep.subr.bf16.mxu0 %v7089_v50 }
  0xb6   : > { %5853 = vmatmul.mubr.bf16.gmra.mxu0 %v6506_v23  ;;  %v851_v23 = vadd.s32 64, %v7079_v42 }
  0xb7   : > { %5856 = vmatprep.mubr.bf16.mxu0 %v6507_v24 }
  0xb8   : > { %v935_v40 = vand.u32 15, %v851_v23 }
  0xba   : > { %vm7153_vm8 = vcmp.ne.s32.totalorder %v935_v40, 0 }
  0xbb   : > { %vm7176_vm10 = vmpackc.low %vm8620_vm1, %vm7153_vm8 }
  0xbe   : > { %5857 = vmatmul.mubr.bf16.gmra.mxu0 %v6508_v25 }
  0xbf   : > { %5860 = vmatprep.mubr.bf16.mxu0 %v6509_v26 }
  0xc6   : > { %5861 = vmatmul.mubr.bf16.gmra.mxu0 %v6510_v27  ;;  %v8655_v27 = vmov 0 }
  0xc7   : > { %5864 = vmatprep.mubr.bf16.mxu0 %v6511_v28  ;;  %v8656_v27 = vsel %vm7123_vm5, 4294967295, %v8655_v27 }
  0xce   : > { %5865 = vmatmul.mubr.bf16.gmra.mxu0 %v6512_v29 }
  0xcf   : > { %5932 = vmatprep.mubr.msk.bf16.mxu0 %vm7083_vm2, %v5163_v47 }
 0x156   : > { %v5838_v52 = vpop.f32.mrf.mxu0 }
 0x157   : > { %v652_v53 = vadd.f32 %v5838_v52, %v7095_v51  ;;  %v853_v52 = vadd.s32 80, %v7079_v42 }
 0x158   : > { %v643_v54 = vpop.f32.mrf.mxu0 }
 0x159   : > { %v772_v55 = vmax.f32 %v652_v53, 0.0  ;;  %v644_v56 = vadd.f32 %v7095_v51, %v643_v54 }
 0x15a   : > { %v5839_v57 = vpop.f32.mrf.mxu0 }
 0x15b   : > { %812 = vst [vmem:[#allocation2 + $0x30] sm:$0xff] %v772_v55  ;;  %v770_v58 = vmax.f32 %v644_v56, 0.0  ;;  %v655_v59 = vadd.f32 %v5839_v57, %v7095_v51  ;;  %v855_v57 = vadd.s32 96, %v7079_v42  ;;  %v6541_v56 = vld [vmem:[#allocation8 + $0xd0] sm:$0xff]  }
 0x15c   : > { %v646_v60 = vpop.f32.mrf.mxu0 }
 0x15d   : > { %810 = vst [vmem:[#allocation2 + $0x20] sm:$0xff] %v770_v58  ;;  %v773_v62 = vmax.f32 %v655_v59, 0.0  ;;  %v647_v63 = vadd.f32 %v7095_v51, %v646_v60 }
 0x15e   : > { %v5842_v0 = vpop.f32.mrf.mxu0 }
 0x15f   : > { %813 = vst [vmem:[#allocation2 + $0x38] sm:$0xff] %v773_v62  ;;  %v771_v2 = vmax.f32 %v647_v63, 0.0  ;;  %v668_v3 = vadd.f32 %v5842_v0, %v7095_v51  ;;  %v1517_v11 = vpack.c.bf16 %v773_v62, %v772_v55  ;;  %v8663_v62 = vmov 0  ;;  %v6537_v63 = vld [vmem:[#allocation8 + $0xe8] sm:$0xff]  }
 0x160   : > { %v659_v4 = vpop.f32.mrf.mxu0  ;;  %v8664_v62 = vsel %vm7165_vm9, 4294967295, %v8663_v62 }
 0x161   : > { %811 = vst [vmem:[#allocation2 + $0x28] sm:$0xff] %v771_v2  ;;  %v776_v6 = vmax.f32 %v668_v3, 0.0  ;;  %v660_v7 = vadd.f32 %v7095_v51, %v659_v4  ;;  %v1516_v8 = vpack.c.bf16 %v771_v2, %v770_v58  ;;  %v6533_v58 = vld [vmem:[#allocation8 + $0x98] sm:$0xff]  }
 0x162   : > { %v5843_v10 = vpop.f32.mrf.mxu0 }
 0x163   : > { %816 = vst [vmem:[#allocation2 + $0x50] sm:$0xff] %v776_v6  ;;  %v774_v13 = vmax.f32 %v660_v7, 0.0  ;;  %v671_v14 = vadd.f32 %v5843_v10, %v7095_v51  ;;  %5885 = vmatmul.mubr.bf16.vlgmr.msra.gmra.mxu1 %v1516_v8  ;;  %v8665_v7 = vmov 0 }
 0x164   : > { %v662_v15 = vpop.f32.mrf.mxu0  ;;  %5965 = vmatpush3.bf16.msra.mxu1 %v6529_v49  ;;  %5888 = vmatprep.mubr.bf16.mxu1 %v1517_v11  ;;  %v1325_v26 = vld [vmem:[#allocation2 + $0x1f] sm:$0xff]  ;;  %v8666_v7 = vsel %vm7176_vm10, 4294967295, %v8665_v7  ;;  %v963_v11 = vand.u32 15, %v855_v57 }
 0x165   : > { %814 = vst [vmem:[#allocation2 + $0x40] sm:$0xff] %v774_v13  ;;  %v777_v18 = vmax.f32 %v671_v14, 0.0  ;;  %v663_v19 = vadd.f32 %v7095_v51, %v662_v15  ;;  %5966 = vmatprep.subr.bf16.mxu1 %v6530_v9 }
 0x166   : > { %v5846_v21 = vpop.f32.mrf.mxu0  ;;  %v1328_v31 = vld [vmem:[#allocation2 + $0x37] sm:$0xff]  ;;  %vm7197_vm12 = vcmp.ne.s32.totalorder %v963_v11, 0 }
 0x167   : > { %817 = vst [vmem:[#allocation2 + $0x58] sm:$0xff] %v777_v18  ;;  %v775_v24 = vmax.f32 %v663_v19, 0.0  ;;  %v7118_v25 = vadd.f32 %v5846_v21, %v7095_v51  ;;  %v1519_v45 = vpack.c.bf16 %v777_v18, %v776_v6  ;;  %v857_v19 = vadd.s32 112, %v7079_v42  ;;  %vm7219_vm14 = vmpackc.low %vm8620_vm1, %vm7197_vm12 }
 0x168   : > { %v675_v28 = vpop.f32.mrf.mxu0  ;;  %v1326_v29 = vld [vmem:[#allocation2 + $0x27] sm:$0xff]  ;;  %v1327_v30 = vld [vmem:[#allocation2 + $0x2f] sm:$0xff]  ;;  %5967 = vmatpush3.bf16.msra.mxu1 %v6530_v9  ;;  %v8681_v18 = vmov 0 }
 0x169   : > { %815 = vst [vmem:[#allocation2 + $0x48] sm:$0xff] %v775_v24  ;;  %v780_v33 = vmax.f32 %v7118_v25, 0.0  ;;  %v676_v34 = vadd.f32 %v7095_v51, %v675_v28  ;;  %v7129_v35 = vpack.c.bf16 %v1326_v29, %v1325_v26  ;;  %v7138_v37 = vpack.c.bf16 %v1328_v31, %v1327_v30  ;;  %5968 = vmatprep.subr.bf16.mxu1 %v6531_v20  ;;  %v6539_v25 = vld [vmem:[#allocation8 + $0x88] sm:$0xff]   ;;  %v6540_v31 = vld [vmem:[#allocation8 + $0xd8] sm:$0xff]  }
 0x16a   : > { %v5847_v38 = vpop.f32.mrf.mxu0  ;;  %v1518_v39 = vpack.c.bf16 %v775_v24, %v774_v13  ;;  %v859_v24 = vadd.s32 128, %v7079_v42  ;;  %v8671_v30 = vmov 0 }
 0x16b   : > { %820 = vst [vmem:[#allocation2 + $0x70] sm:$0xff] %v780_v33  ;;  %v778_v43 = vmax.f32 %v676_v34, 0.0  ;;  %v687_v44 = vadd.f32 %v5847_v38, %v7095_v51  ;;  %5933 = vmatmul.mubr.msk.bf16.vlgmr.msra.gmra.mxu0 %vm7123_vm5, %v7129_v35 }
 0x16c   : > { %v678_v47 = vpop.f32.mrf.mxu0  ;;  %5936 = vmatprep.mubr.msk.bf16.mxu0 %vm7134_vm6, %v7138_v37  ;;  %5889 = vmatmul.mubr.bf16.gmra.mxu1 %v1518_v39  ;;  %v1329_v61 = vld [vmem:[#allocation2 + $0x3f] sm:$0xff]  ;;  %v977_v39 = vand.u32 15, %v857_v19  ;;  %v991_v49 = vand.u32 15, %v859_v24 }
 0x16d   : > { %818 = vst [vmem:[#allocation2 + $0x60] sm:$0xff] %v778_v43  ;;  %v781_v53 = vmax.f32 %v687_v44, 0.0  ;;  %v679_v54 = vadd.f32 %v7095_v51, %v678_v47  ;;  %5892 = vmatprep.mubr.bf16.mxu1 %v1519_v45  ;;  %5969 = vmatpush3.bf16.msra.mxu1 %v6531_v20  ;;  %v8673_v44 = vmov 0 }
 0x16e   : > { %v5850_v55 = vpop.f32.mrf.mxu0  ;;  %5970 = vmatprep.subr.bf16.mxu1 %v6532_v41  ;;  %6013 = vmatpush3.bf16.msra.mxu0 %v7089_v50  ;;  %v1332_v3 = vld [vmem:[#allocation2 + $0x57] sm:$0xff]  ;;  %v949_v50 = vand.u32 15, %v853_v52  ;;  %v8674_v44 = vsel %vm7219_vm14, 4294967295, %v8673_v44  ;;  %v6542_v52 = vld [vmem:[#allocation8 + $0x80] sm:$0xff]   ;;  %vm7236_vm15 = vcmp.ne.s32.totalorder %v977_v39, 0  ;;  %vm7242_vm0 = vcmp.ne.s32.totalorder %v991_v49, 0 }
 0x16f   : > { %821 = vst [vmem:[#allocation2 + $0x78] sm:$0xff] %v781_v53  ;;  %v779_v59 = vmax.f32 %v679_v54, 0.0  ;;  %v7160_v60 = vadd.f32 %v5850_v55, %v7095_v51  ;;  %6014 = vmatprep.subr.bf16.mxu0 %v6535_v46  ;;  %v1521_v15 = vpack.c.bf16 %v781_v53, %v780_v33  ;;  %vm7255_vm3 = vmpackc.low %vm8620_vm1, %vm7236_vm15 }
 0x170   : > { %v691_v0 = vpop.f32.mrf.mxu0  ;;  %v1330_v1 = vld [vmem:[#allocation2 + $0x47] sm:$0xff]  ;;  %v1331_v2 = vld [vmem:[#allocation2 + $0x4f] sm:$0xff]  ;;  %vm7191_vm11 = vcmp.ne.s32.totalorder %v949_v50, 0  ;;  %vm7266_vm4 = vmpackc.low %vm8620_vm1, %vm7242_vm0 }
 0x171   : > { %819 = vst [vmem:[#allocation2 + $0x68] sm:$0xff] %v779_v59  ;;  %v784_v4 = vmax.f32 %v7160_v60, 0.0  ;;  %v692_v5 = vadd.f32 %v7095_v51, %v691_v0  ;;  %v7171_v6 = vpack.c.bf16 %v1330_v1, %v1329_v61  ;;  %v7180_v8 = vpack.c.bf16 %v1332_v3, %v1331_v2  ;;  %5971 = vmatpush3.bf16.msra.mxu1 %v6532_v41  ;;  %vm7208_vm13 = vmpackc.low %vm8620_vm1, %vm7191_vm11  ;;  %v7247_v2 = vld [vmem:[#allocation8 + $0x138] sm:$0xff]  }
 0x172   : > { %v5851_v9 = vpop.f32.mrf.mxu0  ;;  %v1520_v10 = vpack.c.bf16 %v779_v59, %v778_v43  ;;  %5972 = vmatprep.subr.bf16.mxu1 %v6533_v58  ;;  %6015 = vmatpush3.bf16.msra.mxu0 %v6535_v46  ;;  %v8672_v30 = vsel %vm7208_vm13, 4294967295, %v8671_v30  ;;  %v861_v59 = vadd.s32 144, %v7079_v42  ;;  %v863_v1 = vadd.s32 160, %v7079_v42 }
 0x173   : > { %824 = vst [vmem:[#allocation2 + $0x90] sm:$0xff] %v784_v4  ;;  %v782_v13 = vmax.f32 %v692_v5, 0.0  ;;  %v703_v14 = vadd.f32 %v5851_v9, %v7095_v51  ;;  %5937 = vmatmul.mubr.msk.bf16.gmra.mxu0 %vm7165_vm9, %v7171_v6  ;;  %6016 = vmatprep.subr.bf16.mxu0 %v6537_v63  ;;  %v8679_v5 = vmov 0  ;;  %v6543_v9 = vld [vmem:[#allocation8 + $0xc8] sm:$0xff]   ;;  %v8682_v18 = vsel %vm7266_vm4, 4294967295, %v8681_v18 }
 0x174   : > { %v694_v17 = vpop.f32.mrf.mxu0  ;;  %5940 = vmatprep.mubr.msk.bf16.mxu0 %vm7176_vm10, %v7180_v8  ;;  %5893 = vmatmul.mubr.bf16.gmra.mxu1 %v1520_v10  ;;  %v1333_v29 = vld [vmem:[#allocation2 + $0x5f] sm:$0xff]  ;;  %v8680_v5 = vsel %vm7255_vm3, 4294967295, %v8679_v5 }
 0x175   : > { %822 = vst [vmem:[#allocation2 + $0x80] sm:$0xff] %v782_v13  ;;  %v785_v20 = vmax.f32 %v703_v14, 0.0  ;;  %v695_v21 = vadd.f32 %v7095_v51, %v694_v17  ;;  %5896 = vmatprep.mubr.bf16.mxu1 %v1521_v15  ;;  %5973 = vmatpush3.bf16.msra.mxu1 %v6533_v58  ;;  %v1005_v14 = vand.u32 15, %v861_v59  ;;  %v8687_v59 = vmov 0 }
 0x176   : > { %v5854_v22 = vpop.f32.mrf.mxu0  ;;  %5974 = vmatprep.subr.bf16.mxu1 %v6536_v12  ;;  %6017 = vmatpush3.bf16.msra.mxu0 %v6537_v63  ;;  %v1336_v38 = vld [vmem:[#allocation2 + $0x77] sm:$0xff] }
 0x177   : > { %825 = vst [vmem:[#allocation2 + $0x98] sm:$0xff] %v785_v20  ;;  %v783_v26 = vmax.f32 %v695_v21, 0.0  ;;  %v7203_v28 = vadd.f32 %v5854_v22, %v7095_v51  ;;  %6018 = vmatprep.subr.bf16.mxu0 %v6538_v16  ;;  %v1523_v55 = vpack.c.bf16 %v785_v20, %v784_v4  ;;  %v1019_v22 = vand.u32 15, %v863_v1 }
 0x178   : > { %v707_v32 = vpop.f32.mrf.mxu0  ;;  %v1334_v33 = vld [vmem:[#allocation2 + $0x67] sm:$0xff]  ;;  %v1335_v34 = vld [vmem:[#allocation2 + $0x6f] sm:$0xff]  ;;  %vm1277_vm7 = vcmp.ne.s32.totalorder %v1005_v14, 0  ;;  %v871_v14 = vadd.s32 224, %v7079_v42 }
 0x179   : > { %823 = vst [vmem:[#allocation2 + $0x88] sm:$0xff] %v783_v26  ;;  %v788_v40 = vmax.f32 %v7203_v28, 0.0  ;;  %v708_v41 = vadd.f32 %v7095_v51, %v707_v32  ;;  %v7214_v43 = vpack.c.bf16 %v1334_v33, %v1333_v29  ;;  %v7223_v45 = vpack.c.bf16 %v1336_v38, %v1335_v34  ;;  %5975 = vmatpush3.bf16.msra.mxu1 %v6536_v12  ;;  %vm7293_vm11 = vmpackc.low %vm8620_vm1, %vm1277_vm7 }
 0x17a   : > { %v5855_v46 = vpop.f32.mrf.mxu0  ;;  %v1522_v47 = vpack.c.bf16 %v783_v26, %v782_v13  ;;  %6019 = vmatpush3.bf16.msra.mxu0 %v6538_v16  ;;  %5976 = vmatprep.subr.bf16.mxu1 %v6539_v25  ;;  %v6544_v26 = vld [vmem:[#allocation8 + $0xc0] sm:$0xff]   ;;  %vm7284_vm8 = vcmp.ne.s32.totalorder %v1019_v22, 0  ;;  %v867_v38 = vadd.s32 192, %v7079_v42  ;;  %v844_v22 = vadd.s32 8, %v7079_v42 }
 0x17b   : > { %828 = vst [vmem:[#allocation2 + $0xb0] sm:$0xff] %v788_v40  ;;  %v786_v53 = vmax.f32 %v708_v41, 0.0  ;;  %v719_v54 = vadd.f32 %v5855_v46, %v7095_v51  ;;  %5941 = vmatmul.mubr.msk.bf16.gmra.mxu0 %vm7208_vm13, %v7214_v43  ;;  %6020 = vmatprep.subr.bf16.mxu0 %v6540_v31  ;;  %v8685_v46 = vmov 0  ;;  %vm7306_vm12 = vmpackc.low %vm8620_vm1, %vm7284_vm8 }
 0x17c   : > { %v710_v57 = vpop.f32.mrf.mxu0  ;;  %5944 = vmatprep.mubr.msk.bf16.mxu0 %vm7219_vm14, %v7223_v45  ;;  %5897 = vmatmul.mubr.bf16.gmra.mxu1 %v1522_v47  ;;  %v1337_v4 = vld [vmem:[#allocation2 + $0x7f] sm:$0xff]  ;;  %v8686_v46 = vsel %vm7293_vm11, 4294967295, %v8685_v46  ;;  %v8688_v59 = vsel %vm7306_vm12, 4294967295, %v8687_v59  ;;  %v1047_v0 = vand.u32 15, %v867_v38 }
 0x17d   : > { %826 = vst [vmem:[#allocation2 + $0xa0] sm:$0xff] %v786_v53  ;;  %v789_v61 = vmax.f32 %v719_v54, 0.0  ;;  %v711_v63 = vadd.f32 %v7095_v51, %v710_v57  ;;  %5900 = vmatprep.mubr.bf16.mxu1 %v1523_v55  ;;  %5977 = vmatpush3.bf16.msra.mxu1 %v6539_v25  ;;  %v7297_v47 = vld [vmem:[#allocation8 + $0x178] sm:$0xff]  }
 0x17e   : > { %v5858_v60 = vpop.f32.mrf.mxu0  ;;  %6021 = vmatpush3.bf16.msra.mxu0 %v6540_v31  ;;  %5978 = vmatprep.subr.bf16.mxu1 %v6542_v52  ;;  %v1340_v13 = vld [vmem:[#allocation2 + $0x97] sm:$0xff]  ;;  %v865_v31 = vadd.s32 176, %v7079_v42  ;;  %vm7322_vm0 = vcmp.ne.s32.totalorder %v1047_v0, 0  ;;  %v846_v0 = vadd.s32 24, %v7079_v42 }
 0x17f   : > { %829 = vst [vmem:[#allocation2 + $0xb8] sm:$0xff] %v789_v61  ;;  %v787_v3 = vmax.f32 %v711_v63, 0.0  ;;  %v7250_v50 = vadd.f32 %v5858_v60, %v7095_v51  ;;  %6022 = vmatprep.subr.bf16.mxu0 %v6541_v56  ;;  %v1525_v25 = vpack.c.bf16 %v789_v61, %v788_v40  ;;  %vm7340_vm8 = vmpackc.low %vm8620_vm1, %vm7322_vm0 }
 0x180   : > { %v723_v10 = vpop.f32.mrf.mxu0  ;;  %v1338_v11 = vld [vmem:[#allocation2 + $0x87] sm:$0xff]  ;;  %v1339_v12 = vld [vmem:[#allocation2 + $0x8f] sm:$0xff]  ;;  %v1033_v55 = vand.u32 15, %v865_v31 }
 0x181   : > { %827 = vst [vmem:[#allocation2 + $0xa8] sm:$0xff] %v787_v3  ;;  %v792_v15 = vmax.f32 %v7250_v50, 0.0  ;;  %v724_v16 = vadd.f32 %v7095_v51, %v723_v10  ;;  %v7261_v17 = vpack.c.bf16 %v1338_v11, %v1337_v4  ;;  %v7270_v19 = vpack.c.bf16 %v1340_v13, %v1339_v12  ;;  %5979 = vmatpush3.bf16.msra.mxu1 %v6542_v52 }
 0x182   : > { %v5859_v20 = vpop.f32.mrf.mxu0  ;;  %v1524_v21 = vpack.c.bf16 %v787_v3, %v786_v53  ;;  %6023 = vmatpush3.bf16.msra.mxu0 %v6541_v56  ;;  %6060 = vmatprep.subr.bf16.mxu1 %v7247_v2  ;;  %vm1281_vm15 = vcmp.ne.s32.totalorder %v1033_v55, 0  ;;  %v873_v55 = vadd.s32 240, %v7079_v42 }
 0x183   : > { %832 = vst [vmem:[#allocation2 + $0xd0] sm:$0xff] %v792_v15  ;;  %v790_v23 = vmax.f32 %v724_v16, 0.0  ;;  %v735_v24 = vadd.f32 %v5859_v20, %v7095_v51  ;;  %5945 = vmatmul.mubr.msk.bf16.gmra.mxu0 %vm7255_vm3, %v7261_v17  ;;  %6024 = vmatprep.subr.bf16.mxu0 %v6543_v9  ;;  %vm7329_vm7 = vmpackc.low %vm8620_vm1, %vm1281_vm15 }
 0x184   : > { %v726_v29 = vpop.f32.mrf.mxu0  ;;  %5948 = vmatprep.mubr.msk.bf16.mxu0 %vm7266_vm4, %v7270_v19  ;;  %5901 = vmatmul.mubr.bf16.gmra.mxu1 %v1524_v21  ;;  %v1341_v41 = vld [vmem:[#allocation2 + $0x9f] sm:$0xff]  ;;  %v8691_v21 = vmov 0 }
 0x185   : > { %830 = vst [vmem:[#allocation2 + $0xc0] sm:$0xff] %v790_v23  ;;  %v793_v32 = vmax.f32 %v735_v24, 0.0  ;;  %v727_v33 = vadd.f32 %v7095_v51, %v726_v29  ;;  %5904 = vmatprep.mubr.bf16.mxu1 %v1525_v25  ;;  %v8692_v21 = vsel %vm7329_vm7, 4294967295, %v8691_v21 }
 0x186   : > { %v5862_v34 = vpop.f32.mrf.mxu0  ;;  %6025 = vmatpush3.bf16.msra.mxu0 %v6543_v9  ;;  %v1344_v54 = vld [vmem:[#allocation2 + $0xb7] sm:$0xff]  ;;  %v869_v9 = vadd.s32 208, %v7079_v42 }
 0x187   : > { %833 = vst [vmem:[#allocation2 + $0xd8] sm:$0xff] %v793_v32  ;;  %v791_v39 = vmax.f32 %v727_v33, 0.0  ;;  %v7290_v40 = vadd.f32 %v5862_v34, %v7095_v51  ;;  %6026 = vmatprep.subr.bf16.mxu0 %v6544_v26  ;;  %v1527_v50 = vpack.c.bf16 %v793_v32, %v792_v15  ;;  %v8693_v34 = vmov 0 }
 0x188   : > { %v739_v49 = vpop.f32.mrf.mxu0  ;;  %v1342_v52 = vld [vmem:[#allocation2 + $0xa7] sm:$0xff]  ;;  %v1343_v53 = vld [vmem:[#allocation2 + $0xaf] sm:$0xff]  ;;  %v1061_v29 = vand.u32 15, %v869_v9  ;;  %v8694_v34 = vsel %vm7340_vm8, 4294967295, %v8693_v34 }
 0x189   : > { %831 = vst [vmem:[#allocation2 + $0xc8] sm:$0xff] %v791_v39  ;;  %v796_v56 = vmax.f32 %v7290_v40, 0.0  ;;  %v740_v57 = vadd.f32 %v7095_v51, %v739_v49  ;;  %v7301_v58 = vpack.c.bf16 %v1342_v52, %v1341_v41  ;;  %v7310_v61 = vpack.c.bf16 %v1344_v54, %v1343_v53 }
 0x18a   : > { %v5863_v63 = vpop.f32.mrf.mxu0  ;;  %v1526_v60 = vpack.c.bf16 %v791_v39, %v790_v23  ;;  %6027 = vmatpush3.bf16.msra.mxu0 %v6544_v26  ;;  %v1075_v40 = vand.u32 15, %v871_v14  ;;  %v886_v53 = vand.u32 15, %v844_v22  ;;  %vm1285_vm15 = vcmp.ne.s32.totalorder %v1061_v29, 0  ;;  %v1968_v29 = vld [vmem:[#allocation2 + $0x21] sm:$0xff] }
 0x18b   : > { %836 = vst [vmem:[#allocation2 + $0xf0] sm:$0xff] %v796_v56  ;;  %v794_v1 = vmax.f32 %v740_v57, 0.0  ;;  %v751_v3 = vadd.f32 %v5863_v63, %v7095_v51  ;;  %5949 = vmatmul.mubr.msk.bf16.gmra.mxu0 %vm7293_vm11, %v7301_v58  ;;  %6108 = vmatprep.subr.bf16.mxu0 %v7297_v47  ;;  %v900_v22 = vand.u32 15, %v846_v0  ;;  %v854_v0 = vadd.s32 88, %v7079_v42 }
 0x18c   : > { %v742_v4 = vpop.f32.mrf.mxu0  ;;  %5952 = vmatprep.mubr.msk.bf16.mxu0 %vm7306_vm12, %v7310_v61  ;;  %5905 = vmatmul.mubr.bf16.gmra.mxu1 %v1526_v60  ;;  %v1345_v20 = vld [vmem:[#allocation2 + $0xbf] sm:$0xff]  ;;  %vm7355_vm0 = vcmp.ne.s32.totalorder %v1075_v40, 0 }
 0x18d   : > { %834 = vst [vmem:[#allocation2 + $0xe0] sm:$0xff] %v794_v1  ;;  %v797_v10 = vmax.f32 %v751_v3, 0.0  ;;  %v743_v11 = vadd.f32 %v7095_v51, %v742_v4  ;;  %5908 = vmatprep.mubr.bf16.mxu1 %v1527_v50  ;;  %v8697_v50 = vmov 0  ;;  %v1967_v4 = vld [vmem:[#allocation2 + $0x19] sm:$0xff]  ;;  %vm7371_vm12 = vmpackc.low %vm8620_vm1, %vm7355_vm0 }
 0x18e   : > { %v5866_v12 = vpop.f32.mrf.mxu0  ;;  %v1348_v26 = vld [vmem:[#allocation2 + $0xd7] sm:$0xff] }
 0x18f   : > { %837 = vst [vmem:[#allocation2 + $0xf8] sm:$0xff] %v797_v10  ;;  %v795_v15 = vmax.f32 %v743_v11, 0.0  ;;  %v764_v16 = vadd.f32 %v5866_v12, %v7095_v51  ;;  %v1529_v52 = vpack.c.bf16 %v797_v10, %v796_v56  ;;  %v1966_v56 = vld [vmem:[#allocation2 + $0x11] sm:$0xff]  ;;  %v1089_v12 = vand.u32 15, %v873_v55  ;;  %v1971_v40 = vld [vmem:[#allocation2 + $0x39] sm:$0xff] }
 0x190   : > { %v755_v23 = vpop.f32.mrf.mxu0  ;;  %v1346_v24 = vld [vmem:[#allocation2 + $0xc7] sm:$0xff]  ;;  %v1347_v25 = vld [vmem:[#allocation2 + $0xcf] sm:$0xff] }
 0x191   : > { %835 = vst [vmem:[#allocation2 + $0xe8] sm:$0xff] %v795_v15  ;;  %v800_v31 = vmax.f32 %v764_v16, 0.0  ;;  %v756_v32 = vadd.f32 %v7095_v51, %v755_v23  ;;  %v7335_v33 = vpack.c.bf16 %v1346_v24, %v1345_v20  ;;  %v7344_v28 = vpack.c.bf16 %v1348_v26, %v1347_v25  ;;  %v6546_v55 = vld [vmem:[#allocation8 + $0x130] sm:$0xff]  }
 0x192   : > { %v5867_v38 = vpop.f32.mrf.mxu0  ;;  %v1528_v39 = vpack.c.bf16 %v795_v15, %v794_v1  ;;  %v8701_v20 = vmov 0  ;;  %v5219_v23 = vpack.c.bf16 %v1967_v4, %v1966_v56  ;;  %vm1289_vm0 = vcmp.ne.s32.totalorder %v1089_v12, 0  ;;  %v6547_v56 = vld [vmem:[#allocation8 + $0x128] sm:$0xff]   ;;  %v1975_v4 = vld [vmem:[#allocation2 + $0x59] sm:$0xff] }
 0x193   : > { %840 = vst [vmem:[#allocation2 + $0x110] sm:$0xff] %v800_v31  ;;  %v798_v41 = vmax.f32 %v756_v32, 0.0  ;;  %v767_v49 = vadd.f32 %v5867_v38, %v7095_v51  ;;  %5953 = vmatmul.mubr.msk.bf16.gmra.mxu0 %vm7329_vm7, %v7335_v33  ;;  %vm1292_vm7 = vcmp.ne.s32.totalorder %v886_v53, 15  ;;  %v850_v25 = vadd.s32 56, %v7079_v42  ;;  %vm7392_vm11 = vmpackc.low %vm8620_vm1, %vm1289_vm0  ;;  %v1969_v31 = vld [vmem:[#allocation2 + $0x29] sm:$0xff]  ;;  %v1970_v53 = vld [vmem:[#allocation2 + $0x31] sm:$0xff] }
 0x194   : > { %v758_v54 = vpop.f32.mrf.mxu0  ;;  %5956 = vmatprep.mubr.msk.bf16.mxu0 %vm7340_vm8, %v7344_v28  ;;  %5909 = vmatmul.mubr.bf16.gmra.mxu1 %v1528_v39  ;;  %v1349_v3 = vld [vmem:[#allocation2 + $0xdf] sm:$0xff]  ;;  %vm7361_vm8 = vmpackc.low %vm8620_vm1, %vm1285_vm15  ;;  %v852_v32 = vadd.s32 72, %v7079_v42 }
 0x195   : > { %838 = vst [vmem:[#allocation2 + $0x100] sm:$0xff] %v798_v41  ;;  %v801_v57 = vmax.f32 %v767_v49, 0.0  ;;  %v759_v63 = vadd.f32 %v7095_v51, %v758_v54  ;;  %5912 = vmatprep.mubr.bf16.mxu1 %v1529_v52  ;;  %v8698_v50 = vsel %vm7361_vm8, 4294967295, %v8697_v50  ;;  %v848_v51 = vadd.s32 40, %v7079_v42  ;;  %vm7378_vm15 = vmpackc.low %vm1292_vm7, %vm8620_vm1  ;;  %v6548_v12 = vld [vmem:[#allocation8 + $0x120] sm:$0xff]  }
 0x196   : > { %v1352_v11 = vld [vmem:[#allocation2 + $0xf7] sm:$0xff]  ;;  %v8702_v20 = vsel %vm7378_vm15, 4294967295, %v8701_v20  ;;  %vm1294_vm7 = vcmp.ne.s32.totalorder %v900_v22, 15  ;;  %v7404_v52 = vpack.c.bf16 %v1969_v31, %v1968_v29  ;;  %v8707_v54 = vmov 0  ;;  %v1977_v29 = vld [vmem:[#allocation2 + $0x69] sm:$0xff] }
 0x197   : > { %841 = vst [vmem:[#allocation2 + $0x118] sm:$0xff] %v801_v57  ;;  %v799_v1 = vmax.f32 %v759_v63, 0.0  ;;  %v914_v24 = vand.u32 15, %v848_v51  ;;  %v928_v57 = vand.u32 15, %v850_v25  ;;  %v7414_v63 = vpack.c.bf16 %v1971_v40, %v1970_v53  ;;  %v1976_v25 = vld [vmem:[#allocation2 + $0x61] sm:$0xff]  ;;  %v1978_v40 = vld [vmem:[#allocation2 + $0x71] sm:$0xff] }
 0x198   : > { %v1350_v9 = vld [vmem:[#allocation2 + $0xe7] sm:$0xff]  ;;  %v1351_v10 = vld [vmem:[#allocation2 + $0xef] sm:$0xff]  ;;  %v942_v60 = vand.u32 15, %v852_v32  ;;  %v1979_v32 = vld [vmem:[#allocation2 + $0x79] sm:$0xff] }
 0x199   : > { %839 = vst [vmem:[#allocation2 + $0x108] sm:$0xff] %v799_v1  ;;  %v7366_v13 = vpack.c.bf16 %v1350_v9, %v1349_v3  ;;  %v7375_v15 = vpack.c.bf16 %v1352_v11, %v1351_v10  ;;  %v1530_v16 = vpack.c.bf16 %v799_v1, %v798_v41  ;;  %v1972_v1 = vld [vmem:[#allocation2 + $0x41] sm:$0xff]  ;;  %v1973_v3 = vld [vmem:[#allocation2 + $0x49] sm:$0xff]  ;;  %v1974_v9 = vld [vmem:[#allocation2 + $0x51] sm:$0xff]  ;;  %v956_v11 = vand.u32 15, %v854_v0 }
 0x19a   : > { %v6553_v31 = vld [vmem:[#allocation8 + $0x168] sm:$0xff]   ;;  %v4006_v10 = vld [vmem:[#allocation2 + $0x91] sm:$0xff] }
 0x19b   : > { %5957 = vmatmul.mubr.msk.bf16.gmra.mxu0 %vm7361_vm8, %v7366_v13  ;;  %vm1296_vm8 = vcmp.ne.s32.totalorder %v914_v24, 15  ;;  %v6549_v24 = vld [vmem:[#allocation8 + $0x118] sm:$0xff]   ;;  %v6555_v0 = vld [vmem:[#allocation8 + $0x108] sm:$0xff]  }
 0x19c   : > { %5960 = vmatprep.mubr.msk.bf16.mxu0 %vm7371_vm12, %v7375_v15  ;;  %5913 = vmatmul.mubr.bf16.gmra.mxu1 %v1530_v16  ;;  %v1353_v38 = vld [vmem:[#allocation2 + $0xff] sm:$0xff]  ;;  %vm7407_vm0 = vmpackc.low %vm1296_vm8, %vm8620_vm1  ;;  %vm1298_vm8 = vcmp.ne.s32.totalorder %v928_v57, 15  ;;  %v7443_v16 = vpack.c.bf16 %v1975_v4, %v1974_v9  ;;  %v7472_v57 = vpack.c.bf16 %v1979_v32, %v1978_v40  ;;  %v8717_v9 = vmov 0  ;;  %v1985_v32 = vld [vmem:[#allocation2 + $0xa9] sm:$0xff] }
 0x19d   : > { %5980 = vmatprep.mubr.msk.bf16.mxu1 %vm7378_vm15, %v5219_v23  ;;  %vm7400_vm15 = vmpackc.low %vm1294_vm7, %vm8620_vm1  ;;  %v8708_v54 = vsel %vm7407_vm0, 4294967295, %v8707_v54  ;;  %vm1300_vm7 = vcmp.ne.s32.totalorder %v942_v60, 15  ;;  %v6551_v23 = vld [vmem:[#allocation8 + $0x170] sm:$0xff]   ;;  %v1983_v4 = vld [vmem:[#allocation2 + $0x99] sm:$0xff] }
 0x19e   : > { %v6559_v40 = vld [vmem:[#allocation8 + $0x148] sm:$0xff]  }
 0x1a0   : > { %v1354_v39 = vld [vmem:[#allocation2 + $0x107] sm:$0xff] }
 0x1a1   : > { %v7397_v41 = vpack.c.bf16 %v1354_v39, %v1353_v38  ;;  %v7462_v39 = vpack.c.bf16 %v1977_v29, %v1976_v25  ;;  %v6557_v29 = vld [vmem:[#allocation8 + $0x150] sm:$0xff]  }
 0x1a3   : > { %5961 = vmatmul.mubr.msk.bf16.gmra.mxu0 %vm7392_vm11, %v7397_v41 }
 0x1a4   : > { %6028 = vmatprep.mubr.msk.bf16.mxu0 %vm7083_vm2, %v7129_v35  ;;  %5981 = vmatmul.mubr.msk.bf16.vlgmr.msra.gmra.mxu1 %vm7400_vm15, %v7404_v52  ;;  %v856_v35 = vadd.s32 104, %v7079_v42  ;;  %vm7429_vm2 = vmpackc.low %vm1298_vm8, %vm8620_vm1  ;;  %vm1302_vm8 = vcmp.ne.s32.totalorder %v956_v11, 15 }
 0x1a5   : > { %6061 = vmatpush3.bf16.msra.mxu1 %v7247_v2  ;;  %5984 = vmatprep.mubr.msk.bf16.mxu1 %vm7407_vm0, %v7414_v63  ;;  %v7433_v2 = vpack.c.bf16 %v1973_v3, %v1972_v1  ;;  %vm7436_vm0 = vmpackc.low %vm1300_vm7, %vm8620_vm1  ;;  %v1980_v1 = vld [vmem:[#allocation2 + $0x81] sm:$0xff]  ;;  %v1981_v3 = vld [vmem:[#allocation2 + $0x89] sm:$0xff] }
 0x1a6   : > { %6062 = vmatprep.subr.bf16.mxu1 %v6546_v55  ;;  %v970_v22 = vand.u32 15, %v856_v35  ;;  %v6556_v35 = vld [vmem:[#allocation8 + $0x158] sm:$0xff]   ;;  %v7490_v11 = vpack.c.bf16 %v1981_v3, %v1980_v1 }
 0x1a8   : > { %vm1304_vm7 = vcmp.ne.s32.totalorder %v970_v22, 15  ;;  %v8719_v22 = vmov 0 }
 0x1a9   : > { %6063 = vmatpush3.bf16.msra.mxu1 %v6546_v55  ;;  %v6552_v55 = vld [vmem:[#allocation8 + $0x110] sm:$0xff]  }
 0x1aa   : > { %6064 = vmatprep.subr.bf16.mxu1 %v6547_v56 }
 0x1ab   : > { %6029 = vmatmul.mubr.msk.bf16.vlgmr.msra.gmra.mxu0 %vm7123_vm5, %v7138_v37  ;;  %v858_v37 = vadd.s32 120, %v7079_v42  ;;  %vm7465_vm5 = vmpackc.low %vm1304_vm7, %vm8620_vm1 }
 0x1ac   : > { %6032 = vmatprep.mubr.msk.bf16.mxu0 %vm7134_vm6, %v7171_v6  ;;  %5985 = vmatmul.mubr.msk.bf16.gmra.mxu1 %vm7429_vm2, %v7433_v2  ;;  %v860_v6 = vadd.s32 136, %v7079_v42  ;;  %vm7458_vm6 = vmpackc.low %vm1302_vm8, %vm8620_vm1 }
 0x1ad   : > { %5988 = vmatprep.mubr.msk.bf16.mxu1 %vm7436_vm0, %v7443_v16  ;;  %6065 = vmatpush3.bf16.msra.mxu1 %v6547_v56  ;;  %v984_v53 = vand.u32 15, %v858_v37  ;;  %v6554_v56 = vld [vmem:[#allocation8 + $0x160] sm:$0xff]  }
 0x1ae   : > { %6066 = vmatprep.subr.bf16.mxu1 %v6548_v12  ;;  %6109 = vmatpush3.bf16.msra.mxu0 %v7297_v47  ;;  %v998_v60 = vand.u32 15, %v860_v6  ;;  %v6558_v37 = vld [vmem:[#allocation8 + $0x100] sm:$0xff]   ;;  %v7512_v6 = vld [vmem:[#allocation8 + $0x1b8] sm:$0xff]  }
 0x1af   : > { %6110 = vmatprep.subr.bf16.mxu0 %v6551_v23  ;;  %vm1306_vm8 = vcmp.ne.s32.totalorder %v984_v53, 15  ;;  %v1987_v53 = vld [vmem:[#allocation2 + $0xb9] sm:$0xff]  ;;  %v4010_v47 = vld [vmem:[#allocation2 + $0xb1] sm:$0xff] }
 0x1b0   : > { %vm1308_vm7 = vcmp.ne.s32.totalorder %v998_v60, 15 }
 0x1b1   : > { %6067 = vmatpush3.bf16.msra.mxu1 %v6548_v12  ;;  %v1982_v12 = vld [vmem:[#allocation2 + $0x91] sm:$0xff] }
 0x1b2   : > { %6068 = vmatprep.subr.bf16.mxu1 %v6549_v24  ;;  %6111 = vmatpush3.bf16.msra.mxu0 %v6551_v23 }
 0x1b3   : > { %6033 = vmatmul.mubr.msk.bf16.gmra.mxu0 %vm7165_vm9, %v7180_v8  ;;  %6112 = vmatprep.subr.bf16.mxu0 %v6553_v31  ;;  %v862_v8 = vadd.s32 152, %v7079_v42  ;;  %vm7493_vm9 = vmpackc.low %vm1308_vm7, %vm8620_vm1 }
 0x1b4   : > { %6036 = vmatprep.mubr.msk.bf16.mxu0 %vm7176_vm10, %v7214_v43  ;;  %5989 = vmatmul.mubr.msk.bf16.gmra.mxu1 %vm7458_vm6, %v7462_v39  ;;  %v864_v43 = vadd.s32 168, %v7079_v42  ;;  %vm7486_vm10 = vmpackc.low %vm1306_vm8, %vm8620_vm1  ;;  %v8720_v22 = vsel %vm7493_vm9, 4294967295, %v8719_v22 }
 0x1b5   : > { %5992 = vmatprep.mubr.msk.bf16.mxu1 %vm7465_vm5, %v7472_v57  ;;  %6069 = vmatpush3.bf16.msra.mxu1 %v6549_v24  ;;  %v8718_v9 = vsel %vm7486_vm10, 4294967295, %v8717_v9  ;;  %v1012_v23 = vand.u32 15, %v862_v8  ;;  %v7500_v24 = vpack.c.bf16 %v1983_v4, %v1982_v12  ;;  %v8723_v8 = vmov 0  ;;  %v1989_v4 = vld [vmem:[#allocation2 + $0xc9] sm:$0xff] }
 0x1b6   : > { %6070 = vmatprep.subr.bf16.mxu1 %v6552_v55  ;;  %6113 = vmatpush3.bf16.msra.mxu0 %v6553_v31  ;;  %v1026_v25 = vand.u32 15, %v864_v43  ;;  %v1984_v31 = vld [vmem:[#allocation2 + $0xa1] sm:$0xff]  ;;  %v872_v12 = vadd.s32 232, %v7079_v42 }
 0x1b7   : > { %6114 = vmatprep.subr.bf16.mxu0 %v6554_v56  ;;  %vm1310_vm8 = vcmp.ne.s32.totalorder %v1012_v23, 15  ;;  %v7520_v60 = vpack.c.bf16 %v1985_v32, %v1984_v31  ;;  %v6560_v43 = vld [vmem:[#allocation8 + $0x140] sm:$0xff]   ;;  %v7544_v23 = vld [vmem:[#allocation8 + $0x1f8] sm:$0xff]  }
 0x1b8   : > { %vm1312_vm7 = vcmp.ne.s32.totalorder %v1026_v25, 15 }
 0x1b9   : > { %6071 = vmatpush3.bf16.msra.mxu1 %v6552_v55  ;;  %v8721_v55 = vmov 0 }
 0x1ba   : > { %6115 = vmatpush3.bf16.msra.mxu0 %v6554_v56  ;;  %6072 = vmatprep.subr.bf16.mxu1 %v6555_v0  ;;  %v1986_v56 = vld [vmem:[#allocation2 + $0xb1] sm:$0xff] }
 0x1bb   : > { %6037 = vmatmul.mubr.msk.bf16.gmra.mxu0 %vm7208_vm13, %v7223_v45  ;;  %6116 = vmatprep.subr.bf16.mxu0 %v6556_v35  ;;  %v866_v45 = vadd.s32 184, %v7079_v42  ;;  %vm7523_vm13 = vmpackc.low %vm1312_vm7, %vm8620_vm1  ;;  %v7531_v1 = vpack.c.bf16 %v1987_v53, %v1986_v56  ;;  %v1993_v53 = vld [vmem:[#allocation2 + $0xe9] sm:$0xff]  ;;  %v1995_v56 = vld [vmem:[#allocation2 + $0xf9] sm:$0xff] }
 0x1bc   : > { %6040 = vmatprep.mubr.msk.bf16.mxu0 %vm7219_vm14, %v7261_v17  ;;  %5993 = vmatmul.mubr.msk.bf16.gmra.mxu1 %vm7486_vm10, %v7490_v11  ;;  %v868_v17 = vadd.s32 200, %v7079_v42  ;;  %vm7516_vm14 = vmpackc.low %vm1310_vm8, %vm8620_vm1  ;;  %v8724_v8 = vsel %vm7523_vm13, 4294967295, %v8723_v8 }
 0x1bd   : > { %5996 = vmatprep.mubr.msk.bf16.mxu1 %vm7493_vm9, %v7500_v24  ;;  %6073 = vmatpush3.bf16.msra.mxu1 %v6555_v0  ;;  %v8722_v55 = vsel %vm7516_vm14, 4294967295, %v8721_v55  ;;  %v1040_v0 = vand.u32 15, %v866_v45  ;;  %v8727_v45 = vmov 0 }
 0x1be   : > { %6117 = vmatpush3.bf16.msra.mxu0 %v6556_v35  ;;  %6074 = vmatprep.subr.bf16.mxu1 %v6558_v37  ;;  %v1054_v3 = vand.u32 15, %v868_v17  ;;  %v1988_v35 = vld [vmem:[#allocation2 + $0xc1] sm:$0xff]  ;;  %v1082_v17 = vand.u32 15, %v872_v12 }
 0x1bf   : > { %6118 = vmatprep.subr.bf16.mxu0 %v6557_v29  ;;  %vm1314_vm8 = vcmp.ne.s32.totalorder %v1040_v0, 15  ;;  %v7551_v25 = vpack.c.bf16 %v1989_v4, %v1988_v35  ;;  %v1996_v35 = vld [vmem:[#allocation2 + $0x101] sm:$0xff]  ;;  %v1997_v4 = vld [vmem:[#allocation2 + $0x109] sm:$0xff] }
 0x1c0   : > { %vm1316_vm7 = vcmp.ne.s32.totalorder %v1054_v3, 15  ;;  %v1994_v3 = vld [vmem:[#allocation2 + $0xf1] sm:$0xff]  ;;  %v2707_v12 = vld [vmem:[#allocation2 + $0x28] sm:$0xff] }
 0x1c1   : > { %6075 = vmatpush3.bf16.msra.mxu1 %v6558_v37 }
 0x1c2   : > { %6119 = vmatpush3.bf16.msra.mxu0 %v6557_v29  ;;  %6156 = vmatprep.subr.bf16.mxu1 %v7512_v6  ;;  %v1990_v29 = vld [vmem:[#allocation2 + $0xd1] sm:$0xff] }
 0x1c3   : > { %6041 = vmatmul.mubr.msk.bf16.gmra.mxu0 %vm7255_vm3, %v7270_v19  ;;  %6120 = vmatprep.subr.bf16.mxu0 %v6559_v40  ;;  %v870_v19 = vadd.s32 216, %v7079_v42  ;;  %vm7554_vm3 = vmpackc.low %vm1316_vm7, %vm8620_vm1 }
 0x1c4   : > { %6044 = vmatprep.mubr.msk.bf16.mxu0 %vm7266_vm4, %v7301_v58  ;;  %5997 = vmatmul.mubr.msk.bf16.gmra.mxu1 %vm7516_vm14, %v7520_v60  ;;  %v1991_v58 = vld [vmem:[#allocation2 + $0xd9] sm:$0xff]  ;;  %vm7547_vm4 = vmpackc.low %vm1314_vm8, %vm8620_vm1  ;;  %v8728_v45 = vsel %vm7554_vm3, 4294967295, %v8727_v45  ;;  %vm8730_vm8 = vnez %v8688_v59  ;;  %vm1320_vm1 = vcmp.ne.s32.totalorder %v1082_v17, 15 }
 0x1c5   : > { %6000 = vmatprep.mubr.msk.bf16.mxu1 %vm7523_vm13, %v7531_v1  ;;  %v1068_v31 = vand.u32 15, %v870_v19  ;;  %vm8729_vm13 = vnez %v8686_v46  ;;  %v7561_v32 = vpack.c.bf16 %v1991_v58, %v1990_v29  ;;  %v7605_v58 = vpack.c.bf16 %v1997_v4, %v1996_v35  ;;  %v2709_v17 = vld [vmem:[#allocation2 + $0x38] sm:$0xff]  ;;  %v6563_v35 = vld [vmem:[#allocation8 + $0x1a8] sm:$0xff]  }
 0x1c6   : > { %6121 = vmatpush3.bf16.msra.mxu0 %v6559_v40  ;;  %v1992_v40 = vld [vmem:[#allocation2 + $0xe1] sm:$0xff]  ;;  %v2713_v4 = vld [vmem:[#allocation2 + $0x58] sm:$0xff] }
 0x1c7   : > { %6122 = vmatprep.subr.bf16.mxu0 %v6560_v43  ;;  %vm1318_vm7 = vcmp.ne.s32.totalorder %v1068_v31, 15  ;;  %v2398_v31 = vld [vmem:[#allocation2 + $0x10f] sm:$0xff] }
 0x1ca   : > { %6123 = vmatpush3.bf16.msra.mxu0 %v6560_v43  ;;  %v8734_v43 = vmov 0 }
 0x1cb   : > { %6045 = vmatmul.mubr.msk.bf16.gmra.mxu0 %vm8729_vm13, %v7310_v61  ;;  %6204 = vmatprep.subr.bf16.mxu0 %v7544_v23  ;;  %v874_v61 = vadd.s32 248, %v7079_v42  ;;  %vm8731_vm13 = vmmov 1   ;;  %v7589_v42 = vpack.c.bf16 %v1995_v56, %v1994_v3  ;;  %v2708_v56 = vld [vmem:[#allocation2 + $0x30] sm:$0xff] }
 0x1cc   : > { %6048 = vmatprep.mubr.msk.bf16.mxu0 %vm8730_vm8, %v7335_v33  ;;  %6001 = vmatmul.mubr.msk.bf16.gmra.mxu1 %vm7547_vm4, %v7551_v25  ;;  %vm7575_vm14 = vmpackc.low %vm1318_vm7, %vm8731_vm13  ;;  %v7579_v33 = vpack.c.bf16 %v1993_v53, %v1992_v40  ;;  %vm8737_vm7 = vnez %v8694_v34  ;;  %v2711_v40 = vld [vmem:[#allocation2 + $0x48] sm:$0xff]  ;;  %v7618_v3 = vpack.c.bf16 %v2709_v17, %v2708_v56  ;;  %v6564_v17 = vld [vmem:[#allocation8 + $0x1a0] sm:$0xff]  }
 0x1cd   : > { %6004 = vmatprep.mubr.msk.bf16.mxu1 %vm7554_vm3, %v7561_v32  ;;  %vm7582_vm8 = vmpackc.low %vm1320_vm1, %vm8731_vm13  ;;  %v1096_v19 = vand.u32 15, %v874_v61  ;;  %vm8736_vm3 = vnez %v8692_v21  ;;  %v2399_v61 = vld [vmem:[#allocation2 + $0x117] sm:$0xff]  ;;  %v6569_v56 = vld [vmem:[#allocation8 + $0x1e8] sm:$0xff]  }
 0x1ce   : > { %v8735_v43 = vsel %vm7582_vm8, 4294967295, %v8734_v43  ;;  %v7616_v53 = vpack.c.bf16 %v2399_v61, %v2398_v31  ;;  %v2714_v31 = vld [vmem:[#allocation2 + $0x60] sm:$0xff]  ;;  %v6565_v61 = vld [vmem:[#allocation8 + $0x198] sm:$0xff]  }
 0x1cf   : > { %vm1322_vm1 = vcmp.ne.s32.totalorder %v1096_v19, 15  ;;  %v6562_v19 = vld [vmem:[#allocation8 + $0x1b0] sm:$0xff]  }
 0x1d3   : > { %6049 = vmatmul.mubr.msk.bf16.gmra.mxu0 %vm8736_vm3, %v7344_v28  ;;  %vm7601_vm3 = vmpackc.low %vm1322_vm1, %vm8731_vm13  ;;  %vm8741_vm13 = vnez %v8702_v20  ;;  %vm8742_vm1 = vnez %v8708_v54  ;;  %v4002_v54 = vld [vmem:[#allocation2 + $0x71] sm:$0xff] }
 0x1d4   : > { %6052 = vmatprep.mubr.msk.bf16.mxu0 %vm8737_vm7, %v7366_v13  ;;  %6005 = vmatmul.mubr.msk.bf16.gmra.mxu1 %vm7575_vm14, %v7579_v33  ;;  %v2706_v13 = vld [vmem:[#allocation2 + $0x20] sm:$0xff]  ;;  %vm8740_vm7 = vnez %v8698_v50 }
 0x1d5   : > { %6008 = vmatprep.mubr.msk.bf16.mxu1 %vm7582_vm8, %v7589_v42  ;;  %v2738_v29 = vpack.c.bf16 %v2707_v12, %v2706_v13  ;;  %v2715_v12 = vld [vmem:[#allocation2 + $0x68] sm:$0xff]  ;;  %v2712_v13 = vld [vmem:[#allocation2 + $0x50] sm:$0xff] }
 0x1db   : > { %6053 = vmatmul.mubr.msk.bf16.gmra.mxu0 %vm8740_vm7, %v7375_v15  ;;  %v2710_v15 = vld [vmem:[#allocation2 + $0x40] sm:$0xff] }
 0x1dc   : > { %6056 = vmatprep.mubr.msk.bf16.mxu0 %vm7371_vm12, %v7397_v41  ;;  %6009 = vmatmul.mubr.msk.bf16.gmra.mxu1 %vm7601_vm3, %v7605_v58  ;;  %v7623_v41 = vpack.c.bf16 %v2711_v40, %v2710_v15  ;;  %v2717_v40 = vld [vmem:[#allocation2 + $0x78] sm:$0xff]  ;;  %v2716_v15 = vld [vmem:[#allocation2 + $0x70] sm:$0xff] }
 0x1dd   : > { %6076 = vmatprep.mubr.bf16.mxu1 %v2738_v29  ;;  %v7631_v29 = vpack.c.bf16 %v2713_v4, %v2712_v13  ;;  %v2718_v4 = vld [vmem:[#allocation2 + $0x80] sm:$0xff]  ;;  %v2721_v13 = vld [vmem:[#allocation2 + $0x98] sm:$0xff] }
 0x1e3   : > { %6057 = vmatmul.mubr.msk.bf16.gmra.mxu0 %vm7392_vm11, %v7616_v53 }
 0x1e4   : > { %6124 = vmatprep.mubr.msk.bf16.mxu0 %vm8741_vm13, %v7404_v52  ;;  %6077 = vmatmul.mubr.bf16.vlgmr.msra.gmra.mxu1 %v7618_v3  ;;  %v7636_v52 = vpack.c.bf16 %v2715_v12, %v2714_v31  ;;  %v6571_v12 = vld [vmem:[#allocation8 + $0x188] sm:$0xff]   ;;  %v6572_v31 = vld [vmem:[#allocation8 + $0x1d8] sm:$0xff]  }
 0x1e5   : > { %6157 = vmatpush3.bf16.msra.mxu1 %v7512_v6  ;;  %6080 = vmatprep.mubr.bf16.mxu1 %v7623_v41  ;;  %v6567_v6 = vld [vmem:[#allocation8 + $0x1f0] sm:$0xff]  }
 0x1e6   : > { %6158 = vmatprep.subr.bf16.mxu1 %v6562_v19 }
 0x1e9   : > { %6159 = vmatpush3.bf16.msra.mxu1 %v6562_v19  ;;  %v7644_v19 = vpack.c.bf16 %v2717_v40, %v2716_v15  ;;  %v2722_v40 = vld [vmem:[#allocation2 + $0xa0] sm:$0xff]  ;;  %v2725_v15 = vld [vmem:[#allocation2 + $0xb8] sm:$0xff] }
 0x1ea   : > { %6160 = vmatprep.subr.bf16.mxu1 %v6563_v35 }
 0x1eb   : > { %6125 = vmatmul.mubr.msk.bf16.vlgmr.msra.gmra.mxu0 %vm7400_vm15, %v7414_v63  ;;  %v2719_v63 = vld [vmem:[#allocation2 + $0x88] sm:$0xff] }
 0x1ec   : > { %6128 = vmatprep.mubr.msk.bf16.mxu0 %vm8742_vm1, %v7433_v2  ;;  %6081 = vmatmul.mubr.bf16.gmra.mxu1 %v7631_v29  ;;  %v6568_v2 = vld [vmem:[#allocation8 + $0x190] sm:$0xff]  }
 0x1ed   : > { %6084 = vmatprep.mubr.bf16.mxu1 %v7636_v52  ;;  %6161 = vmatpush3.bf16.msra.mxu1 %v6563_v35  ;;  %v7649_v35 = vpack.c.bf16 %v2719_v63, %v2718_v4  ;;  %v7668_v63 = vld [vmem:[#allocation8 + $0x238] sm:$0xff]   ;;  %v2727_v4 = vld [vmem:[#allocation2 + $0xc8] sm:$0xff] }
 0x1ee   : > { %6162 = vmatprep.subr.bf16.mxu1 %v6564_v17  ;;  %6205 = vmatpush3.bf16.msra.mxu0 %v7544_v23  ;;  %v6570_v23 = vld [vmem:[#allocation8 + $0x1e0] sm:$0xff]  }
 0x1ef   : > { %6206 = vmatprep.subr.bf16.mxu0 %v6567_v6 }
 0x1f1   : > { %6163 = vmatpush3.bf16.msra.mxu1 %v6564_v17  ;;  %v2720_v17 = vld [vmem:[#allocation2 + $0x90] sm:$0xff] }
 0x1f2   : > { %6164 = vmatprep.subr.bf16.mxu1 %v6565_v61  ;;  %6207 = vmatpush3.bf16.msra.mxu0 %v6567_v6  ;;  %v7656_v6 = vpack.c.bf16 %v2721_v13, %v2720_v17  ;;  %v2726_v13 = vld [vmem:[#allocation2 + $0xc0] sm:$0xff]  ;;  %v2728_v17 = vld [vmem:[#allocation2 + $0xd0] sm:$0xff] }
 0x1f3   : > { %6129 = vmatmul.mubr.msk.bf16.gmra.mxu0 %vm7429_vm2, %v7443_v16  ;;  %6208 = vmatprep.subr.bf16.mxu0 %v6569_v56  ;;  %v2723_v16 = vld [vmem:[#allocation2 + $0xa8] sm:$0xff] }
 0x1f4   : > { %6132 = vmatprep.mubr.msk.bf16.mxu0 %vm7436_vm0, %v7462_v39  ;;  %6085 = vmatmul.mubr.bf16.gmra.mxu1 %v7644_v19  ;;  %v6574_v39 = vld [vmem:[#allocation8 + $0x180] sm:$0xff]  }
 0x1f5   : > { %6088 = vmatprep.mubr.bf16.mxu1 %v7649_v35  ;;  %6165 = vmatpush3.bf16.msra.mxu1 %v6565_v61  ;;  %v7661_v61 = vpack.c.bf16 %v2723_v16, %v2722_v40  ;;  %v2731_v16 = vld [vmem:[#allocation2 + $0xe8] sm:$0xff] }
 0x1f6   : > { %6166 = vmatprep.subr.bf16.mxu1 %v6568_v2  ;;  %6209 = vmatpush3.bf16.msra.mxu0 %v6569_v56  ;;  %v6573_v56 = vld [vmem:[#allocation8 + $0x1d0] sm:$0xff]  }
 0x1f7   : > { %6210 = vmatprep.subr.bf16.mxu0 %v6570_v23 }
 0x1f9   : > { %6167 = vmatpush3.bf16.msra.mxu1 %v6568_v2  ;;  %v2724_v2 = vld [vmem:[#allocation2 + $0xb0] sm:$0xff] }
 0x1fa   : > { %6211 = vmatpush3.bf16.msra.mxu0 %v6570_v23  ;;  %6168 = vmatprep.subr.bf16.mxu1 %v6571_v12  ;;  %v7670_v23 = vpack.c.bf16 %v2725_v15, %v2724_v2  ;;  %v2732_v15 = vld [vmem:[#allocation2 + $0xf0] sm:$0xff] }
 0x1fb   : > { %6133 = vmatmul.mubr.msk.bf16.gmra.mxu0 %vm7458_vm6, %v7472_v57  ;;  %6212 = vmatprep.subr.bf16.mxu0 %v6572_v31  ;;  %v6575_v57 = vld [vmem:[#allocation8 + $0x1c8] sm:$0xff]  }
 0x1fc   : > { %6136 = vmatprep.mubr.msk.bf16.mxu0 %vm7465_vm5, %v7490_v11  ;;  %6089 = vmatmul.mubr.bf16.gmra.mxu1 %v7656_v6  ;;  %v7676_v11 = vpack.c.bf16 %v2727_v4, %v2726_v13  ;;  %v2734_v4 = vld [vmem:[#allocation2 + $0x100] sm:$0xff]  ;;  %v3350_v2 = vld [vmem:[#allocation2 + $0x2f] sm:$0xff] }
 0x1fd   : > { %6092 = vmatprep.mubr.bf16.mxu1 %v7661_v61  ;;  %6169 = vmatpush3.bf16.msra.mxu1 %v6571_v12  ;;  %v6576_v12 = vld [vmem:[#allocation8 + $0x1c0] sm:$0xff]   ;;  %v2736_v13 = vld [vmem:[#allocation2 + $0x110] sm:$0xff] }
 0x1fe   : > { %6213 = vmatpush3.bf16.msra.mxu0 %v6572_v31  ;;  %6170 = vmatprep.subr.bf16.mxu1 %v6574_v39  ;;  %v2729_v31 = vld [vmem:[#allocation2 + $0xd8] sm:$0xff] }
 0x1ff   : > { %6214 = vmatprep.subr.bf16.mxu0 %v6573_v56  ;;  %v7683_v40 = vpack.c.bf16 %v2729_v31, %v2728_v17  ;;  %v3351_v31 = vld [vmem:[#allocation2 + $0x37] sm:$0xff]  ;;  %v3353_v17 = vld [vmem:[#allocation2 + $0x47] sm:$0xff] }
 0x201   : > { %6171 = vmatpush3.bf16.msra.mxu1 %v6574_v39 }
 0x202   : > { %6215 = vmatpush3.bf16.msra.mxu0 %v6573_v56  ;;  %6252 = vmatprep.subr.bf16.mxu1 %v7668_v63  ;;  %v2735_v56 = vld [vmem:[#allocation2 + $0x108] sm:$0xff] }
 0x203   : > { %6137 = vmatmul.mubr.msk.bf16.gmra.mxu0 %vm7486_vm10, %v7500_v24  ;;  %6216 = vmatprep.subr.bf16.mxu0 %v6575_v57  ;;  %v2730_v24 = vld [vmem:[#allocation2 + $0xe0] sm:$0xff]  ;;  %vm8743_vm10 = vnez %v8722_v55 }
 0x204   : > { %6140 = vmatprep.mubr.msk.bf16.mxu0 %vm7493_vm9, %v7520_v60  ;;  %6093 = vmatmul.mubr.bf16.gmra.mxu1 %v7670_v23  ;;  %v7688_v39 = vpack.c.bf16 %v2731_v16, %v2730_v24  ;;  %vm8744_vm9 = vnez %v8724_v8  ;;  %v2733_v60 = vld [vmem:[#allocation2 + $0xf8] sm:$0xff]  ;;  %v3354_v24 = vld [vmem:[#allocation2 + $0x4f] sm:$0xff] }
 0x205   : > { %6096 = vmatprep.mubr.bf16.mxu1 %v7676_v11  ;;  %v3043_v16 = vld [vmem:[#allocation2 + $0x119] sm:$0xff] }
 0x206   : > { %6217 = vmatpush3.bf16.msra.mxu0 %v6575_v57  ;;  %v7695_v57 = vpack.c.bf16 %v2733_v60, %v2732_v15 }
 0x207   : > { %6218 = vmatprep.subr.bf16.mxu0 %v6576_v12 }
 0x20a   : > { %6219 = vmatpush3.bf16.msra.mxu0 %v6576_v12 }
 0x20b   : > { %6141 = vmatmul.mubr.msk.bf16.gmra.mxu0 %vm8743_vm10, %v7531_v1  ;;  %v7700_v1 = vpack.c.bf16 %v2735_v56, %v2734_v4  ;;  %vm8745_vm10 = vnez %v8728_v45  ;;  %v3352_v56 = vld [vmem:[#allocation2 + $0x3f] sm:$0xff]  ;;  %v3355_v4 = vld [vmem:[#allocation2 + $0x57] sm:$0xff] }
 0x20c   : > { %6144 = vmatprep.mubr.msk.bf16.mxu0 %vm8744_vm9, %v7551_v25  ;;  %6097 = vmatmul.mubr.bf16.gmra.mxu1 %v7683_v40  ;;  %v2737_v25 = vld [vmem:[#allocation2 + $0x118] sm:$0xff]  ;;  %v5398_v15 = vpack.c.bf16 %v3353_v17, %v3352_v56 }
 0x20d   : > { %6100 = vmatprep.mubr.bf16.mxu1 %v7688_v39  ;;  %v7707_v12 = vpack.c.bf16 %v2737_v25, %v2736_v13  ;;  %v5401_v25 = vpack.c.bf16 %v3355_v4, %v3354_v24  ;;  %v3359_v24 = vld [vmem:[#allocation2 + $0x77] sm:$0xff] }
 0x213   : > { %6145 = vmatmul.mubr.msk.bf16.gmra.mxu0 %vm7547_vm4, %v7561_v32  ;;  %v5395_v32 = vpack.c.bf16 %v3351_v31, %v3350_v2  ;;  %v6579_v2 = vld [vmem:[#allocation8 + $0x228] sm:$0xff]  }
 0x214   : > { %6148 = vmatprep.mubr.msk.bf16.mxu0 %vm8745_vm10, %v7579_v33  ;;  %6101 = vmatmul.mubr.bf16.gmra.mxu1 %v7695_v57  ;;  %vm8746_vm10 = vnez %v8650_v48  ;;  %v3042_v33 = vld [vmem:[#allocation2 + $0x111] sm:$0xff]  ;;  %v3357_v31 = vld [vmem:[#allocation2 + $0x67] sm:$0xff] }
 0x215   : > { %6104 = vmatprep.mubr.bf16.mxu1 %v7700_v1  ;;  %v7718_v60 = vpack.c.bf16 %v3043_v16, %v3042_v33  ;;  %v3356_v16 = vld [vmem:[#allocation2 + $0x5f] sm:$0xff] }
 0x216   : > { %v5404_v17 = vpack.c.bf16 %v3357_v31, %v3356_v16  ;;  %v3361_v31 = vld [vmem:[#allocation2 + $0x87] sm:$0xff] }
 0x21b   : > { %6149 = vmatmul.mubr.msk.bf16.gmra.mxu0 %vm7575_vm14, %v7589_v42  ;;  %v6578_v42 = vld [vmem:[#allocation8 + $0x230] sm:$0xff]  }
 0x21c   : > { %6152 = vmatprep.mubr.msk.bf16.mxu0 %vm7582_vm8, %v7605_v58  ;;  %6105 = vmatmul.mubr.bf16.gmra.mxu1 %v7707_v12  ;;  %vm8748_vm8 = vnez %v8658_v36 }
 0x21d   : > { %6172 = vmatprep.mubr.msk.bf16.mxu1 %vm8746_vm10, %v5395_v32  ;;  %vm8747_vm10 = vnez %v8656_v27  ;;  %v3358_v32 = vld [vmem:[#allocation2 + $0x6f] sm:$0xff] }
 0x223   : > { %6153 = vmatmul.mubr.msk.bf16.gmra.mxu0 %vm7601_vm3, %v7718_v60  ;;  %v5886_v58 = vpop.f32.mrf.mxu1 }
 0x224   : > { %6220 = vmatprep.mubr.bf16.mxu0 %v7618_v3  ;;  %6173 = vmatmul.mubr.msk.bf16.vlgmr.msra.gmra.mxu1 %vm8747_vm10, %v5398_v15  ;;  %v6580_v3 = vld [vmem:[#allocation8 + $0x220] sm:$0xff]   ;;  %vm8750_vm10 = vnez %v8666_v7 }
 0x225   : > { %6253 = vmatpush3.bf16.msra.mxu1 %v7668_v63  ;;  %6176 = vmatprep.mubr.msk.bf16.mxu1 %vm8748_vm8, %v5401_v25  ;;  %v1630_v48 = vpop.f32.mrf.mxu1  ;;  %v5407_v63 = vpack.c.bf16 %v3359_v24, %v3358_v32  ;;  %vm8749_vm8 = vnez %v8664_v62  ;;  %v6581_v25 = vld [vmem:[#allocation8 + $0x218] sm:$0xff]  }
 0x226   : > { %6254 = vmatprep.subr.bf16.mxu1 %v6578_v42  ;;  %v3360_v24 = vld [vmem:[#allocation2 + $0x7f] sm:$0xff] }
 0x227   : > { %v5887_v13 = vpop.f32.mrf.mxu1  ;;  %v5410_v7 = vpack.c.bf16 %v3361_v31, %v3360_v24  ;;  %v6583_v31 = vld [vmem:[#allocation8 + $0x208] sm:$0xff]  }
 0x229   : > { %v1633_v33 = vpop.f32.mrf.mxu1  ;;  %6255 = vmatpush3.bf16.msra.mxu1 %v6578_v42 }
 0x22a   : > { %6256 = vmatprep.subr.bf16.mxu1 %v6579_v2 }
 0x22b   : > { %v5934_v27 = vpop.f32.mrf.mxu0  ;;  %6221 = vmatmul.mubr.bf16.vlgmr.msra.gmra.mxu0 %v7623_v41 }
 0x22c   : > { %v7730_v56 = vadd.f32 %v5934_v27, %v5886_v58  ;;  %6224 = vmatprep.mubr.bf16.mxu0 %v7631_v29  ;;  %v5890_v36 = vpop.f32.mrf.mxu1  ;;  %6177 = vmatmul.mubr.msk.bf16.gmra.mxu1 %vm8749_vm8, %v5404_v17  ;;  %v3362_v29 = vld [vmem:[#allocation2 + $0x8f] sm:$0xff]  ;;  %v3363_v27 = vld [vmem:[#allocation2 + $0x97] sm:$0xff]  ;;  %vm8751_vm8 = vnez %v8672_v30 }
 0x22d   : > { %v1839_v15 = vpop.f32.mrf.mxu0  ;;  %6180 = vmatprep.mubr.msk.bf16.mxu1 %vm8750_vm10, %v5407_v63  ;;  %6257 = vmatpush3.bf16.msra.mxu1 %v6579_v2  ;;  %v5413_v63 = vpack.c.bf16 %v3363_v27, %v3362_v29  ;;  %vm8752_vm10 = vnez %v8674_v44  ;;  %v3365_v29 = vld [vmem:[#allocation2 + $0xa7] sm:$0xff]  ;;  %v3364_v27 = vld [vmem:[#allocation2 + $0x9f] sm:$0xff] }
 0x22e   : > { %v7737_v4 = vadd.f32 %v1839_v15, %v1630_v48  ;;  %v1646_v42 = vpop.f32.mrf.mxu1  ;;  %6258 = vmatprep.subr.bf16.mxu1 %v6580_v3  ;;  %v6582_v48 = vld [vmem:[#allocation8 + $0x210] sm:$0xff]   ;;  %v5416_v44 = vpack.c.bf16 %v3365_v29, %v3364_v27  ;;  %v3368_v27 = vld [vmem:[#allocation2 + $0xbf] sm:$0xff] }
 0x22f   : > { %v5935_v41 = vpop.f32.mrf.mxu0 }
 0x230   : > { %v7739_v58 = vadd.f32 %v5935_v41, %v5887_v13  ;;  %v5891_v32 = vpop.f32.mrf.mxu1 }
 0x231   : > { %v1842_v16 = vpop.f32.mrf.mxu0  ;;  %6259 = vmatpush3.bf16.msra.mxu1 %v6580_v3 }
 0x232   : > { %v7741_v62 = vadd.f32 %v1842_v16, %v1633_v33  ;;  %v1649_v17 = vpop.f32.mrf.mxu1  ;;  %6260 = vmatprep.subr.bf16.mxu1 %v6581_v25 }
 0x233   : > { %v5938_v2 = vpop.f32.mrf.mxu0  ;;  %6225 = vmatmul.mubr.bf16.gmra.mxu0 %v7636_v52 }
 0x234   : > { %v7744_v15 = vadd.f32 %v5938_v2, %v5890_v36  ;;  %6228 = vmatprep.mubr.bf16.mxu0 %v7644_v19  ;;  %v5894_v13 = vpop.f32.mrf.mxu1  ;;  %6181 = vmatmul.mubr.msk.bf16.gmra.mxu1 %vm8751_vm8, %v5410_v7  ;;  %v3366_v19 = vld [vmem:[#allocation2 + $0xaf] sm:$0xff]  ;;  %v3367_v2 = vld [vmem:[#allocation2 + $0xb7] sm:$0xff]  ;;  %vm8753_vm8 = vnez %v8680_v5 }
 0x235   : > { %v1855_v3 = vpop.f32.mrf.mxu0  ;;  %6184 = vmatprep.mubr.msk.bf16.mxu1 %vm8752_vm10, %v5413_v63  ;;  %6261 = vmatpush3.bf16.msra.mxu1 %v6581_v25  ;;  %v5419_v63 = vpack.c.bf16 %v3367_v2, %v3366_v19  ;;  %vm8754_vm10 = vnez %v8682_v18  ;;  %v3371_v18 = vld [vmem:[#allocation2 + $0xd7] sm:$0xff] }
 0x236   : > { %v7751_v33 = vadd.f32 %v1855_v3, %v1646_v42  ;;  %v1662_v41 = vpop.f32.mrf.mxu1  ;;  %6262 = vmatprep.subr.bf16.mxu1 %v6582_v48  ;;  %v6584_v42 = vld [vmem:[#allocation8 + $0x200] sm:$0xff]  }
 0x237   : > { %v5939_v52 = vpop.f32.mrf.mxu0 }
 0x238   : > { %v7753_v36 = vadd.f32 %v5939_v52, %v5891_v32  ;;  %v5895_v16 = vpop.f32.mrf.mxu1 }
 0x239   : > { %v1858_v24 = vpop.f32.mrf.mxu0  ;;  %6263 = vmatpush3.bf16.msra.mxu1 %v6582_v48 }
 0x23a   : > { %v7755_v30 = vadd.f32 %v1858_v24, %v1649_v17  ;;  %v1665_v7 = vpop.f32.mrf.mxu1  ;;  %6264 = vmatprep.subr.bf16.mxu1 %v6583_v31  ;;  %v3370_v24 = vld [vmem:[#allocation2 + $0xcf] sm:$0xff] }
 0x23b   : > { %v5942_v25 = vpop.f32.mrf.mxu0  ;;  %6229 = vmatmul.mubr.bf16.gmra.mxu0 %v7649_v35  ;;  %v3369_v35 = vld [vmem:[#allocation2 + $0xc7] sm:$0xff] }
 0x23c   : > { %v7758_v3 = vadd.f32 %v5942_v25, %v5894_v13  ;;  %6232 = vmatprep.mubr.bf16.mxu0 %v7656_v6  ;;  %v5898_v32 = vpop.f32.mrf.mxu1  ;;  %6185 = vmatmul.mubr.msk.bf16.gmra.mxu1 %vm8753_vm8, %v5416_v44  ;;  %v5422_v2 = vpack.c.bf16 %v3369_v35, %v3368_v27  ;;  %vm8755_vm8 = vnez %v8686_v46 }
 0x23d   : > { %v1871_v48 = vpop.f32.mrf.mxu0  ;;  %6188 = vmatprep.mubr.msk.bf16.mxu1 %vm8754_vm10, %v5419_v63  ;;  %6265 = vmatpush3.bf16.msra.mxu1 %v6583_v31  ;;  %vm8756_vm10 = vnez %v8688_v59 }
 0x23e   : > { %v7765_v17 = vadd.f32 %v1871_v48, %v1662_v41  ;;  %v1678_v52 = vpop.f32.mrf.mxu1  ;;  %6266 = vmatprep.subr.bf16.mxu1 %v6584_v42  ;;  %v5425_v41 = vpack.c.bf16 %v3371_v18, %v3370_v24 }
 0x23f   : > { %v5943_v29 = vpop.f32.mrf.mxu0 }
 0x240   : > { %v7767_v19 = vadd.f32 %v5943_v29, %v5895_v16  ;;  %v5899_v13 = vpop.f32.mrf.mxu1  ;;  %v3373_v29 = vld [vmem:[#allocation2 + $0xe7] sm:$0xff] }
 0x241   : > { %v1874_v6 = vpop.f32.mrf.mxu0  ;;  %6267 = vmatpush3.bf16.msra.mxu1 %v6584_v42 }
 0x242   : > { %v7769_v5 = vadd.f32 %v1874_v6, %v1665_v7  ;;  %v1681_v44 = vpop.f32.mrf.mxu1  ;;  %v3372_v6 = vld [vmem:[#allocation2 + $0xdf] sm:$0xff] }
 0x243   : > { %v5946_v25 = vpop.f32.mrf.mxu0  ;;  %6233 = vmatmul.mubr.bf16.gmra.mxu0 %v7661_v61  ;;  %v5428_v46 = vpack.c.bf16 %v3373_v29, %v3372_v6 }
 0x244   : > { %v7772_v31 = vadd.f32 %v5946_v25, %v5898_v32  ;;  %6236 = vmatprep.mubr.bf16.mxu0 %v7670_v23  ;;  %v5902_v16 = vpop.f32.mrf.mxu1  ;;  %6189 = vmatmul.mubr.msk.bf16.gmra.mxu1 %vm8755_vm8, %v5422_v2  ;;  %v3374_v32 = vld [vmem:[#allocation2 + $0xef] sm:$0xff]  ;;  %v3375_v2 = vld [vmem:[#allocation2 + $0xf7] sm:$0xff]  ;;  %vm8757_vm8 = vnez %v8692_v21 }
 0x245   : > { %v1887_v63 = vpop.f32.mrf.mxu0  ;;  %6192 = vmatprep.mubr.msk.bf16.mxu1 %vm8756_vm10, %v5425_v41  ;;  %v5431_v59 = vpack.c.bf16 %v3375_v2, %v3374_v32  ;;  %vm8758_vm10 = vnez %v8694_v34  ;;  %v3376_v32 = vld [vmem:[#allocation2 + $0xff] sm:$0xff] }
 0x246   : > { %v7779_v7 = vadd.f32 %v1887_v63, %v1678_v52  ;;  %v1694_v42 = vpop.f32.mrf.mxu1 }
 0x247   : > { %v5947_v48 = vpop.f32.mrf.mxu0 }
 0x248   : > { %v7781_v35 = vadd.f32 %v5947_v48, %v5899_v13  ;;  %v5903_v61 = vpop.f32.mrf.mxu1  ;;  %v3377_v48 = vld [vmem:[#allocation2 + $0x107] sm:$0xff] }
 0x249   : > { %v1890_v24 = vpop.f32.mrf.mxu0 }
 0x24a   : > { %v7783_v23 = vadd.f32 %v1890_v24, %v1681_v44  ;;  %v7785_v27 = vpop.f32.mrf.mxu1  ;;  %v5434_v24 = vpack.c.bf16 %v3377_v48, %v3376_v32  ;;  %v3994_v48 = vld [vmem:[#allocation2 + $0x31] sm:$0xff] }
 0x24b   : > { %v5950_v18 = vpop.f32.mrf.mxu0  ;;  %6237 = vmatmul.mubr.bf16.gmra.mxu0 %v7676_v11 }
 0x24c   : > { %v7788_v52 = vadd.f32 %v5950_v18, %v5902_v16  ;;  %6240 = vmatprep.mubr.bf16.mxu0 %v7683_v40  ;;  %v5906_v13 = vpop.f32.mrf.mxu1  ;;  %6193 = vmatmul.mubr.msk.bf16.gmra.mxu1 %vm8757_vm8, %v5428_v46  ;;  %v3380_v18 = vld [vmem:[#allocation2 + $0x11f] sm:$0xff] }
 0x24d   : > { %v1903_v25 = vpop.f32.mrf.mxu0  ;;  %6196 = vmatprep.mubr.msk.bf16.mxu1 %vm8758_vm10, %v5431_v59  ;;  %v3381_v59 = vld [vmem:[#allocation2 + $0x127] sm:$0xff] }
 0x24e   : > { %v7795_v44 = vadd.f32 %v1903_v25, %v1694_v42  ;;  %v1710_v41 = vpop.f32.mrf.mxu1  ;;  %v3995_v25 = vld [vmem:[#allocation2 + $0x39] sm:$0xff]  ;;  %v5440_v50 = vpack.c.bf16 %v3381_v59, %v3380_v18  ;;  %v3997_v59 = vld [vmem:[#allocation2 + $0x49] sm:$0xff] }
 0x24f   : > { %v5951_v63 = vpop.f32.mrf.mxu0  ;;  %v5459_v14 = vpack.c.bf16 %v3995_v25, %v3994_v48 }
 0x250   : > { %v7797_v29 = vadd.f32 %v5951_v63, %v5903_v61  ;;  %v5907_v11 = vpop.f32.mrf.mxu1 }
 0x251   : > { %v7799_v16 = vpop.f32.mrf.mxu0 }
 0x252   : > { %v7801_v40 = vpop.f32.mrf.mxu1 }
 0x253   : > { %v5954_v21 = vpop.f32.mrf.mxu0  ;;  %6241 = vmatmul.mubr.bf16.gmra.mxu0 %v7688_v39 }
 0x254   : > { %v7804_v6 = vadd.f32 %v5954_v21, %v5906_v13  ;;  %6244 = vmatprep.mubr.bf16.mxu0 %v7695_v57  ;;  %v5910_v34 = vpop.f32.mrf.mxu1  ;;  %6197 = vmatmul.mubr.msk.bf16.gmra.mxu1 %vm8740_vm7, %v5434_v24 }
 0x255   : > { %v1919_v42 = vpop.f32.mrf.mxu0  ;;  %6200 = vmatprep.mubr.msk.bf16.mxu1 %vm7371_vm12, %v7616_v53 }
 0x256   : > { %v7812_v61 = vadd.f32 %v1919_v42, %v1710_v41  ;;  %v1726_v46 = vpop.f32.mrf.mxu1 }
 0x257   : > { %v5955_v2 = vpop.f32.mrf.mxu0 }
 0x258   : > { %v7814_v39 = vadd.f32 %v5955_v2, %v5907_v11  ;;  %v5911_v13 = vpop.f32.mrf.mxu1  ;;  %v6601_v2 = vld [vmem:[#allocation2] sm:$0xff] }
 0x259   : > { %v7816_v57 = vpop.f32.mrf.mxu0  ;;  %v3735_v18 = vpack.c.bf16 %v6601_v2, %v6601_v2 }
 0x25a   : > { %v7818_v63 = vpop.f32.mrf.mxu1 }
 0x25b   : > { %v5958_v32 = vpop.f32.mrf.mxu0  ;;  %6245 = vmatmul.mubr.bf16.gmra.mxu0 %v7700_v1  ;;  %v3996_v1 = vld [vmem:[#allocation2 + $0x41] sm:$0xff] }
 0x25c   : > { %v7821_v53 = vadd.f32 %v5958_v32, %v5910_v34  ;;  %6248 = vmatprep.mubr.bf16.mxu0 %v7707_v12  ;;  %v5914_v41 = vpop.f32.mrf.mxu1  ;;  %6201 = vmatmul.mubr.msk.bf16.gmra.mxu1 %vm7392_vm11, %v5440_v50  ;;  %v3999_v12 = vld [vmem:[#allocation2 + $0x59] sm:$0xff]  ;;  %v5462_v50 = vpack.c.bf16 %v3997_v59, %v3996_v1  ;;  %v3998_v32 = vld [vmem:[#allocation2 + $0x51] sm:$0xff] }
 0x25d   : > { %v1935_v11 = vpop.f32.mrf.mxu0  ;;  %6268 = vmatprep.mubr.msk.bf16.mxu1 %vm8741_vm13, %v5459_v14 }
 0x25e   : > { %v7828_v24 = vadd.f32 %v1935_v11, %v1726_v46  ;;  %v1742_v21 = vpop.f32.mrf.mxu1  ;;  %v5465_v46 = vpack.c.bf16 %v3999_v12, %v3998_v32  ;;  %v4001_v12 = vld [vmem:[#allocation2 + $0x69] sm:$0xff] }
 0x25f   : > { %v5959_v42 = vpop.f32.mrf.mxu0 }
 0x260   : > { %v7830_v34 = vadd.f32 %v5959_v42, %v5911_v13  ;;  %v5915_v25 = vpop.f32.mrf.mxu1 }
 0x261   : > { %v7832_v48 = vpop.f32.mrf.mxu0 }
 0x262   : > { %v7834_v26 = vpop.f32.mrf.mxu1 }
 0x263   : > { %8759 = vst [vmem:[#allocation17_spill] sm:$0xff] %v7834_v26  ;;  %v5962_v20 = vpop.f32.mrf.mxu0  ;;  %6249 = vmatmul.mubr.bf16.gmra.mxu0 %v3735_v18  ;;  %v4000_v18 = vld [vmem:[#allocation2 + $0x61] sm:$0xff] }
 0x264   : > { %v7836_v14 = vadd.f32 %v5962_v20, %v5914_v41  ;;  %v5982_v11 = vpop.f32.mrf.mxu1  ;;  %6269 = vmatmul.mubr.msk.bf16.vlgmr.msra.gmra.mxu1 %vm7400_vm15, %v5462_v50  ;;  %v4003_v20 = vld [vmem:[#allocation2 + $0x79] sm:$0xff] }
 0x265   : > { %v1951_v2 = vpop.f32.mrf.mxu0  ;;  %v2338_v13 = vadd.f32 %v5982_v11, %v7730_v56  ;;  %6272 = vmatprep.mubr.msk.bf16.mxu1 %vm8742_vm1, %v5465_v46  ;;  %v5468_v11 = vpack.c.bf16 %v4001_v12, %v4000_v18  ;;  %v4004_v12 = vld [vmem:[#allocation2 + $0x81] sm:$0xff] }
 0x266   : > { %v7843_v42 = vadd.f32 %v1951_v2, %v1742_v21  ;;  %v2209_v26 = vpop.f32.mrf.mxu1  ;;  %v5471_v2 = vpack.c.bf16 %v4003_v20, %v4002_v54 }
 0x267   : > { %v5963_v1 = vpop.f32.mrf.mxu0  ;;  %v2336_v59 = vadd.f32 %v2209_v26, %v7737_v4 }
 0x268   : > { %8760 = vst [vmem:[#allocation18_spill] sm:$0xff] %v7843_v42  ;;  %v7846_v41 = vadd.f32 %v5963_v1, %v5915_v25  ;;  %v5983_v32 = vpop.f32.mrf.mxu1 }
 0x269   : > { %v7848_v49 = vpop.f32.mrf.mxu0  ;;  %v2339_v50 = vadd.f32 %v5983_v32, %v7739_v58  ;;  %v4005_v32 = vld [vmem:[#allocation2 + $0x89] sm:$0xff] }
 0x26a   : > { %v2212_v56 = vpop.f32.mrf.mxu1  ;;  %v5474_v54 = vpack.c.bf16 %v4005_v32, %v4004_v12  ;;  %v4008_v12 = vld [vmem:[#allocation2 + $0xa1] sm:$0xff]  ;;  %v4009_v32 = vld [vmem:[#allocation2 + $0xa9] sm:$0xff] }
 0x26b   : > { %v6030_v46 = vpop.f32.mrf.mxu0  ;;  %v7852_v21 = vadd.f32 %v2212_v56, %v7741_v62  ;;  %v4007_v56 = vld [vmem:[#allocation2 + $0x99] sm:$0xff] }
 0x26c   : > { %v7854_v42 = vadd.f32 %v6030_v46, %v2338_v13  ;;  %v5986_v4 = vpop.f32.mrf.mxu1  ;;  %6273 = vmatmul.mubr.msk.bf16.gmra.mxu1 %vm7429_vm2, %v5468_v11  ;;  %vm8761_vm2 = vnez %v8718_v9  ;;  %v8767_v28 = vld [vmem:[#allocation17_spill] sm:$0xff] }
 0x26d   : > { %v2547_v25 = vpop.f32.mrf.mxu0  ;;  %v2342_v26 = vadd.f32 %v5986_v4, %v7744_v15  ;;  %6276 = vmatprep.mubr.msk.bf16.mxu1 %vm7436_vm0, %v5471_v2  ;;  %v5477_v2 = vpack.c.bf16 %v4007_v56, %v4006_v10  ;;  %v4011_v56 = vld [vmem:[#allocation2 + $0xb9] sm:$0xff] }
 0x26e   : > { %v7861_v58 = vadd.f32 %v2547_v25, %v2336_v59  ;;  %v2225_v1 = vpop.f32.mrf.mxu1  ;;  %v6585_v10 = vld [vmem:[#allocation9 + $0x38] sm:$0xff]  }
 0x26f   : > { %v6031_v18 = vpop.f32.mrf.mxu0  ;;  %v2340_v62 = vadd.f32 %v2225_v1, %v7751_v33  ;;  %6300 = vmatprep.subr.bf16.mxu0 %v6585_v10 }
 0x270   : > { %v7864_v13 = vadd.f32 %v6031_v18, %v2339_v50  ;;  %v5987_v20 = vpop.f32.mrf.mxu1  ;;  %6301 = vmatpush3.bf16.msra.mxu0 %v6585_v10 }
 0x271   : > { %v7866_v51 = vpop.f32.mrf.mxu0  ;;  %v2343_v11 = vadd.f32 %v5987_v20, %v7753_v36 }
 0x272   : > { %v2228_v15 = vpop.f32.mrf.mxu1 }
 0x273   : > { %v6034_v46 = vpop.f32.mrf.mxu0  ;;  %v7870_v59 = vadd.f32 %v2228_v15, %v7755_v30 }
 0x274   : > { %v7872_v4 = vadd.f32 %v6034_v46, %v2342_v26  ;;  %v5990_v33 = vpop.f32.mrf.mxu1  ;;  %6277 = vmatmul.mubr.msk.bf16.gmra.mxu1 %vm7458_vm6, %v5474_v54  ;;  %v5480_v54 = vpack.c.bf16 %v4009_v32, %v4008_v12  ;;  %v4012_v12 = vld [vmem:[#allocation2 + $0xc1] sm:$0xff]  ;;  %v4013_v32 = vld [vmem:[#allocation2 + $0xc9] sm:$0xff]  ;;  %vm8763_vm6 = vnez %v8722_v55 }
 0x275   : > { %v2563_v50 = vpop.f32.mrf.mxu0  ;;  %v2346_v25 = vadd.f32 %v5990_v33, %v7758_v3  ;;  %6280 = vmatprep.mubr.msk.bf16.mxu1 %vm7465_vm5, %v5477_v2  ;;  %vm8762_vm5 = vnez %v8720_v22 }
 0x276   : > { %v7879_v36 = vadd.f32 %v2563_v50, %v2340_v62  ;;  %v2241_v1 = vpop.f32.mrf.mxu1  ;;  %v6586_v62 = vld [vmem:[#allocation11 + $0x38] sm:$0xff]  }
 0x277   : > { %v6035_v18 = vpop.f32.mrf.mxu0  ;;  %v2344_v30 = vadd.f32 %v2241_v1, %v7765_v17  ;;  %v5483_v17 = vpack.c.bf16 %v4011_v56, %v4010_v47  ;;  %6348 = vmatprep.subr.bf16.mxu1 %v6586_v62  ;;  %v4015_v56 = vld [vmem:[#allocation2 + $0xd9] sm:$0xff]  ;;  %v6587_v47 = vld [vmem:[#allocation9 + $0x30] sm:$0xff]  }
 0x278   : > { %v7882_v26 = vadd.f32 %v6035_v18, %v2343_v11  ;;  %v5991_v20 = vpop.f32.mrf.mxu1  ;;  %6349 = vmatpush3.bf16.msra.mxu1 %v6586_v62  ;;  %6302 = vmatprep.subr.bf16.mxu0 %v6587_v47 }
 0x279   : > { %v7884_v38 = vpop.f32.mrf.mxu0  ;;  %v2347_v15 = vadd.f32 %v5991_v20, %v7767_v19  ;;  %6303 = vmatpush3.bf16.msra.mxu0 %v6587_v47  ;;  %v6590_v47 = vld [vmem:[#allocation11 + $0x28] sm:$0xff]  }
 0x27a   : > { %v2244_v3 = vpop.f32.mrf.mxu1 }
 0x27b   : > { %v6038_v46 = vpop.f32.mrf.mxu0  ;;  %v7888_v2 = vadd.f32 %v2244_v3, %v7769_v5 }
 0x27c   : > { %v7890_v33 = vadd.f32 %v6038_v46, %v2346_v25  ;;  %v5994_v11 = vpop.f32.mrf.mxu1  ;;  %6281 = vmatmul.mubr.msk.bf16.gmra.mxu1 %vm8761_vm2, %v5480_v54  ;;  %v5486_v54 = vpack.c.bf16 %v4013_v32, %v4012_v12  ;;  %v6588_v46 = vld [vmem:[#allocation11 + $0x30] sm:$0xff]  }
 0x27d   : > { %v2579_v50 = vpop.f32.mrf.mxu0  ;;  %v2350_v19 = vadd.f32 %v5994_v11, %v7772_v31  ;;  %6284 = vmatprep.mubr.msk.bf16.mxu1 %vm8762_vm5, %v5483_v17  ;;  %6350 = vmatprep.subr.bf16.mxu1 %v6588_v46  ;;  %v4017_v12 = vld [vmem:[#allocation2 + $0xe9] sm:$0xff] }
 0x27e   : > { %v7897_v1 = vadd.f32 %v2579_v50, %v2344_v30  ;;  %v2257_v18 = vpop.f32.mrf.mxu1  ;;  %v4014_v30 = vld [vmem:[#allocation2 + $0xd1] sm:$0xff]  ;;  %6351 = vmatpush3.bf16.msra.mxu1 %v6588_v46 }
 0x27f   : > { %v6039_v5 = vpop.f32.mrf.mxu0  ;;  %v2348_v25 = vadd.f32 %v2257_v18, %v7779_v7  ;;  %v5489_v7 = vpack.c.bf16 %v4015_v56, %v4014_v30  ;;  %v6589_v30 = vld [vmem:[#allocation9 + $0x28] sm:$0xff]   ;;  %6352 = vmatprep.subr.bf16.mxu1 %v6590_v47 }
 0x280   : > { %v7900_v9 = vadd.f32 %v6039_v5, %v2347_v15  ;;  %v5995_v20 = vpop.f32.mrf.mxu1  ;;  %v4016_v5 = vld [vmem:[#allocation2 + $0xe1] sm:$0xff]  ;;  %6304 = vmatprep.subr.bf16.mxu0 %v6589_v30 }
 0x281   : > { %v7902_v3 = vpop.f32.mrf.mxu0  ;;  %v2351_v22 = vadd.f32 %v5995_v20, %v7781_v35  ;;  %v4019_v20 = vld [vmem:[#allocation2 + $0xf9] sm:$0xff]  ;;  %6305 = vmatpush3.bf16.msra.mxu0 %v6589_v30 }
 0x282   : > { %v2260_v31 = vpop.f32.mrf.mxu1  ;;  %6353 = vmatpush3.bf16.msra.mxu1 %v6590_v47 }
 0x283   : > { %v6042_v10 = vpop.f32.mrf.mxu0  ;;  %v7906_v62 = vadd.f32 %v2260_v31, %v7783_v23  ;;  %v5492_v31 = vpack.c.bf16 %v4017_v12, %v4016_v5 }
 0x284   : > { %v7908_v17 = vadd.f32 %v6042_v10, %v2350_v19  ;;  %v5998_v15 = vpop.f32.mrf.mxu1  ;;  %6285 = vmatmul.mubr.msk.bf16.gmra.mxu1 %vm8763_vm6, %v5486_v54  ;;  %v4018_v54 = vld [vmem:[#allocation2 + $0xf1] sm:$0xff] }
 0x285   : > { %v2595_v11 = vpop.f32.mrf.mxu0  ;;  %v2354_v35 = vadd.f32 %v5998_v15, %v7788_v52  ;;  %6288 = vmatprep.mubr.msk.bf16.mxu1 %vm8744_vm9, %v5489_v7  ;;  %v1907_v52 = vadd.f32 %v7799_v16, %v7785_v27  ;;  %v5495_v10 = vpack.c.bf16 %v4019_v20, %v4018_v54  ;;  %vm8764_vm9 = vnez %v8728_v45 }
 0x286   : > { %v7915_v50 = vadd.f32 %v2595_v11, %v2348_v25  ;;  %v2273_v18 = vpop.f32.mrf.mxu1 }
 0x287   : > { %v6043_v23 = vpop.f32.mrf.mxu0  ;;  %v2352_v19 = vadd.f32 %v2273_v18, %v7795_v44  ;;  %v4020_v18 = vld [vmem:[#allocation2 + $0x101] sm:$0xff] }
 0x288   : > { %v7918_v55 = vadd.f32 %v6043_v23, %v2351_v22  ;;  %v5999_v32 = vpop.f32.mrf.mxu1  ;;  %v4021_v23 = vld [vmem:[#allocation2 + $0x109] sm:$0xff] }
 0x289   : > { %v7922_v8 = vpop.f32.mrf.mxu0  ;;  %v2355_v25 = vadd.f32 %v5999_v32, %v7797_v29  ;;  %v5498_v20 = vpack.c.bf16 %v4021_v23, %v4020_v18 }
 0x28a   : > { %v2276_v56 = vpop.f32.mrf.mxu1 }
 0x28b   : > { %v6046_v46 = vpop.f32.mrf.mxu0  ;;  %v2353_v44 = vadd.f32 %v2276_v56, %v1907_v52  ;;  %v6591_v52 = vld [vmem:[#allocation9 + $0x20] sm:$0xff]  }
 0x28c   : > { %v7925_v7 = vadd.f32 %v6046_v46, %v2354_v35  ;;  %v6002_v22 = vpop.f32.mrf.mxu1  ;;  %6289 = vmatmul.mubr.msk.bf16.gmra.mxu1 %vm7547_vm4, %v5492_v31  ;;  %v6592_v56 = vld [vmem:[#allocation11 + $0x20] sm:$0xff]   ;;  %6306 = vmatprep.subr.bf16.mxu0 %v6591_v52  ;;  %vm8765_vm4 = vnez %v8735_v43 }
 0x28d   : > { %v2611_v27 = vpop.f32.mrf.mxu0  ;;  %v2358_v16 = vadd.f32 %v6002_v22, %v7804_v6  ;;  %6292 = vmatprep.mubr.msk.bf16.mxu1 %vm8764_vm9, %v5495_v10  ;;  %v1923_v6 = vadd.f32 %v7816_v57, %v7801_v40  ;;  %v4025_v57 = vld [vmem:[#allocation2 + $0x129] sm:$0xff]  ;;  %6354 = vmatprep.subr.bf16.mxu1 %v6592_v56 }
 0x28e   : > { %v7932_v29 = vadd.f32 %v2611_v27, %v2352_v19  ;;  %v2289_v15 = vpop.f32.mrf.mxu1  ;;  %6307 = vmatpush3.bf16.msra.mxu0 %v6591_v52  ;;  %6355 = vmatpush3.bf16.msra.mxu1 %v6592_v56 }
 0x28f   : > { %v6047_v11 = vpop.f32.mrf.mxu0  ;;  %v2356_v35 = vadd.f32 %v2289_v15, %v7812_v61 }
 0x290   : > { %v7935_v37 = vadd.f32 %v6047_v11, %v2355_v25  ;;  %v6003_v5 = vpop.f32.mrf.mxu1  ;;  %v6593_v11 = vld [vmem:[#allocation9 + $0x18] sm:$0xff]  }
 0x291   : > { %v2614_v12 = vpop.f32.mrf.mxu0  ;;  %v2359_v45 = vadd.f32 %v6003_v5, %v7814_v39  ;;  %v4024_v39 = vld [vmem:[#allocation2 + $0x121] sm:$0xff]  ;;  %6308 = vmatprep.subr.bf16.mxu0 %v6593_v11 }
 0x292   : > { %v7940_v32 = vadd.f32 %v2614_v12, %v2353_v44  ;;  %v2292_v19 = vpop.f32.mrf.mxu1  ;;  %v5504_v27 = vpack.c.bf16 %v4025_v57, %v4024_v39  ;;  %6309 = vmatpush3.bf16.msra.mxu0 %v6593_v11  ;;  %v6602_v12 = vld [vmem:[%s7049_s24] sm:$0xff]   ;;  %v6596_v39 = vld [vmem:[#allocation11 + $0x10] sm:$0xff]  }
 0x293   : > { %v6050_v31 = vpop.f32.mrf.mxu0  ;;  %v2357_v54 = vadd.f32 %v2292_v19, %v1923_v6  ;;  %v8766_v19 = vld [vmem:[#allocation18_spill] sm:$0xff] }
 0x294   : > { %v7942_v61 = vadd.f32 %v6050_v31, %v2358_v16  ;;  %v6006_v30 = vpop.f32.mrf.mxu1  ;;  %6293 = vmatmul.mubr.msk.bf16.gmra.mxu1 %vm7575_vm14, %v5498_v20  ;;  %v1955_v31 = vadd.f32 %v7848_v49, %v8767_v28  ;;  %v6600_v28 = vld [vmem:[#allocation9] sm:$0xff]  }
 0x295   : > { %v2627_v25 = vpop.f32.mrf.mxu0  ;;  %v2362_v40 = vadd.f32 %v6006_v30, %v7821_v53  ;;  %6296 = vmatprep.mubr.msk.bf16.mxu1 %vm8765_vm4, %v7718_v60  ;;  %v1939_v53 = vadd.f32 %v7832_v48, %v7818_v63 }
 0x296   : > { %v7950_v47 = vadd.f32 %v2627_v25, %v2356_v35  ;;  %v2305_v46 = vpop.f32.mrf.mxu1  ;;  %v6594_v35 = vld [vmem:[#allocation11 + $0x18] sm:$0xff]  }
 0x297   : > { %v6051_v44 = vpop.f32.mrf.mxu0  ;;  %v2360_v0 = vadd.f32 %v2305_v46, %v7828_v24  ;;  %6356 = vmatprep.subr.bf16.mxu1 %v6594_v35 }
 0x298   : > { %v7953_v10 = vadd.f32 %v6051_v44, %v2359_v45  ;;  %v6007_v22 = vpop.f32.mrf.mxu1  ;;  %6357 = vmatpush3.bf16.msra.mxu1 %v6594_v35  ;;  %v6597_v35 = vld [vmem:[#allocation9 + $0x8] sm:$0xff]  }
 0x299   : > { %v2630_v43 = vpop.f32.mrf.mxu0  ;;  %v2363_v60 = vadd.f32 %v6007_v22, %v7830_v34  ;;  %6358 = vmatprep.subr.bf16.mxu1 %v6596_v39 }
 0x29a   : > { %v7958_v16 = vadd.f32 %v2630_v43, %v2357_v54  ;;  %v2308_v15 = vpop.f32.mrf.mxu1 }
 0x29b   : > { %v6054_v18 = vpop.f32.mrf.mxu0  ;;  %v2361_v23 = vadd.f32 %v2308_v15, %v1939_v53  ;;  %v6598_v53 = vld [vmem:[#allocation11 + $0x8] sm:$0xff]  }
 0x29c   : > { %v7960_v5 = vadd.f32 %v6054_v18, %v2362_v40  ;;  %v6010_v24 = vpop.f32.mrf.mxu1  ;;  %6297 = vmatmul.mubr.msk.bf16.gmra.mxu1 %vm7601_vm3, %v5504_v27  ;;  %v6595_v40 = vld [vmem:[#allocation9 + $0x10] sm:$0xff]   ;;  %v2675_v18 = vadd.f32 %v7866_v51, %v7852_v21 }
 0x29d   : > { %v2643_v6 = vpop.f32.mrf.mxu0  ;;  %v2366_v63 = vadd.f32 %v6010_v24, %v7836_v14  ;;  %6364 = vmatprep.mubr.bf16.mxu1 %v6602_v12  ;;  %6310 = vmatprep.subr.bf16.mxu0 %v6595_v40 }
 0x29e   : > { %v7965_v34 = vadd.f32 %v2643_v6, %v2360_v0  ;;  %v2321_v48 = vpop.f32.mrf.mxu1  ;;  %6311 = vmatpush3.bf16.msra.mxu0 %v6595_v40  ;;  %6359 = vmatpush3.bf16.msra.mxu1 %v6596_v39 }
 0x29f   : > { %v6055_v45 = vpop.f32.mrf.mxu0  ;;  %v2364_v20 = vadd.f32 %v2321_v48, %v8766_v19  ;;  %6360 = vmatprep.subr.bf16.mxu1 %v6598_v53  ;;  %6312 = vmatprep.subr.bf16.mxu0 %v6597_v35 }
 0x2a0   : > { %v7969_v52 = vadd.f32 %v6055_v45, %v2363_v60  ;;  %v6011_v56 = vpop.f32.mrf.mxu1 }
 0x2a1   : > { %v2646_v54 = vpop.f32.mrf.mxu0  ;;  %v2367_v14 = vadd.f32 %v6011_v56, %v7846_v41 }
 0x2a2   : > { %v7974_v30 = vadd.f32 %v2646_v54, %v2361_v23  ;;  %v2324_v25 = vpop.f32.mrf.mxu1  ;;  %6361 = vmatpush3.bf16.msra.mxu1 %v6598_v53  ;;  %6313 = vmatpush3.bf16.msra.mxu0 %v6597_v35  ;;  %v6603_v54 = vld [vmem:[%s7049_s24 + $0x8] sm:$0xff]  }
 0x2a3   : > { %v6058_v57 = vpop.f32.mrf.mxu0  ;;  %v2365_v46 = vadd.f32 %v2324_v25, %v1955_v31  ;;  %6314 = vmatprep.subr.bf16.mxu0 %v6600_v28 }
 0x2a4   : > { %v7976_v44 = vadd.f32 %v6058_v57, %v2366_v63  ;;  %v6078_v0 = vpop.f32.mrf.mxu1  ;;  %v6599_v63 = vld [vmem:[#allocation11] sm:$0xff]  }
 0x2a5   : > { %v2659_v22 = vpop.f32.mrf.mxu0  ;;  %v2982_v27 = vadd.f32 %v6078_v0, %v7854_v42  ;;  %6362 = vmatprep.subr.bf16.mxu1 %v6599_v63 }
 0x2a6   : > { %v7979_v49 = vadd.f32 %v2659_v22, %v2364_v20  ;;  %v2853_v41 = vpop.f32.mrf.mxu1  ;;  %6363 = vmatpush3.bf16.msra.mxu1 %v6599_v63  ;;  %6315 = vmatpush3.bf16.msra.mxu0 %v6600_v28 }
 0x2a7   : > { %v6059_v43 = vpop.f32.mrf.mxu0  ;;  %v2980_v60 = vadd.f32 %v2853_v41, %v7861_v58 }
 0x2a8   : > { %v7982_v15 = vadd.f32 %v6059_v43, %v2367_v14  ;;  %v6079_v11 = vpop.f32.mrf.mxu1  ;;  %v2679_v14 = vadd.f32 %v7884_v38, %v7870_v59  ;;  %v6605_v43 = vld [vmem:[%s7049_s24 + $0x18] sm:$0xff]  }
 0x2a9   : > { %v2662_v23 = vpop.f32.mrf.mxu0  ;;  %v7987_v42 = vadd.f32 %v6079_v11, %v7864_v13  ;;  %6365 = vmatmul.mubr.bf16.vlgmr.msra.gmra.mxu1 %v6603_v54 }
 0x2aa   : > { %v7989_v24 = vadd.f32 %v2662_v23, %v2365_v46  ;;  %v2856_v6 = vpop.f32.mrf.mxu1 }
 0x2ab   : > { %v6126_v58 = vpop.f32.mrf.mxu0  ;;  %v7991_v48 = vadd.f32 %v2856_v6, %v2675_v18 }
 0x2ac   : > { %v7993_v12 = vadd.f32 %v6126_v58, %v2982_v27  ;;  %v6082_v45 = vpop.f32.mrf.mxu1 }
 0x2ad   : > { %v3191_v21 = vpop.f32.mrf.mxu0  ;;  %v2986_v13 = vadd.f32 %v6082_v45, %v7872_v4  ;;  %v6604_v4 = vld [vmem:[%s7049_s24 + $0x10] sm:$0xff]  }
 0x2ae   : > { %v7996_v51 = vadd.f32 %v3191_v21, %v2980_v60  ;;  %v2869_v19 = vpop.f32.mrf.mxu1  ;;  %6368 = vmatprep.mubr.bf16.mxu1 %v6604_v4  ;;  %v2683_v60 = vadd.f32 %v7902_v3, %v7888_v2 }
 0x2af   : > { %v7998_v20 = vpop.f32.mrf.mxu0  ;;  %v2984_v56 = vadd.f32 %v2869_v19, %v7879_v36  ;;  %v6607_v19 = vld [vmem:[%s7049_s24 + $0x28] sm:$0xff]  }
 0x2b0   : > { %v6083_v31 = vpop.f32.mrf.mxu1 }
 0x2b1   : > { %v8004_v25 = vpop.f32.mrf.mxu0  ;;  %v8007_v40 = vadd.f32 %v6083_v31, %v7882_v26  ;;  %6369 = vmatmul.mubr.bf16.gmra.mxu1 %v6605_v43  ;;  %v6610_v43 = vld [vmem:[%s7049_s24 + $0x40] sm:$0xff]  }
 0x2b2   : > { %v2872_v39 = vpop.f32.mrf.mxu1 }
 0x2b3   : > { %v6130_v57 = vpop.f32.mrf.mxu0  ;;  %v8010_v36 = vadd.f32 %v2872_v39, %v2679_v14 }
 0x2b4   : > { %v8012_v46 = vadd.f32 %v6130_v57, %v2986_v13  ;;  %v6086_v0 = vpop.f32.mrf.mxu1 }
 0x2b5   : > { %v3207_v22 = vpop.f32.mrf.mxu0  ;;  %v2990_v59 = vadd.f32 %v6086_v0, %v7890_v33  ;;  %v6606_v33 = vld [vmem:[%s7049_s24 + $0x20] sm:$0xff]  }
 0x2b6   : > { %v8015_v38 = vadd.f32 %v3207_v22, %v2984_v56  ;;  %v2885_v26 = vpop.f32.mrf.mxu1  ;;  %6372 = vmatprep.mubr.bf16.mxu1 %v6606_v33  ;;  %v2687_v56 = vadd.f32 %v7922_v8, %v7906_v62 }
 0x2b7   : > { %v8017_v27 = vpop.f32.mrf.mxu0  ;;  %v2988_v41 = vadd.f32 %v2885_v26, %v7897_v1  ;;  %v6609_v26 = vld [vmem:[%s7049_s24 + $0x38] sm:$0xff]  }
 0x2b8   : > { %v6087_v53 = vpop.f32.mrf.mxu1 }
 0x2b9   : > { %v8023_v11 = vpop.f32.mrf.mxu0  ;;  %v8026_v35 = vadd.f32 %v6087_v53, %v7900_v9  ;;  %6373 = vmatmul.mubr.bf16.gmra.mxu1 %v6607_v19 }
 0x2ba   : > { %v2888_v18 = vpop.f32.mrf.mxu1 }
 0x2bb   : > { %v6134_v23 = vpop.f32.mrf.mxu0  ;;  %v8029_v6 = vadd.f32 %v2888_v18, %v2683_v60 }
 0x2bc   : > { %v8031_v1 = vadd.f32 %v6134_v23, %v2990_v59  ;;  %v6090_v63 = vpop.f32.mrf.mxu1 }
 0x2bd   : > { %v3223_v58 = vpop.f32.mrf.mxu0  ;;  %v2994_v45 = vadd.f32 %v6090_v63, %v7908_v17  ;;  %v6608_v17 = vld [vmem:[%s7049_s24 + $0x30] sm:$0xff]  }
 0x2be   : > { %v8034_v2 = vadd.f32 %v3223_v58, %v2988_v41  ;;  %v2901_v3 = vpop.f32.mrf.mxu1  ;;  %6376 = vmatprep.mubr.bf16.mxu1 %v6608_v17 }
 0x2bf   : > { %v8036_v21 = vpop.f32.mrf.mxu0  ;;  %v2992_v9 = vadd.f32 %v2901_v3, %v7915_v50 }
 0x2c0   : > { %v6091_v13 = vpop.f32.mrf.mxu1 }
 0x2c1   : > { %v8042_v28 = vpop.f32.mrf.mxu0  ;;  %v8045_v31 = vadd.f32 %v6091_v13, %v7918_v55  ;;  %6377 = vmatmul.mubr.bf16.gmra.mxu1 %v6609_v26  ;;  %v6611_v13 = vld [vmem:[%s7049_s24 + $0x48] sm:$0xff]   ;;  %v6613_v26 = vld [vmem:[%s7049_s24 + $0x58] sm:$0xff]  }
 0x2c2   : > { %v2904_v54 = vpop.f32.mrf.mxu1  ;;  %6380 = vmatprep.mubr.bf16.mxu1 %v6610_v43 }
 0x2c3   : > { %v6138_v14 = vpop.f32.mrf.mxu0  ;;  %v8048_v4 = vadd.f32 %v2904_v54, %v2687_v56  ;;  %v6612_v56 = vld [vmem:[%s7049_s24 + $0x50] sm:$0xff]  }
 0x2c4   : > { %v8050_v50 = vadd.f32 %v6138_v14, %v2994_v45  ;;  %v6094_v39 = vpop.f32.mrf.mxu1 }
 0x2c5   : > { %v3239_v57 = vpop.f32.mrf.mxu0  ;;  %v2998_v0 = vadd.f32 %v6094_v39, %v7925_v7 }
 0x2c6   : > { %v8053_v62 = vadd.f32 %v3239_v57, %v2992_v9  ;;  %v2917_v8 = vpop.f32.mrf.mxu1 }
 0x2c7   : > { %v8055_v22 = vpop.f32.mrf.mxu0  ;;  %v2996_v55 = vadd.f32 %v2917_v8, %v7932_v29 }
 0x2c8   : > { %v6095_v59 = vpop.f32.mrf.mxu1 }
 0x2c9   : > { %v8059_v41 = vpop.f32.mrf.mxu0  ;;  %v8062_v53 = vadd.f32 %v6095_v59, %v7935_v37  ;;  %6381 = vmatmul.mubr.bf16.gmra.mxu1 %v6611_v13 }
 0x2ca   : > { %v2920_v60 = vpop.f32.mrf.mxu1  ;;  %6384 = vmatprep.mubr.bf16.mxu1 %v6612_v56 }
 0x2cb   : > { %v6142_v7 = vpop.f32.mrf.mxu0  ;;  %v8066_v33 = vadd.f32 %v2920_v60, %v7940_v32  ;;  %v6614_v60 = vld [vmem:[%s7049_s24 + $0x60] sm:$0xff]  }
 0x2cc   : > { %v8068_v18 = vadd.f32 %v6142_v7, %v2998_v0  ;;  %v6098_v29 = vpop.f32.mrf.mxu1 }
 0x2cd   : > { %v3255_v23 = vpop.f32.mrf.mxu0  ;;  %v3002_v63 = vadd.f32 %v6098_v29, %v7942_v61 }
 0x2ce   : > { %v8071_v58 = vadd.f32 %v3255_v23, %v2996_v55  ;;  %v2933_v45 = vpop.f32.mrf.mxu1 }
 0x2cf   : > { %v8073_v3 = vpop.f32.mrf.mxu0  ;;  %v3000_v37 = vadd.f32 %v2933_v45, %v7950_v47 }
 0x2d0   : > { %v6099_v9 = vpop.f32.mrf.mxu1 }
 0x2d1   : > { %v8077_v19 = vpop.f32.mrf.mxu0  ;;  %v8080_v32 = vadd.f32 %v6099_v9, %v7953_v10  ;;  %6385 = vmatmul.mubr.bf16.gmra.mxu1 %v6613_v26 }
 0x2d2   : > { %8768 = vst [vmem:[#allocation18_spill] sm:$0xff] %v8077_v19  ;;  %v2936_v17 = vpop.f32.mrf.mxu1  ;;  %6388 = vmatprep.mubr.bf16.mxu1 %v6614_v60 }
 0x2d3   : > { %8769 = vst [vmem:[#allocation17_spill] sm:$0xff] %v8080_v32  ;;  %v6146_v61 = vpop.f32.mrf.mxu0  ;;  %v8084_v54 = vadd.f32 %v2936_v17, %v7958_v16  ;;  %v6615_v17 = vld [vmem:[%s7049_s24 + $0x68] sm:$0xff]  }
 0x2d4   : > { %v8086_v14 = vadd.f32 %v6146_v61, %v3002_v63  ;;  %v6102_v47 = vpop.f32.mrf.mxu1 }
 0x2d5   : > { %8770 = vst [vmem:[#allocation19_spill] sm:$0xff] %v8084_v54  ;;  %v3271_v39 = vpop.f32.mrf.mxu0  ;;  %v3006_v57 = vadd.f32 %v6102_v47, %v7960_v5  ;;  %v6616_v47 = vld [vmem:[%s7049_s24 + $0x70] sm:$0xff]  }
 0x2d6   : > { %v8089_v0 = vadd.f32 %v3271_v39, %v3000_v37  ;;  %v2949_v8 = vpop.f32.mrf.mxu1 }
 0x2d7   : > { %v8091_v55 = vpop.f32.mrf.mxu0  ;;  %v3004_v10 = vadd.f32 %v2949_v8, %v7965_v34 }
 0x2d8   : > { %8771 = vst [vmem:[#allocation20_spill] sm:$0xff] %v8091_v55  ;;  %v6103_v59 = vpop.f32.mrf.mxu1 }
 0x2d9   : > { %v8095_v43 = vpop.f32.mrf.mxu0  ;;  %v8098_v16 = vadd.f32 %v6103_v59, %v7969_v52  ;;  %6389 = vmatmul.mubr.bf16.gmra.mxu1 %v6615_v17 }
 0x2da   : > { %8772 = vst [vmem:[#allocation21_spill] sm:$0xff] %v8095_v43  ;;  %v2952_v7 = vpop.f32.mrf.mxu1  ;;  %6392 = vmatprep.mubr.bf16.mxu1 %v6616_v47 }
 0x2db   : > { %8773 = vst [vmem:[#allocation22_spill] sm:$0xff] %v8098_v16  ;;  %v6150_v5 = vpop.f32.mrf.mxu0  ;;  %v8102_v29 = vadd.f32 %v2952_v7, %v7974_v30 }
 0x2dc   : > { %v8104_v23 = vadd.f32 %v6150_v5, %v3006_v57  ;;  %v6106_v34 = vpop.f32.mrf.mxu1 }
 0x2dd   : > { %8774 = vst [vmem:[#allocation23_spill] sm:$0xff] %v8102_v29  ;;  %v3287_v63 = vpop.f32.mrf.mxu0  ;;  %v3010_v45 = vadd.f32 %v6106_v34, %v7976_v44  ;;  %v6617_v34 = vld [vmem:[%s7049_s24 + $0x78] sm:$0xff]  }
 0x2de   : > { %v8107_v37 = vadd.f32 %v3287_v63, %v3004_v10  ;;  %v2965_v9 = vpop.f32.mrf.mxu1 }
 0x2df   : > { %v8109_v13 = vpop.f32.mrf.mxu0  ;;  %v3008_v52 = vadd.f32 %v2965_v9, %v7979_v49 }
 0x2e0   : > { %8775 = vst [vmem:[#allocation24_spill] sm:$0xff] %v8109_v13  ;;  %v6107_v56 = vpop.f32.mrf.mxu1 }
 0x2e1   : > { %v8113_v61 = vpop.f32.mrf.mxu0  ;;  %v8116_v30 = vadd.f32 %v6107_v56, %v7982_v15  ;;  %6393 = vmatmul.mubr.bf16.gmra.mxu1 %v6617_v34 }
 0x2e2   : > { %8776 = vst [vmem:[#allocation25_spill] sm:$0xff] %v8113_v61  ;;  %v2968_v39 = vpop.f32.mrf.mxu1 }
 0x2e3   : > { %8777 = vst [vmem:[#allocation26_spill] sm:$0xff] %v8116_v30  ;;  %v6154_v44 = vpop.f32.mrf.mxu0  ;;  %v8120_v57 = vadd.f32 %v2968_v39, %v7989_v24 }
 0x2e4   : > { %v8122_v8 = vadd.f32 %v6154_v44, %v3010_v45  ;;  %v6174_v10 = vpop.f32.mrf.mxu1 }
 0x2e5   : > { %8778 = vst [vmem:[#allocation27_spill] sm:$0xff] %v8120_v57  ;;  %v3303_v49 = vpop.f32.mrf.mxu0  ;;  %v8125_v59 = vadd.f32 %v6174_v10, %v7993_v12 }
 0x2e6   : > { %v8127_v26 = vadd.f32 %v3303_v49, %v3008_v52  ;;  %v3529_v60 = vpop.f32.mrf.mxu1 }
 0x2e7   : > { %v8129_v7 = vpop.f32.mrf.mxu0  ;;  %v8132_v15 = vadd.f32 %v3529_v60, %v7996_v51 }
 0x2e8   : > { %8779 = vst [vmem:[#allocation28_spill] sm:$0xff] %v8129_v7  ;;  %v8134_v5 = vpop.f32.mrf.mxu1 }
 0x2e9   : > { %v8137_v24 = vpop.f32.mrf.mxu0 }
 0x2ea   : > { %8780 = vst [vmem:[#allocation29_spill] sm:$0xff] %v8137_v24  ;;  %v8139_v63 = vpop.f32.mrf.mxu1 }
 0x2eb   : > { %v6222_v45 = vpop.f32.mrf.mxu0 }
 0x2ec   : > { %v6178_v9 = vpop.f32.mrf.mxu1 }
 0x2ed   : > { %v3835_v12 = vpop.f32.mrf.mxu0  ;;  %v8142_v52 = vadd.f32 %v6178_v9, %v8012_v46 }
 0x2ee   : > { %v3545_v56 = vpop.f32.mrf.mxu1 }
 0x2ef   : > { %v8144_v17 = vpop.f32.mrf.mxu0  ;;  %v8147_v51 = vadd.f32 %v3545_v56, %v8015_v38 }
 0x2f0   : > { %v8149_v47 = vpop.f32.mrf.mxu1 }
 0x2f1   : > { %v8151_v39 = vpop.f32.mrf.mxu0 }
 0x2f2   : > { %v8153_v44 = vpop.f32.mrf.mxu1 }
 0x2f3   : > { %v8155_v10 = vpop.f32.mrf.mxu0 }
 0x2f4   : > { %v6182_v49 = vpop.f32.mrf.mxu1 }
 0x2f5   : > { %v8158_v60 = vadd.f32 %v6182_v49, %v8031_v1  ;;  %v8160_v46 = vpop.f32.mrf.mxu0 }
 0x2f6   : > { %v3561_v34 = vpop.f32.mrf.mxu1 }
 0x2f7   : > { %v8163_v9 = vadd.f32 %v3561_v34, %v8034_v2  ;;  %v8167_v56 = vpop.f32.mrf.mxu0 }
 0x2f8   : > { %v8165_v38 = vpop.f32.mrf.mxu1 }
 0x2f9   : > { %v8174_v30 = vpop.f32.mrf.mxu0 }
 0x2fa   : > { %v8169_v24 = vpop.f32.mrf.mxu1 }
 0x2fb   : > { %v8181_v2 = vpop.f32.mrf.mxu0 }
 0x2fc   : > { %v6186_v57 = vpop.f32.mrf.mxu1 }
 0x2fd   : > { %v8172_v7 = vadd.f32 %v6186_v57, %v8050_v50  ;;  %v8188_v16 = vpop.f32.mrf.mxu0 }
 0x2fe   : > { %v3577_v1 = vpop.f32.mrf.mxu1 }
 0x2ff   : > { %v8177_v49 = vadd.f32 %v3577_v1, %v8053_v62  ;;  %v8195_v62 = vpop.f32.mrf.mxu0 }
 0x300   : > { %v8179_v61 = vpop.f32.mrf.mxu1 }
 0x301   : > { %v8202_v32 = vpop.f32.mrf.mxu0 }
 0x302   : > { %v8183_v34 = vpop.f32.mrf.mxu1 }
 0x304   : > { %v6190_v29 = vpop.f32.mrf.mxu1 }
 0x305   : > { %v8186_v13 = vadd.f32 %v6190_v29, %v8068_v18 }
 0x306   : > { %v3593_v50 = vpop.f32.mrf.mxu1 }
 0x307   : > { %v8191_v57 = vadd.f32 %v3593_v50, %v8071_v58  ;;  %v8209_v58 = vpop.f32.mrf.mxu0 }
 0x308   : > { %v8193_v43 = vpop.f32.mrf.mxu1 }
 0x309   : > { %8781 = vst [vmem:[#allocation30_spill] sm:$0xff] %v8191_v57  ;;  %8782 = vst [vmem:[#allocation31_spill] sm:$0xff] %v8193_v43 }
 0x30a   : > { %v8197_v1 = vpop.f32.mrf.mxu1 }
 0x30b   : > { %8783 = vst [vmem:[#allocation32_spill] sm:$0xff] %v8197_v1  ;;  %v8216_v1 = vpop.f32.mrf.mxu0 }
 0x30c   : > { %v6194_v54 = vpop.f32.mrf.mxu1 }
 0x30d   : > { %v8200_v55 = vadd.f32 %v6194_v54, %v8086_v14 }
 0x30e   : > { %v3609_v18 = vpop.f32.mrf.mxu1 }
 0x30f   : > { %8784 = vst [vmem:[#allocation33_spill] sm:$0xff] %v8200_v55  ;;  %v8205_v29 = vadd.f32 %v3609_v18, %v8089_v0  ;;  %v8223_v0 = vpop.f32.mrf.mxu0 }
 0x310   : > { %v8207_v19 = vpop.f32.mrf.mxu1 }
 0x311   : > { %8785 = vst [vmem:[#allocation34_spill] sm:$0xff] %v8205_v29  ;;  %8786 = vst [vmem:[#allocation35_spill] sm:$0xff] %v8207_v19 }
 0x312   : > { %v8211_v50 = vpop.f32.mrf.mxu1 }
 0x313   : > { %8787 = vst [vmem:[#allocation36_spill] sm:$0xff] %v8211_v50  ;;  %v8230_v50 = vpop.f32.mrf.mxu0 }
 0x314   : > { %v6198_v43 = vpop.f32.mrf.mxu1 }
 0x315   : > { %v8214_v57 = vadd.f32 %v6198_v43, %v8104_v23 }
 0x316   : > { %v3625_v54 = vpop.f32.mrf.mxu1 }
 0x317   : > { %8788 = vst [vmem:[#allocation37_spill] sm:$0xff] %v8214_v57  ;;  %v8219_v14 = vadd.f32 %v3625_v54, %v8107_v37  ;;  %v8237_v37 = vpop.f32.mrf.mxu0 }
 0x318   : > { %v8221_v55 = vpop.f32.mrf.mxu1 }
 0x319   : > { %8789 = vst [vmem:[#allocation38_spill] sm:$0xff] %v8219_v14  ;;  %8790 = vst [vmem:[#allocation39_spill] sm:$0xff] %v8221_v55  ;;  %v3321_v55 = vadd.f32 %v7998_v20, %v7987_v42 }
 0x31a   : > { %v8225_v18 = vpop.f32.mrf.mxu1 }
 0x31b   : > { %8791 = vst [vmem:[#allocation40_spill] sm:$0xff] %v8225_v18  ;;  %v3964_v18 = vadd.f32 %v6222_v45, %v8125_v59 }
 0x31c   : > { %v6202_v19 = vpop.f32.mrf.mxu1 }
 0x31d   : > { %v8228_v29 = vadd.f32 %v6202_v19, %v8122_v8  ;;  %v3319_v19 = vadd.f32 %v8004_v25, %v7991_v48  ;;  %v3962_v8 = vadd.f32 %v3835_v12, %v8132_v15  ;;  %v3325_v15 = vadd.f32 %v8017_v27, %v8007_v40 }
 0x31e   : > { %v3641_v43 = vpop.f32.mrf.mxu1 }
 0x31f   : > { %v8233_v23 = vadd.f32 %v3641_v43, %v8127_v26  ;;  %v3659_v26 = vadd.f32 %v8134_v5, %v3321_v55  ;;  %v3657_v20 = vadd.f32 %v8139_v63, %v3319_v19  ;;  %v3663_v19 = vadd.f32 %v8149_v47, %v3325_v15 }
 0x320   : > { %v8235_v57 = vpop.f32.mrf.mxu1  ;;  %v3972_v15 = vadd.f32 %v8181_v2, %v8158_v60 }
 0x321   : > { %8792 = vst [vmem:[#allocation41_spill] sm:$0xff] %v8233_v23  ;;  %8793 = vst [vmem:[#allocation42_spill] sm:$0xff] %v8235_v57  ;;  %v8248_v23 = vpop.f32.mrf.mxu0  ;;  %v3965_v42 = vadd.f32 %v8144_v17, %v3659_v26  ;;  %v3963_v48 = vadd.f32 %v8151_v39, %v3657_v20  ;;  %v3323_v39 = vadd.f32 %v8023_v11, %v8010_v36 }
 0x322   : > { %v8239_v54 = vpop.f32.mrf.mxu1 }
 0x323   : > { %8794 = vst [vmem:[#allocation43_spill] sm:$0xff] %v8239_v54  ;;  %v8253_v54 = vld [vmem:[%s8585_s6] ss:$0 sm:$0xff]  ;;  %v8261_v5 = vpop.f32.mrf.mxu0 }
 0x324   : > { %v6270_v14 = vpop.f32.mrf.mxu1 }
 0x325   : > { %v4302_v43 = vadd.f32 %v6270_v14, %v3964_v18  ;;  %v3968_v14 = vadd.f32 %v8155_v10, %v8142_v52  ;;  %v3966_v18 = vadd.f32 %v8160_v46, %v8147_v51  ;;  %v3969_v52 = vadd.f32 %v8167_v56, %v3663_v19 }
 0x326   : > { %v4173_v57 = vpop.f32.mrf.mxu1  ;;  %v3661_v10 = vadd.f32 %v8153_v44, %v3323_v39 }
 0x327   : > { %v4300_v59 = vadd.f32 %v4173_v57, %v3962_v8  ;;  %v4341_v25 = vadd.f32 %v8253_v54, %v4302_v43 }
 0x328   : > { %v6271_v45 = vpop.f32.mrf.mxu1  ;;  %v3967_v47 = vadd.f32 %v8174_v30, %v3661_v10  ;;  %v3327_v30 = vadd.f32 %v8042_v28, %v8029_v6  ;;  %v3333_v10 = vadd.f32 %v8055_v22, %v8045_v31 }
 0x329   : > { %v4303_v55 = vadd.f32 %v6271_v45, %v3965_v42  ;;  %v4339_v17 = vadd.f32 %v8253_v54, %v4300_v59  ;;  %v4373_v27 = vmax.f32 %v4341_v25, 0.0  ;;  %v8275_v42 = vpop.f32.mrf.mxu0 }
 0x32a   : > { %v4176_v12 = vpop.f32.mrf.mxu1  ;;  %v3665_v19 = vadd.f32 %v8169_v24, %v3327_v30  ;;  %v3671_v31 = vadd.f32 %v8179_v61, %v3333_v10 }
 0x32b   : > { %v4342_v63 = vadd.f32 %v8253_v54, %v4303_v55  ;;  %v4301_v57 = vadd.f32 %v4176_v12, %v3963_v48  ;;  %v4371_v59 = vmax.f32 %v4339_v17, 0.0  ;;  %v3329_v55 = vadd.f32 %v8036_v21, %v8026_v35  ;;  %v8281_v56 = vpop.f32.mrf.mxu0 }
 0x32c   : > { %v6274_v40 = vpop.f32.mrf.mxu1 }
 0x32d   : > { %v4374_v8 = vmax.f32 %v4342_v63, 0.0  ;;  %v4340_v26 = vadd.f32 %v8253_v54, %v4301_v57  ;;  %v4306_v43 = vadd.f32 %v6274_v40, %v3968_v14  ;;  %v3970_v63 = vadd.f32 %v8188_v16, %v8163_v9  ;;  %v8295_v40 = vpop.f32.mrf.mxu0 }
 0x32e   : > { %v4189_v20 = vpop.f32.mrf.mxu1  ;;  %v3667_v35 = vadd.f32 %v8165_v38, %v3329_v55  ;;  %v3971_v38 = vadd.f32 %v8202_v32, %v3665_v19  ;;  %v3331_v32 = vadd.f32 %v8059_v41, %v8048_v4 }
 0x32f   : > { %v4404_v36 = vpack.c.bf16 %v4374_v8, %v4373_v27  ;;  %v4372_v11 = vmax.f32 %v4340_v26, 0.0  ;;  %v4304_v45 = vadd.f32 %v4189_v20, %v3966_v18  ;;  %v4345_v46 = vadd.f32 %v8253_v54, %v4306_v43 }
 0x330   : > { %v6275_v51 = vpop.f32.mrf.mxu1  ;;  %v3973_v18 = vadd.f32 %v8195_v62, %v3667_v35  ;;  %v8301_v62 = vpop.f32.mrf.mxu0  ;;  %v3976_v20 = vadd.f32 %v8209_v58, %v8172_v7 }
 0x331   : > { %v4307_v48 = vadd.f32 %v6275_v51, %v3969_v52  ;;  %v4403_v25 = vpack.c.bf16 %v4372_v11, %v4371_v59  ;;  %v4343_v12 = vadd.f32 %v8253_v54, %v4304_v45  ;;  %v4377_v57 = vmax.f32 %v4345_v46, 0.0 }
 0x332   : > { %v4192_v44 = vpop.f32.mrf.mxu1  ;;  %v3974_v45 = vadd.f32 %v8216_v1, %v8177_v49  ;;  %v3977_v46 = vadd.f32 %v8223_v0, %v3671_v31 }
 0x333   : > { %v4346_v14 = vadd.f32 %v8253_v54, %v4307_v48  ;;  %v4305_v17 = vadd.f32 %v4192_v44, %v3967_v47  ;;  %6316 = vmatprep.mubr.bf16.mxu0 %v4403_v25  ;;  %v4375_v6 = vmax.f32 %v4343_v12, 0.0  ;;  %v3669_v48 = vadd.f32 %v8183_v34, %v3331_v32  ;;  %v8315_v25 = vpop.f32.mrf.mxu0  ;;  %v8801_v32 = vld [vmem:[#allocation33_spill] sm:$0xff] }
 0x334   : > { %v6278_v21 = vpop.f32.mrf.mxu1  ;;  %6317 = vmatmul.mubr.bf16.vlgmr.msra.gmra.mxu0 %v4404_v36  ;;  %v3980_v34 = vadd.f32 %v8237_v37, %v8186_v13 }
 0x335   : > { %v4378_v39 = vmax.f32 %v4346_v14, 0.0  ;;  %v4344_v60 = vadd.f32 %v8253_v54, %v4305_v17  ;;  %v4310_v2 = vadd.f32 %v6278_v21, %v3972_v15  ;;  %v3975_v61 = vadd.f32 %v8230_v50, %v3669_v48  ;;  %v6246_v0 = vpop.f32.mrf.mxu0  ;;  %v8795_v50 = vld [vmem:[#allocation18_spill] sm:$0xff]  ;;  %v8805_v48 = vld [vmem:[#allocation35_spill] sm:$0xff] }
 0x336   : > { %v4205_v27 = vpop.f32.mrf.mxu1  ;;  %v3337_v17 = vadd.f32 %v8073_v3, %v8062_v53 }
 0x337   : > { %v4406_v28 = vpack.c.bf16 %v4378_v39, %v4377_v57  ;;  %v4376_v8 = vmax.f32 %v4344_v60, 0.0  ;;  %v4308_v16 = vadd.f32 %v4205_v27, %v3970_v63  ;;  %v4349_v26 = vadd.f32 %v8253_v54, %v4310_v2  ;;  %v8796_v39 = vld [vmem:[#allocation30_spill] sm:$0xff]  ;;  %v8797_v2 = vld [vmem:[#allocation31_spill] sm:$0xff] }
 0x338   : > { %v6279_v9 = vpop.f32.mrf.mxu1  ;;  %v3335_v57 = vadd.f32 %v8795_v50, %v8066_v33  ;;  %v3978_v60 = vadd.f32 %v8248_v23, %v8796_v39  ;;  %v8807_v39 = vld [vmem:[#allocation22_spill] sm:$0xff] }
 0x339   : > { %v4311_v43 = vadd.f32 %v6279_v9, %v3973_v18  ;;  %v4405_v52 = vpack.c.bf16 %v4376_v8, %v4375_v6  ;;  %v4347_v59 = vadd.f32 %v8253_v54, %v4308_v16  ;;  %v4381_v51 = vmax.f32 %v4349_v26, 0.0  ;;  %v8798_v6 = vld [vmem:[#allocation32_spill] sm:$0xff]  ;;  %v3931_v8 = vpop.f32.mrf.mxu0 }
 0x33a   : > { %v4208_v24 = vpop.f32.mrf.mxu1  ;;  %v3675_v18 = vadd.f32 %v8797_v2, %v3337_v17 }
 0x33b   : > { %v4350_v36 = vadd.f32 %v8253_v54, %v4311_v43  ;;  %v4309_v11 = vadd.f32 %v4208_v24, %v3971_v38  ;;  %6320 = vmatprep.mubr.bf16.mxu0 %v4405_v52  ;;  %v4379_v4 = vmax.f32 %v4347_v59, 0.0  ;;  %v8800_v59 = vld [vmem:[#allocation20_spill] sm:$0xff] }
 0x33c   : > { %v6282_v22 = vpop.f32.mrf.mxu1  ;;  %6321 = vmatmul.mubr.bf16.gmra.mxu0 %v4406_v28  ;;  %v3981_v27 = vadd.f32 %v8261_v5, %v3675_v18  ;;  %v3673_v28 = vadd.f32 %v8798_v6, %v3335_v57  ;;  %v8811_v6 = vld [vmem:[#allocation25_spill] sm:$0xff] }
 0x33d   : > { %v4382_v47 = vmax.f32 %v4350_v36, 0.0  ;;  %v4348_v7 = vadd.f32 %v8253_v54, %v4309_v11  ;;  %v4314_v58 = vadd.f32 %v6282_v22, %v3976_v20  ;;  %v8799_v20 = vld [vmem:[#allocation17_spill] sm:$0xff]  ;;  %v6247_v11 = vpop.f32.mrf.mxu0 }
 0x33e   : > { %v4221_v55 = vpop.f32.mrf.mxu1  ;;  %v3979_v43 = vadd.f32 %v8275_v42, %v3673_v28  ;;  %v3341_v36 = vadd.f32 %v8800_v59, %v8799_v20  ;;  %v8803_v42 = vld [vmem:[#allocation21_spill] sm:$0xff]  ;;  %v8812_v28 = vld [vmem:[#allocation38_spill] sm:$0xff] }
 0x33f   : > { %v4408_v41 = vpack.c.bf16 %v4382_v47, %v4381_v51  ;;  %v4380_v44 = vmax.f32 %v4348_v7, 0.0  ;;  %v4312_v49 = vadd.f32 %v4221_v55, %v3974_v45  ;;  %v4353_v15 = vadd.f32 %v8253_v54, %v4314_v58  ;;  %v8802_v47 = vld [vmem:[#allocation19_spill] sm:$0xff]  ;;  %v8804_v58 = vld [vmem:[#allocation34_spill] sm:$0xff] }
 0x340   : > { %v6283_v1 = vpop.f32.mrf.mxu1  ;;  %v3984_v45 = vadd.f32 %v8281_v56, %v8801_v32  ;;  %v3339_v7 = vadd.f32 %v8803_v42, %v8802_v47  ;;  %v3679_v55 = vadd.f32 %v8805_v48, %v3341_v36  ;;  %v8815_v42 = vld [vmem:[#allocation26_spill] sm:$0xff] }
 0x341   : > { %v4315_v12 = vadd.f32 %v6283_v1, %v3977_v46  ;;  %v4407_v14 = vpack.c.bf16 %v4380_v44, %v4379_v4  ;;  %v4351_v63 = vadd.f32 %v8253_v54, %v4312_v49  ;;  %v4385_v3 = vmax.f32 %v4353_v15, 0.0 }
 0x342   : > { %v4224_v30 = vpop.f32.mrf.mxu1  ;;  %v3982_v46 = vadd.f32 %v8295_v40, %v8804_v58  ;;  %v3985_v1 = vadd.f32 %v8301_v62, %v3679_v55 }
 0x343   : > { %v4354_v35 = vadd.f32 %v8253_v54, %v4315_v12  ;;  %v4313_v21 = vadd.f32 %v4224_v30, %v3975_v61  ;;  %6324 = vmatprep.mubr.bf16.mxu0 %v4407_v14  ;;  %v4383_v9 = vmax.f32 %v4351_v63, 0.0  ;;  %v8806_v61 = vld [vmem:[#allocation36_spill] sm:$0xff]  ;;  %v3934_v12 = vpop.f32.mrf.mxu0 }
 0x344   : > { %v6286_v53 = vpop.f32.mrf.mxu1  ;;  %6325 = vmatmul.mubr.bf16.gmra.mxu0 %v4408_v41  ;;  %v3677_v15 = vadd.f32 %v8806_v61, %v3339_v7  ;;  %v8816_v7 = vld [vmem:[#allocation28_spill] sm:$0xff] }
 0x345   : > { %v4386_v19 = vmax.f32 %v4354_v35, 0.0  ;;  %v4352_v13 = vadd.f32 %v8253_v54, %v4313_v21  ;;  %v4318_v37 = vadd.f32 %v6286_v53, %v3980_v34  ;;  %v6250_v18 = vpop.f32.mrf.mxu0  ;;  %v8809_v53 = vld [vmem:[#allocation37_spill] sm:$0xff]  ;;  %v3349_v58 = vadd.f32 %v8816_v7, %v8815_v42 }
 0x346   : > { %v4237_v16 = vpop.f32.mrf.mxu1  ;;  %v3983_v35 = vadd.f32 %v8315_v25, %v3677_v15  ;;  %v8820_v15 = vld [vmem:[#allocation41_spill] sm:$0xff] }
 0x347   : > { %v4410_v33 = vpack.c.bf16 %v4386_v19, %v4385_v3  ;;  %v4384_v38 = vmax.f32 %v4352_v13, 0.0  ;;  %v4316_v26 = vadd.f32 %v4237_v16, %v3978_v60  ;;  %v4357_v52 = vadd.f32 %v8253_v54, %v4318_v37  ;;  %v8808_v60 = vld [vmem:[#allocation24_spill] sm:$0xff]  ;;  %v3947_v20 = vpop.f32.mrf.mxu0 }
 0x348   : > { %v6287_v23 = vpop.f32.mrf.mxu1  ;;  %v3345_v2 = vadd.f32 %v8808_v60, %v8807_v39  ;;  %v3988_v3 = vadd.f32 %v6246_v0, %v8809_v53  ;;  %v3986_v16 = vadd.f32 %v3931_v8, %v8812_v28 }
 0x349   : > { %v4319_v10 = vadd.f32 %v6287_v23, %v3981_v27  ;;  %v4409_v24 = vpack.c.bf16 %v4384_v38, %v4383_v9  ;;  %v4355_v31 = vadd.f32 %v8253_v54, %v4316_v26  ;;  %v4389_v41 = vmax.f32 %v4357_v52, 0.0  ;;  %v8810_v27 = vld [vmem:[#allocation23_spill] sm:$0xff] }
 0x34a   : > { %v4240_v5 = vpop.f32.mrf.mxu1  ;;  %v3343_v25 = vadd.f32 %v8811_v6, %v8810_v27  ;;  %v8813_v9 = vld [vmem:[#allocation39_spill] sm:$0xff] }
 0x34b   : > { %v4358_v22 = vadd.f32 %v8253_v54, %v4319_v10  ;;  %v4317_v51 = vadd.f32 %v4240_v5, %v3979_v43  ;;  %6328 = vmatprep.mubr.bf16.mxu0 %v4409_v24  ;;  %v4387_v17 = vmax.f32 %v4355_v31, 0.0  ;;  %v8814_v10 = vld [vmem:[#allocation40_spill] sm:$0xff] }
 0x34c   : > { %v6290_v4 = vpop.f32.mrf.mxu1  ;;  %6329 = vmatmul.mubr.bf16.gmra.mxu0 %v4410_v33  ;;  %v3683_v33 = vadd.f32 %v8813_v9, %v3345_v2  ;;  %v3681_v24 = vadd.f32 %v8814_v10, %v3343_v25 }
 0x34d   : > { %v4390_v44 = vmax.f32 %v4358_v22, 0.0  ;;  %v4356_v56 = vadd.f32 %v8253_v54, %v4317_v51  ;;  %v4322_v49 = vadd.f32 %v6290_v4, %v3984_v45 }
 0x34e   : > { %v4253_v14 = vpop.f32.mrf.mxu1  ;;  %v3989_v52 = vadd.f32 %v6247_v11, %v3683_v33  ;;  %v3987_v8 = vadd.f32 %v3934_v12, %v3681_v24  ;;  %v3992_v11 = vadd.f32 %v6250_v18, %v8228_v29  ;;  %v3990_v12 = vadd.f32 %v3947_v20, %v8820_v15 }
 0x34f   : > { %v4412_v30 = vpack.c.bf16 %v4390_v44, %v4389_v41  ;;  %v4388_v34 = vmax.f32 %v4356_v56, 0.0  ;;  %v4320_v63 = vadd.f32 %v4253_v14, %v3982_v46  ;;  %v4361_v21 = vadd.f32 %v8253_v54, %v4322_v49  ;;  %v6251_v46 = vpop.f32.mrf.mxu0  ;;  %v8817_v44 = vld [vmem:[#allocation27_spill] sm:$0xff]  ;;  %v8818_v56 = vld [vmem:[#allocation29_spill] sm:$0xff] }
 0x350   : > { %v6291_v40 = vpop.f32.mrf.mxu1  ;;  %v3347_v49 = vadd.f32 %v8818_v56, %v8817_v44 }
 0x351   : > { %v4323_v50 = vadd.f32 %v6291_v40, %v3985_v1  ;;  %v4411_v57 = vpack.c.bf16 %v4388_v34, %v4387_v17  ;;  %v4359_v19 = vadd.f32 %v8253_v54, %v4320_v63  ;;  %v4393_v26 = vmax.f32 %v4361_v21, 0.0  ;;  %v8819_v1 = vld [vmem:[#allocation42_spill] sm:$0xff]  ;;  %v8821_v63 = vld [vmem:[#allocation43_spill] sm:$0xff]  ;;  %v3950_v21 = vpop.f32.mrf.mxu0 }
 0x352   : > { %v4256_v62 = vpop.f32.mrf.mxu1  ;;  %v3687_v61 = vadd.f32 %v8819_v1, %v3349_v58  ;;  %v3685_v40 = vadd.f32 %v8821_v63, %v3347_v49 }
 0x353   : > { %v4362_v13 = vadd.f32 %v8253_v54, %v4323_v50  ;;  %v4321_v37 = vadd.f32 %v4256_v62, %v3983_v35  ;;  %6332 = vmatprep.mubr.bf16.mxu0 %v4411_v57  ;;  %v4391_v36 = vmax.f32 %v4359_v19, 0.0 }
 0x354   : > { %v6294_v38 = vpop.f32.mrf.mxu1  ;;  %6333 = vmatmul.mubr.bf16.gmra.mxu0 %v4412_v30  ;;  %v3993_v35 = vadd.f32 %v6251_v46, %v3687_v61  ;;  %v3991_v62 = vadd.f32 %v3950_v21, %v3685_v40 }
 0x355   : > { %v4394_v23 = vmax.f32 %v4362_v13, 0.0  ;;  %v4360_v43 = vadd.f32 %v8253_v54, %v4321_v37  ;;  %v4326_v0 = vadd.f32 %v6294_v38, %v3988_v3 }
 0x356   : > { %v4269_v59 = vpop.f32.mrf.mxu1 }
 0x357   : > { %v4414_v5 = vpack.c.bf16 %v4394_v23, %v4393_v26  ;;  %v4392_v32 = vmax.f32 %v4360_v43, 0.0  ;;  %v4324_v45 = vadd.f32 %v4269_v59, %v3986_v16  ;;  %v4365_v22 = vadd.f32 %v8253_v54, %v4326_v0 }
 0x358   : > { %v6295_v31 = vpop.f32.mrf.mxu1 }
 0x359   : > { %v4327_v51 = vadd.f32 %v6295_v31, %v3989_v52  ;;  %v4413_v47 = vpack.c.bf16 %v4392_v32, %v4391_v36  ;;  %v4363_v55 = vadd.f32 %v8253_v54, %v4324_v45  ;;  %v4397_v17 = vmax.f32 %v4365_v22, 0.0  ;;  %v8393_v22 = vld [vmem:[%s8587_s8] ss:$0 sm:$0xff] }
 0x35a   : > { %v4272_v48 = vpop.f32.mrf.mxu1 }
 0x35b   : > { %v4366_v4 = vadd.f32 %v8253_v54, %v4327_v51  ;;  %v4325_v41 = vadd.f32 %v4272_v48, %v3987_v8  ;;  %6336 = vmatprep.mubr.bf16.mxu0 %v4413_v47  ;;  %v4395_v57 = vmax.f32 %v4363_v55, 0.0  ;;  %v8400_v47 = vld [vmem:[%s8586_s7] ss:$0 sm:$0xff] }
 0x35c   : > { %v6298_v14 = vpop.f32.mrf.mxu1  ;;  %6337 = vmatmul.mubr.bf16.gmra.mxu0 %v4414_v5 }
 0x35d   : > { %v4398_v30 = vmax.f32 %v4366_v4, 0.0  ;;  %v4364_v34 = vadd.f32 %v8253_v54, %v4325_v41  ;;  %v4330_v29 = vadd.f32 %v6298_v14, %v3992_v11 }
 0x35e   : > { %v4285_v50 = vpop.f32.mrf.mxu1 }
 0x35f   : > { %v4416_v39 = vpack.c.bf16 %v4398_v30, %v4397_v17  ;;  %v4396_v60 = vmax.f32 %v4364_v34, 0.0  ;;  %v4328_v2 = vadd.f32 %v4285_v50, %v3990_v12  ;;  %v4369_v53 = vadd.f32 %v8253_v54, %v4330_v29 }
 0x360   : > { %v6299_v18 = vpop.f32.mrf.mxu1 }
 0x361   : > { %v4331_v3 = vadd.f32 %v6299_v18, %v3993_v35  ;;  %v4415_v19 = vpack.c.bf16 %v4396_v60, %v4395_v57  ;;  %v4367_v37 = vadd.f32 %v8253_v54, %v4328_v2  ;;  %v4401_v25 = vmax.f32 %v4369_v53, 0.0 }
 0x362   : > { %v4288_v13 = vpop.f32.mrf.mxu1 }
 0x363   : > { %v4370_v27 = vadd.f32 %v8253_v54, %v4331_v3  ;;  %v4329_v6 = vadd.f32 %v4288_v13, %v3991_v62  ;;  %6340 = vmatprep.mubr.bf16.mxu0 %v4415_v19  ;;  %v4399_v9 = vmax.f32 %v4367_v37, 0.0 }
 0x364   : > { %6341 = vmatmul.mubr.bf16.gmra.mxu0 %v4416_v39 }
 0x365   : > { %v4402_v28 = vmax.f32 %v4370_v27, 0.0  ;;  %v4368_v16 = vadd.f32 %v8253_v54, %v4329_v6 }
 0x367   : > { %v4418_v33 = vpack.c.bf16 %v4402_v28, %v4401_v25  ;;  %v4400_v38 = vmax.f32 %v4368_v16, 0.0 }
 0x369   : > { %v4417_v26 = vpack.c.bf16 %v4400_v38, %v4399_v9  ;;  %v6366_v23 = vpop.f32.mrf.mxu1 }
 0x36a   : > { %v4765_v42 = vadd.f32 %v6366_v23, %v8393_v22 }
 0x36b   : > { %6344 = vmatprep.mubr.bf16.mxu0 %v4417_v26  ;;  %v4756_v43 = vpop.f32.mrf.mxu1 }
 0x36c   : > { %6345 = vmatmul.mubr.bf16.gmra.mxu0 %v4418_v33  ;;  %v4757_v11 = vadd.f32 %v8393_v22, %v4756_v43 }
 0x36d   : > { %v6367_v0 = vpop.f32.mrf.mxu1 }
 0x36e   : > { %v4768_v56 = vadd.f32 %v6367_v0, %v8393_v22 }
 0x36f   : > { %v4759_v52 = vpop.f32.mrf.mxu1 }
 0x370   : > { %v4760_v15 = vadd.f32 %v8393_v22, %v4759_v52 }
 0x371   : > { %v6370_v10 = vpop.f32.mrf.mxu1 }
 0x372   : > { %v4781_v17 = vadd.f32 %v6370_v10, %v8393_v22 }
 0x373   : > { %v4772_v24 = vpop.f32.mrf.mxu1 }
 0x374   : > { %v4773_v57 = vadd.f32 %v8393_v22, %v4772_v24 }
 0x375   : > { %v6371_v20 = vpop.f32.mrf.mxu1 }
 0x376   : > { %v4784_v53 = vadd.f32 %v6371_v20, %v8393_v22 }
 0x377   : > { %v4775_v59 = vpop.f32.mrf.mxu1 }
 0x378   : > { %v4776_v37 = vadd.f32 %v8393_v22, %v4775_v59 }
 0x379   : > { %v6374_v36 = vpop.f32.mrf.mxu1 }
 0x37a   : > { %v4797_v25 = vadd.f32 %v6374_v36, %v8393_v22 }
 0x37b   : > { %v8378_v5 = vpop.f32.mrf.mxu1 }
 0x37c   : > { %v4789_v0 = vadd.f32 %v8393_v22, %v8378_v5 }
 0x37d   : > { %v8380_v32 = vpop.f32.mrf.mxu1 }
 0x37e   : > { %v4800_v36 = vadd.f32 %v8380_v32, %v8393_v22 }
 0x37f   : > { %v8382_v54 = vpop.f32.mrf.mxu1 }
 0x380   : > { %v4792_v5 = vadd.f32 %v8393_v22, %v8382_v54 }
 0x381   : > { %v8384_v45 = vpop.f32.mrf.mxu1 }
 0x383   : > { %v8386_v31 = vpop.f32.mrf.mxu1 }
 0x385   : > { %v8388_v8 = vpop.f32.mrf.mxu1 }
 0x387   : > { %v8395_v51 = vpop.f32.mrf.mxu1 }
 0x389   : > { %v8403_v58 = vpop.f32.mrf.mxu1 }
 0x38b   : > { %v8409_v44 = vpop.f32.mrf.mxu1 }
 0x38d   : > { %v8419_v63 = vpop.f32.mrf.mxu1 }
 0x38f   : > { %v8426_v62 = vpop.f32.mrf.mxu1 }
 0x391   : > { %v8435_v33 = vpop.f32.mrf.mxu1 }
 0x393   : > { %v8443_v59 = vpop.f32.mrf.mxu1 }
 0x395   : > { %v8455_v32 = vpop.f32.mrf.mxu1 }
 0x3f4   : > { %v6318_v7 = vpop.f32.mrf.mxu0 }
 0x3f5   : > { %v4533_v46 = vadd.f32 %v6318_v7, %v8400_v47 }
 0x3f6   : > { %v4524_v48 = vpop.f32.mrf.mxu0 }
 0x3f7   : > { %v4885_v55 = vadd.f32 %v4765_v42, %v4533_v46  ;;  %v4525_v4 = vadd.f32 %v8400_v47, %v4524_v48 }
 0x3f8   : > { %v6319_v41 = vpop.f32.mrf.mxu0 }
 0x3f9   : > { %v4917_v49 = vmax.f32 %v4885_v55, 0.0  ;;  %v4883_v1 = vadd.f32 %v4757_v11, %v4525_v4  ;;  %v4536_v61 = vadd.f32 %v6319_v41, %v8400_v47  ;;  %v4813_v55 = vadd.f32 %v8384_v45, %v8393_v22 }
 0x3fa   : > { %v4527_v12 = vpop.f32.mrf.mxu0 }
 0x3fb   : > { %4949 = vst [vmem:[%s8414_s1 + $0x10] sm:$0xff] %v4917_v49  ;;  %v4915_v14 = vmax.f32 %v4883_v1, 0.0  ;;  %v4886_v30 = vadd.f32 %v4768_v56, %v4536_v61  ;;  %v4528_v34 = vadd.f32 %v8400_v47, %v4527_v12 }
 0x3fc   : > { %v6322_v29 = vpop.f32.mrf.mxu0 }
 0x3fd   : > { %4947 = vst [vmem:[%s8414_s1] sm:$0xff] %v4915_v14  ;;  %v4918_v40 = vmax.f32 %v4886_v30, 0.0  ;;  %v4884_v35 = vadd.f32 %v4760_v15, %v4528_v34  ;;  %v4549_v21 = vadd.f32 %v6322_v29, %v8400_v47  ;;  %v4805_v15 = vadd.f32 %v8393_v22, %v8386_v31  ;;  %v4839_v30 = vpop.f32.mrf.mxu1 }
 0x3fe   : > { %v4540_v50 = vpop.f32.mrf.mxu0  ;;  %v4816_v34 = vadd.f32 %v8388_v8, %v8393_v22 }
 0x3ff   : > { %4950 = vst [vmem:[%s8414_s1 + $0x18] sm:$0xff] %v4918_v40  ;;  %v4916_v39 = vmax.f32 %v4884_v35, 0.0  ;;  %v4889_v60 = vadd.f32 %v4781_v17, %v4549_v21  ;;  %v4541_v2 = vadd.f32 %v8400_v47, %v4540_v50  ;;  %v4808_v21 = vadd.f32 %v8393_v22, %v8395_v51  ;;  %v6390_v8 = vpop.f32.mrf.mxu1 }
 0x400   : > { %v6323_v18 = vpop.f32.mrf.mxu0  ;;  %v4821_v51 = vadd.f32 %v8393_v22, %v8409_v44 }
 0x401   : > { %4948 = vst [vmem:[%s8414_s1 + $0x8] sm:$0xff] %v4916_v39  ;;  %v4921_v3 = vmax.f32 %v4889_v60, 0.0  ;;  %v4887_v19 = vadd.f32 %v4773_v57, %v4541_v2  ;;  %v4552_v13 = vadd.f32 %v6323_v18, %v8400_v47  ;;  %v4829_v57 = vadd.f32 %v8403_v58, %v8393_v22 }
 0x402   : > { %v4543_v27 = vpop.f32.mrf.mxu0 }
 0x403   : > { %4953 = vst [vmem:[%s8414_s1 + $0x30] sm:$0xff] %v4921_v3  ;;  %v4919_v6 = vmax.f32 %v4887_v19, 0.0  ;;  %v4890_v28 = vadd.f32 %v4784_v53, %v4552_v13  ;;  %v4544_v16 = vadd.f32 %v8400_v47, %v4543_v27 }
 0x404   : > { %v6326_v9 = vpop.f32.mrf.mxu0 }
 0x405   : > { %4951 = vst [vmem:[%s8414_s1 + $0x20] sm:$0xff] %v4919_v6  ;;  %v4922_v38 = vmax.f32 %v4890_v28, 0.0  ;;  %v4888_v26 = vadd.f32 %v4776_v37, %v4544_v16  ;;  %v4565_v23 = vadd.f32 %v6326_v9, %v8400_v47  ;;  %v4852_v6 = vpop.f32.mrf.mxu1 }
 0x406   : > { %v4556_v43 = vpop.f32.mrf.mxu0 }
 0x407   : > { %4954 = vst [vmem:[%s8414_s1 + $0x38] sm:$0xff] %v4922_v38  ;;  %v4920_v52 = vmax.f32 %v4888_v26, 0.0  ;;  %v4893_v10 = vadd.f32 %v4797_v25, %v4565_v23  ;;  %v4557_v24 = vadd.f32 %v8400_v47, %v4556_v43  ;;  %v4832_v25 = vadd.f32 %v8419_v63, %v8393_v22  ;;  %v6391_v63 = vpop.f32.mrf.mxu1 }
 0x408   : > { %v6327_v20 = vpop.f32.mrf.mxu0  ;;  %v4824_v38 = vadd.f32 %v8393_v22, %v8426_v62  ;;  %v4845_v23 = vadd.f32 %v8435_v33, %v8393_v22  ;;  %v4837_v62 = vadd.f32 %v8393_v22, %v8443_v59 }
 0x409   : > { %4952 = vst [vmem:[%s8414_s1 + $0x28] sm:$0xff] %v4920_v52  ;;  %v4925_v42 = vmax.f32 %v4893_v10, 0.0  ;;  %v4891_v7 = vadd.f32 %v4789_v0, %v4557_v24  ;;  %v4568_v46 = vadd.f32 %v6327_v20, %v8400_v47 }
 0x40a   : > { %v4559_v48 = vpop.f32.mrf.mxu0 }
 0x40b   : > { %4957 = vst [vmem:[%s8414_s1 + $0x50] sm:$0xff] %v4925_v42  ;;  %v4923_v11 = vmax.f32 %v4891_v7, 0.0  ;;  %v4894_v4 = vadd.f32 %v4800_v36, %v4568_v46  ;;  %v4560_v41 = vadd.f32 %v8400_v47, %v4559_v48  ;;  %v4848_v48 = vadd.f32 %v8455_v32, %v8393_v22 }
 0x40c   : > { %v6330_v56 = vpop.f32.mrf.mxu0 }
 0x40d   : > { %4955 = vst [vmem:[%s8414_s1 + $0x40] sm:$0xff] %v4923_v11  ;;  %v4926_v49 = vmax.f32 %v4894_v4, 0.0  ;;  %v4892_v1 = vadd.f32 %v4792_v5, %v4560_v41  ;;  %v4581_v61 = vadd.f32 %v6330_v56, %v8400_v47  ;;  %v4855_v5 = vpop.f32.mrf.mxu1  ;;  %v4840_v41 = vadd.f32 %v8393_v22, %v4839_v30 }
 0x40e   : > { %v4572_v54 = vpop.f32.mrf.mxu0 }
 0x40f   : > { %4958 = vst [vmem:[%s8414_s1 + $0x58] sm:$0xff] %v4926_v49  ;;  %v4924_v12 = vmax.f32 %v4892_v1, 0.0  ;;  %v4897_v45 = vadd.f32 %v4813_v55, %v4581_v61  ;;  %v4573_v14 = vadd.f32 %v8400_v47, %v4572_v54  ;;  %v4861_v49 = vadd.f32 %v6390_v8, %v8393_v22 }
 0x410   : > { %v6331_v17 = vpop.f32.mrf.mxu0 }
 0x411   : > { %4956 = vst [vmem:[%s8414_s1 + $0x48] sm:$0xff] %v4924_v12  ;;  %v4929_v29 = vmax.f32 %v4897_v45, 0.0  ;;  %v4895_v40 = vadd.f32 %v4805_v15, %v4573_v14  ;;  %v4584_v35 = vadd.f32 %v6331_v17, %v8400_v47  ;;  %v6394_v15 = vpop.f32.mrf.mxu1  ;;  %v4853_v17 = vadd.f32 %v8393_v22, %v4852_v6 }
 0x412   : > { %v4575_v31 = vpop.f32.mrf.mxu0  ;;  %v4877_v8 = vadd.f32 %v6394_v15, %v8393_v22 }
 0x413   : > { %4961 = vst [vmem:[%s8414_s1 + $0x70] sm:$0xff] %v4929_v29  ;;  %v4927_v50 = vmax.f32 %v4895_v40, 0.0  ;;  %v4898_v39 = vadd.f32 %v4816_v34, %v4584_v35  ;;  %v4576_v60 = vadd.f32 %v8400_v47, %v4575_v31  ;;  %v4868_v35 = vpop.f32.mrf.mxu1 }
 0x414   : > { %v6334_v2 = vpop.f32.mrf.mxu0 }
 0x415   : > { %4959 = vst [vmem:[%s8414_s1 + $0x60] sm:$0xff] %v4927_v50  ;;  %v4930_v18 = vmax.f32 %v4898_v39, 0.0  ;;  %v4896_v53 = vadd.f32 %v4808_v21, %v4576_v60  ;;  %v4597_v3 = vadd.f32 %v6334_v2, %v8400_v47  ;;  %v4864_v21 = vadd.f32 %v6391_v63, %v8393_v22 }
 0x416   : > { %v4588_v19 = vpop.f32.mrf.mxu0  ;;  %v4856_v39 = vadd.f32 %v8393_v22, %v4855_v5 }
 0x417   : > { %4962 = vst [vmem:[%s8414_s1 + $0x78] sm:$0xff] %v4930_v18  ;;  %v4928_v13 = vmax.f32 %v4896_v53, 0.0  ;;  %v4901_v37 = vadd.f32 %v4829_v57, %v4597_v3  ;;  %v4589_v58 = vadd.f32 %v8400_v47, %v4588_v19  ;;  %v6395_v3 = vpop.f32.mrf.mxu1 }
 0x418   : > { %v6335_v27 = vpop.f32.mrf.mxu0 }
 0x419   : > { %4960 = vst [vmem:[%s8414_s1 + $0x68] sm:$0xff] %v4928_v13  ;;  %v4933_v28 = vmax.f32 %v4901_v37, 0.0  ;;  %v4899_v16 = vadd.f32 %v4821_v51, %v4589_v58  ;;  %v4600_v9 = vadd.f32 %v6335_v27, %v8400_v47  ;;  %v4869_v27 = vadd.f32 %v8393_v22, %v4868_v35 }
 0x41a   : > { %v4591_v44 = vpop.f32.mrf.mxu0 }
 0x41b   : > { %4965 = vst [vmem:[%s8414_s1 + $0x90] sm:$0xff] %v4933_v28  ;;  %v4931_v26 = vmax.f32 %v4899_v16, 0.0  ;;  %v4902_v43 = vadd.f32 %v4832_v25, %v4600_v9  ;;  %v4592_v0 = vadd.f32 %v8400_v47, %v4591_v44  ;;  %v4871_v16 = vpop.f32.mrf.mxu1 }
 0x41c   : > { %v6338_v52 = vpop.f32.mrf.mxu0 }
 0x41d   : > { %4963 = vst [vmem:[%s8414_s1 + $0x80] sm:$0xff] %v4931_v26  ;;  %v4934_v10 = vmax.f32 %v4902_v43, 0.0  ;;  %v4900_v24 = vadd.f32 %v4824_v38, %v4592_v0  ;;  %v4613_v20 = vadd.f32 %v6338_v52, %v8400_v47  ;;  %v4880_v38 = vadd.f32 %v6395_v3, %v8393_v22 }
 0x41e   : > { %v4604_v36 = vpop.f32.mrf.mxu0  ;;  %v4872_v0 = vadd.f32 %v8393_v22, %v4871_v16 }
 0x41f   : > { %4966 = vst [vmem:[%s8414_s1 + $0x98] sm:$0xff] %v4934_v10  ;;  %v4932_v42 = vmax.f32 %v4900_v24, 0.0  ;;  %v4905_v7 = vadd.f32 %v4845_v23, %v4613_v20  ;;  %v4605_v33 = vadd.f32 %v8400_v47, %v4604_v36 }
 0x420   : > { %v6339_v46 = vpop.f32.mrf.mxu0 }
 0x421   : > { %4964 = vst [vmem:[%s8414_s1 + $0x88] sm:$0xff] %v4932_v42  ;;  %v4937_v11 = vmax.f32 %v4905_v7, 0.0  ;;  %v4903_v55 = vadd.f32 %v4837_v62, %v4605_v33  ;;  %v4616_v4 = vadd.f32 %v6339_v46, %v8400_v47 }
 0x422   : > { %v4607_v56 = vpop.f32.mrf.mxu0 }
 0x423   : > { %4969 = vst [vmem:[%s8414_s1 + $0xb0] sm:$0xff] %v4937_v11  ;;  %v4935_v59 = vmax.f32 %v4903_v55, 0.0  ;;  %v4906_v1 = vadd.f32 %v4848_v48, %v4616_v4  ;;  %v4608_v61 = vadd.f32 %v8400_v47, %v4607_v56 }
 0x424   : > { %v6342_v54 = vpop.f32.mrf.mxu0 }
 0x425   : > { %4967 = vst [vmem:[%s8414_s1 + $0xa0] sm:$0xff] %v4935_v59  ;;  %v4938_v32 = vmax.f32 %v4906_v1, 0.0  ;;  %v4904_v12 = vadd.f32 %v4840_v41, %v4608_v61  ;;  %v4629_v45 = vadd.f32 %v6342_v54, %v8400_v47 }
 0x426   : > { %v4620_v14 = vpop.f32.mrf.mxu0 }
 0x427   : > { %4970 = vst [vmem:[%s8414_s1 + $0xb8] sm:$0xff] %v4938_v32  ;;  %v4936_v30 = vmax.f32 %v4904_v12, 0.0  ;;  %v4909_v34 = vadd.f32 %v4861_v49, %v4629_v45  ;;  %v4621_v29 = vadd.f32 %v8400_v47, %v4620_v14 }
 0x428   : > { %v6343_v40 = vpop.f32.mrf.mxu0 }
 0x429   : > { %4968 = vst [vmem:[%s8414_s1 + $0xa8] sm:$0xff] %v4936_v30  ;;  %v4941_v31 = vmax.f32 %v4909_v34, 0.0  ;;  %v4907_v50 = vadd.f32 %v4853_v17, %v4621_v29  ;;  %v4632_v57 = vadd.f32 %v6343_v40, %v8400_v47 }
 0x42a   : > { %v4623_v60 = vpop.f32.mrf.mxu0 }
 0x42b   : > { %4973 = vst [vmem:[%s8414_s1 + $0xd0] sm:$0xff] %v4941_v31  ;;  %v4939_v2 = vmax.f32 %v4907_v50, 0.0  ;;  %v4910_v18 = vadd.f32 %v4864_v21, %v4632_v57  ;;  %v4624_v53 = vadd.f32 %v8400_v47, %v4623_v60 }
 0x42c   : > { %v6346_v19 = vpop.f32.mrf.mxu0 }
 0x42d   : > { %4971 = vst [vmem:[%s8414_s1 + $0xc0] sm:$0xff] %v4939_v2  ;;  %v4942_v51 = vmax.f32 %v4910_v18, 0.0  ;;  %v4908_v13 = vadd.f32 %v4856_v39, %v4624_v53  ;;  %v4645_v37 = vadd.f32 %v6346_v19, %v8400_v47 }
 0x42e   : > { %v4636_v58 = vpop.f32.mrf.mxu0 }
 0x42f   : > { %4974 = vst [vmem:[%s8414_s1 + $0xd8] sm:$0xff] %v4942_v51  ;;  %v4940_v6 = vmax.f32 %v4908_v13, 0.0  ;;  %v4913_v25 = vadd.f32 %v4877_v8, %v4645_v37  ;;  %v4637_v28 = vadd.f32 %v8400_v47, %v4636_v58 }
 0x430   : > { %v6347_v9 = vpop.f32.mrf.mxu0 }
 0x431   : > { %4972 = vst [vmem:[%s8414_s1 + $0xc8] sm:$0xff] %v4940_v6  ;;  %v4945_v44 = vmax.f32 %v4913_v25, 0.0  ;;  %v4911_v26 = vadd.f32 %v4869_v27, %v4637_v28  ;;  %v4648_v23 = vadd.f32 %v6347_v9, %v8400_v47 }
 0x432   : > { %v4639_v43 = vpop.f32.mrf.mxu0 }
 0x433   : > { %4977 = vst [vmem:[%s8414_s1 + $0xf0] sm:$0xff] %v4945_v44  ;;  %v4943_v52 = vmax.f32 %v4911_v26, 0.0  ;;  %v4914_v63 = vadd.f32 %v4880_v38, %v4648_v23  ;;  %v4640_v10 = vadd.f32 %v8400_v47, %v4639_v43 }
 0x435   : > { %4975 = vst [vmem:[%s8414_s1 + $0xe0] sm:$0xff] %v4943_v52  ;;  %v4946_v24 = vmax.f32 %v4914_v63, 0.0  ;;  %v4912_v20 = vadd.f32 %v4872_v0, %v4640_v10 }
 0x437   : > { %4978 = vst [vmem:[%s8414_s1 + $0xf8] sm:$0xff] %v4946_v24  ;;  %v4944_v22 = vmax.f32 %v4912_v20, 0.0 }
 0x439   : > { %4976 = vst [vmem:[%s8414_s1 + $0xe8] sm:$0xff] %v4944_v22 }
 0x43a   : > { %6763 = shalt.err (!%p6760_p5)
}
 0x43b   : > { %s6764_s20 = scalar_lea.hbm %s8532_s15, 4096  ;;  %s6768_s28 = scalar_lea.hbm %s8588_s9, 8192 }
 0x43c   : > { %p6765_p6 = scmp.ne.s32.totalorder %s8532_s15, %s6764_s20  ;;  %p6769_p9 = scmp.lt.s32.totalorder %s8532_s15, %s8588_s9 }
 0x43d   : > { %p6770_p2 = scmp.lt.s32.totalorder %s6768_s28, %s6764_s20 }
 0x43e   : > { %p6766_p4 = pnand %p6765_p6, %p8822_p12 }
 0x43f   : > { %p6771_p3 = por %p6770_p2, %p6769_p9 }
 0x440   : > { %p6767_p8 = pneg %p6766_p4 }
 0x442   : > { %p6772_p10 = pnand %p6771_p3, %p6767_p8 }
 0x444   : > { %6775 = shalt.err (!%p6772_p10)
}
 0x445   : > { %s6835_s22 = smov 128   ;;  %s6836_s24 = smov 8  }
 0x446   : > { %6414 = dma.vmem_to_hbm [thread:$0]  (%p8822_p12), %s8534_s3, 4096, %s8532_s15, %s4980_s17, %s6835_s22, %s6835_s22, %s6836_s24  }
 0x447 PF: > { %s5008_s26 = sand.u32 1, %s6810_s30   ;;  %p8823_p7 = scmp.ne.s32.totalorder %s8633_s16, 0 }
 0x448   : > { %p8824_p1 = scmp.ge.s32.totalorder %s6822_s12, 2  ;;  %s5009_s13 = scalar_lea.sflag [#allocation5], %s5008_s26 }
 0x44a   : > { %p6434_p13 = pnand %p8824_p1, %p8823_p7 }
 0x44c   : > { %p6435_p0 = pneg %p6434_p13 }
 0x44e   : > { %6805 = dma.done.wait (%p6435_p0), %s5009_s13, 4096  }
 0x44f   : > { %6807 = vsyncadd (%p6435_p0), %s5009_s13, 4294963200  ;;  %p24_p11 = scmp.ge.s32.totalorder %s6987_s18, 4   ;;  %s8825_s30 = smov %s6814_s10 }
 0x450   : > { %s8826_s10 = smov %s6818_s11  ;;  %s8827_s11 = smov %s7003_s23 }
 0x451   : > { %s8828_s12 = smov %s6987_s18  ;;  %26 = sbr.rel (!%p24_p11) target bundleno = 11 (0xb), region = 125 }
 0x456   :  { %5014 = vsyncpa [#allocation4], 1 }
 0x457   :  { %5016 = vsyncpa [#allocation4 + $0x1], 1 }
 0x458   :  { %5017 = vsyncpa [#allocation7], 1 }
 0x459   :  { %5018 = vsyncpa [#allocation10], 1 }
 0x45a   :  { %5019 = vsyncpa [#allocation5], 1 }
 0x45b   :  { %5021 = vsyncpa [#allocation5 + $0x1], 1 }

</bundles_post_ra>
